<compile_context>
chip_gen: v7x
topology: tpu7x:2x2x1
jax: 0.10.0
libtpu: 0.0.40
codegen_flags: <defaults>
</compile_context>

<pallas_src>
import math
import jax
import jax.numpy as jnp
from jax.experimental import pallas as pl
from jax.experimental.pallas import tpu as pltpu

D = 48          # layer_size
HEADS = 6
HEAD = D // HEADS
HIDDEN = 2048   # FeedForward default hidden_size
EPS = 1e-6
NEG = -1e9


# ---------------- helpers traced inside the Pallas kernel ----------------

def _layernorm(x, alpha, bias):
    # torch's Normalize: x.std() is the UNBIASED std (divisor N-1)
    mean = jnp.mean(x, axis=-1, keepdims=True)
    xc = x - mean
    var = jnp.sum(xc * xc, axis=-1, keepdims=True) * (1.0 / (x.shape[-1] - 1))
    inv = 1.0 / (jnp.sqrt(var) + EPS)          # one divide per row, broadcast multiply
    return alpha * (xc * inv) + bias


def _mha(xq, xkv, mask, B, Sq, Sk, wq, wk, wv, wo, bo):
    # xq: (B*Sq, D) batch-folded queries, xkv: (B*Sk, D), mask: (B, Sq, Sk)
    scale = 1.0 / math.sqrt(HEAD)
    # Batch-folded projections: M = B*S keeps the MXU fuller than per-batch M = S.
    q = jnp.dot(xq, wq, preferred_element_type=jnp.float32) * scale   # scale folded once
    k = jnp.dot(xkv, wk, preferred_element_type=jnp.float32)
    v = jnp.dot(xkv, wv, preferred_element_type=jnp.float32)

    per_batch = []
    for b in range(B):                              # static python loop (B is tiny)
        qb = q[b * Sq:(b + 1) * Sq, :]
        kb = k[b * Sk:(b + 1) * Sk, :]
        vb = v[b * Sk:(b + 1) * Sk, :]
        # additive mask bias, computed once per (attention, batch) -- hoisted out of heads
        bias = jnp.where(mask[b] == 0, NEG, 0.0)    # (Sq, Sk)
        acc = None
        for h in range(HEADS):                      # static python loop over heads
            sl = slice(h * HEAD, (h + 1) * HEAD)
            s = jax.lax.dot_general(qb[:, sl], kb[:, sl], (((1,), (1,)), ((), ())),
                                    preferred_element_type=jnp.float32) + bias
            s = s - jnp.max(s, axis=-1, keepdims=True)
            e = jnp.exp(s)
            p = e * pl.reciprocal(jnp.sum(e, axis=-1, keepdims=True), approx=True)
            # dropout on attention probs = identity (inference)
            # fuse the output projection per head and accumulate (no concat / relayout)
            term = jnp.dot(jnp.dot(p, vb[:, sl], preferred_element_type=jnp.float32),
                           wo[sl, :], preferred_element_type=jnp.float32)
            acc = term if acc is None else acc + term
        per_batch.append(acc)
    out = per_batch[0] if B == 1 else jnp.concatenate(per_batch, axis=0)   # (B*Sq, D)
    return out + bo


# ------------------------------ fused decoder-layer kernel ------------------------------

def make_decoder_kernel(B, S, Se):
    def kernel(x_ref, enc_ref, tmask_ref, smask_ref,
               a1_ref, n1b_ref, a2_ref, n2b_ref, a3_ref, n3b_ref,
               wq1_ref, wk1_ref, wv1_ref, wo1_ref, bo1_ref,
               wq2_ref, wk2_ref, wv2_ref, wo2_ref, bo2_ref,
               w1_ref, bf1_ref, w2_ref, bf2_ref,
               out_ref):
        x = x_ref[...]            # (B*S, D)  batch folded into rows
        enc = enc_ref[...]        # (B*Se, D)
        tmask = tmask_ref[...]    # (B, S, S)
        smask = smask_ref[...]    # (B, S, Se)

        # --- block 1: self attention (dropout_1 = identity) ---
        xt = _layernorm(x, a1_ref[...], n1b_ref[...])
        x = x + _mha(xt, xt, tmask, B, S, S,
                     wq1_ref[...], wk1_ref[...], wv1_ref[...], wo1_ref[...], bo1_ref[...])

        # --- block 2: cross attention with encoder output (dropout_2 = identity) ---
        xt = _layernorm(x, a2_ref[...], n2b_ref[...])
        x = x + _mha(xt, enc, smask, B, S, Se,
                     wq2_ref[...], wk2_ref[...], wv2_ref[...], wo2_ref[...], bo2_ref[...])

        # --- block 3: feed forward (dropout_3 & internal dropout = identity) ---
        xt = _layernorm(x, a3_ref[...], n3b_ref[...])
        h = jnp.maximum(
            jnp.dot(xt, w1_ref[...], preferred_element_type=jnp.float32) + bf1_ref[...],
            0.0)
        x = x + jnp.dot(h, w2_ref[...], preferred_element_type=jnp.float32) + bf2_ref[...]

        out_ref[...] = x

    return kernel


# ------------------------------------- wrapper -------------------------------------

def decoder_layer(x, encoded, source_mask, target_mask, p):
    B, S, _ = x.shape
    Se = encoded.shape[1]

    # Fold batch into the matmul M dimension before entering the kernel.
    x2 = x.reshape(B * S, D)
    enc2 = encoded.reshape(B * Se, D)

    weight_args = [
        p["alpha1"], p["nbias1"], p["alpha2"], p["nbias2"], p["alpha3"], p["nbias3"],
        p["wq1"], p["wk1"], p["wv1"], p["wo1"], p["bo1"],
        p["wq2"], p["wk2"], p["wv2"], p["wo2"], p["bo2"],
        p["w1"], p["bf1"], p["w2"], p["bf2"],
    ]

    # Single invocation, no grid: every operand (<1 MiB total) is placed whole in VMEM,
    # eliminating per-grid-step pipeline overhead for this tiny, latency-bound problem.
    out2 = pl.pallas_call(
        make_decoder_kernel(B, S, Se),
        out_shape=jax.ShapeDtypeStruct((B * S, D), jnp.float32),
        compiler_params=pltpu.CompilerParams(vmem_limit_bytes=32 * 1024 * 1024),
    )(x2, enc2, target_mask, source_mask, *weight_args)

    return out2.reshape(B, S, D)


# ------------------------------ deterministic parameter init ------------------------------

def init_params(key):
    ks = jax.random.split(key, 14)

    def lin_w(k, fan_in, fan_out):
        # nn.Linear default init U(-1/sqrt(fan_in), 1/sqrt(fan_in)); stored transposed (in, out)
        b = 1.0 / math.sqrt(fan_in)
        return jax.random.uniform(k, (fan_in, fan_out), jnp.float32, -b, b)

    def lin_b(k, fan_in, fan_out):
        b = 1.0 / math.sqrt(fan_in)
        return jax.random.uniform(k, (1, fan_out), jnp.float32, -b, b)

    p = {}
    # Normalize params (module init: ones / zeros)
    for i in (1, 2, 3):
        p[f"alpha{i}"] = jnp.ones((1, D), jnp.float32)
        p[f"nbias{i}"] = jnp.zeros((1, D), jnp.float32)
    # attention 1
    p["wq1"] = lin_w(ks[0], D, D); p["wk1"] = lin_w(ks[1], D, D); p["wv1"] = lin_w(ks[2], D, D)
    p["wo1"] = lin_w(ks[3], D, D); p["bo1"] = lin_b(ks[4], D, D)
    # attention 2
    p["wq2"] = lin_w(ks[5], D, D); p["wk2"] = lin_w(ks[6], D, D); p["wv2"] = lin_w(ks[7], D, D)
    p["wo2"] = lin_w(ks[8], D, D); p["bo2"] = lin_b(ks[9], D, D)
    # feed forward
    p["w1"] = lin_w(ks[10], D, HIDDEN); p["bf1"] = lin_b(ks[11], D, HIDDEN)
    p["w2"] = lin_w(ks[12], HIDDEN, D); p["bf2"] = lin_b(ks[13], HIDDEN, D)
    return p


# ------------------------------ pure-JAX reference (for validation) ------------------------------

def reference(x, encoded, source_mask, target_mask, p):
    hi = jax.lax.Precision.HIGHEST

    def ln(x, a, b):
        mean = x.mean(-1, keepdims=True)
        var = ((x - mean) ** 2).sum(-1, keepdims=True) / (x.shape[-1] - 1)
        return a * (x - mean) / (jnp.sqrt(var) + EPS) + b

    def mha(xq, xkv, mask, wq, wk, wv, wo, bo):
        B, Sq, _ = xq.shape
        Sk = xkv.shape[1]
        q = jnp.matmul(xq, wq, precision=hi).reshape(B, Sq, HEADS, HEAD).transpose(0, 2, 1, 3)
        k = jnp.matmul(xkv, wk, precision=hi).reshape(B, Sk, HEADS, HEAD).transpose(0, 2, 1, 3)
        v = jnp.matmul(xkv, wv, precision=hi).reshape(B, Sk, HEADS, HEAD).transpose(0, 2, 1, 3)
        s = jnp.einsum('bhqd,bhkd->bhqk', q, k, precision=hi) / math.sqrt(HEAD)
        s = jnp.where(mask[:, None] == 0, NEG, s)
        s = jax.nn.softmax(s, axis=-1)
        o = jnp.einsum('bhqk,bhkd->bhqd', s, v, precision=hi).transpose(0, 2, 1, 3).reshape(B, Sq, D)
        return jnp.matmul(o, wo, precision=hi) + bo

    xt = ln(x, p["alpha1"], p["nbias1"])
    x = x + mha(xt, xt, target_mask, p["wq1"], p["wk1"], p["wv1"], p["wo1"], p["bo1"])
    xt = ln(x, p["alpha2"], p["nbias2"])
    x = x + mha(xt, encoded, source_mask, p["wq2"], p["wk2"], p["wv2"], p["wo2"], p["bo2"])
    xt = ln(x, p["alpha3"], p["nbias3"])
    h = jnp.maximum(jnp.matmul(xt, p["w1"], precision=hi) + p["bf1"], 0.0)
    return x + jnp.matmul(h, p["w2"], precision=hi) + p["bf2"]


if __name__ == "__main__":
    key = jax.random.PRNGKey(0)
    B, S, Se = 2, 8, 12
    kx, ke, km, kp = jax.random.split(key, 4)

    x = jax.random.normal(kx, (B, S, D), jnp.float32)
    encoded = jax.random.normal(ke, (B, Se, D), jnp.float32)
    # causal target mask, random (mostly-keep) source mask; 1.0 = attend, 0.0 = masked
    target_mask = jnp.broadcast_to(jnp.tril(jnp.ones((S, S), jnp.float32)), (B, S, S))
    source_mask = (jax.random.uniform(km, (B, S, Se)) > 0.1).astype(jnp.float32)
    source_mask = source_mask.at[:, :, 0].set(1.0)  # at least one visible key per query

    params = init_params(kp)

    out = decoder_layer(x, encoded, source_mask, target_mask, params)
    out = jax.block_until_ready(out)

    ref = reference(x, encoded, source_mask, target_mask, params)
    err = float(jnp.max(jnp.abs(out - ref)))
    assert out.shape == (B, S, D) and out.dtype == jnp.float32
    # slightly looser than before to leave headroom for the EUP approx reciprocal in softmax
    assert err < 5e-3, f"max abs error {err}"
    print("KERNEL_OK")
</pallas_src>

<mosaic_0001>
module attributes {stable_mosaic.version = 11 : i64} {
  func.func @kernel(%arg0: memref<16x48xf32, #tpu.memory_space<vmem>>, %arg1: memref<24x48xf32, #tpu.memory_space<vmem>>, %arg2: memref<2x8x8xf32, #tpu.memory_space<vmem>>, %arg3: memref<2x8x12xf32, #tpu.memory_space<vmem>>, %arg4: memref<1x48xf32, #tpu.memory_space<vmem>>, %arg5: memref<1x48xf32, #tpu.memory_space<vmem>>, %arg6: memref<1x48xf32, #tpu.memory_space<vmem>>, %arg7: memref<1x48xf32, #tpu.memory_space<vmem>>, %arg8: memref<1x48xf32, #tpu.memory_space<vmem>>, %arg9: memref<1x48xf32, #tpu.memory_space<vmem>>, %arg10: memref<48x48xf32, #tpu.memory_space<vmem>>, %arg11: memref<48x48xf32, #tpu.memory_space<vmem>>, %arg12: memref<48x48xf32, #tpu.memory_space<vmem>>, %arg13: memref<48x48xf32, #tpu.memory_space<vmem>>, %arg14: memref<1x48xf32, #tpu.memory_space<vmem>>, %arg15: memref<48x48xf32, #tpu.memory_space<vmem>>, %arg16: memref<48x48xf32, #tpu.memory_space<vmem>>, %arg17: memref<48x48xf32, #tpu.memory_space<vmem>>, %arg18: memref<48x48xf32, #tpu.memory_space<vmem>>, %arg19: memref<1x48xf32, #tpu.memory_space<vmem>>, %arg20: memref<48x2048xf32, #tpu.memory_space<vmem>>, %arg21: memref<1x2048xf32, #tpu.memory_space<vmem>>, %arg22: memref<2048x48xf32, #tpu.memory_space<vmem>>, %arg23: memref<1x48xf32, #tpu.memory_space<vmem>>, %arg24: memref<16x48xf32, #tpu.memory_space<vmem>>) attributes {dimension_semantics = [], scalar_prefetch = 0 : i64, scratch_operands = 0 : i64, tpu.core_type = #tpu.core_type<tc>} {
    %c0 = arith.constant 0 : index
    %c0_0 = arith.constant 0 : index
    %0 = vector.load %arg0[%c0, %c0_0] : memref<16x48xf32, #tpu.memory_space<vmem>>, vector<16x48xf32>
    %c0_1 = arith.constant 0 : index
    %c0_2 = arith.constant 0 : index
    %1 = vector.load %arg1[%c0_1, %c0_2] : memref<24x48xf32, #tpu.memory_space<vmem>>, vector<24x48xf32>
    %c0_3 = arith.constant 0 : index
    %c0_4 = arith.constant 0 : index
    %c0_5 = arith.constant 0 : index
    %2 = vector.load %arg2[%c0_3, %c0_4, %c0_5] : memref<2x8x8xf32, #tpu.memory_space<vmem>>, vector<2x8x8xf32>
    %c0_6 = arith.constant 0 : index
    %c0_7 = arith.constant 0 : index
    %c0_8 = arith.constant 0 : index
    %3 = vector.load %arg3[%c0_6, %c0_7, %c0_8] : memref<2x8x12xf32, #tpu.memory_space<vmem>>, vector<2x8x12xf32>
    %c0_9 = arith.constant 0 : index
    %c0_10 = arith.constant 0 : index
    %4 = vector.load %arg4[%c0_9, %c0_10] : memref<1x48xf32, #tpu.memory_space<vmem>>, vector<1x48xf32>
    %c0_11 = arith.constant 0 : index
    %c0_12 = arith.constant 0 : index
    %5 = vector.load %arg5[%c0_11, %c0_12] : memref<1x48xf32, #tpu.memory_space<vmem>>, vector<1x48xf32>
    %cst = arith.constant dense<0.000000e+00> : vector<16xf32>
    %6 = vector.multi_reduction <add>, %0, %cst [1] : vector<16x48xf32> to vector<16xf32>
    %7 = vector.shape_cast %6 : vector<16xf32> to vector<16x1xf32>
    %cst_13 = arith.constant 4.800000e+01 : f32
    %8 = vector.broadcast %cst_13 : f32 to vector<16x1xf32>
    %9 = arith.divf %7, %8 : vector<16x1xf32>
    %10 = vector.broadcast %9 : vector<16x1xf32> to vector<16x48xf32>
    %11 = arith.subf %0, %10 : vector<16x48xf32>
    %12 = arith.mulf %11, %11 : vector<16x48xf32>
    %cst_14 = arith.constant dense<0.000000e+00> : vector<16xf32>
    %13 = vector.multi_reduction <add>, %12, %cst_14 [1] : vector<16x48xf32> to vector<16xf32>
    %14 = vector.shape_cast %13 : vector<16xf32> to vector<16x1xf32>
    %cst_15 = arith.constant 0.0212765951 : f32
    %15 = vector.broadcast %cst_15 : f32 to vector<16x1xf32>
    %16 = arith.mulf %14, %15 : vector<16x1xf32>
    %17 = math.sqrt %16 : vector<16x1xf32>
    %cst_16 = arith.constant 9.99999997E-7 : f32
    %18 = vector.broadcast %cst_16 : f32 to vector<16x1xf32>
    %19 = arith.addf %17, %18 : vector<16x1xf32>
    %cst_17 = arith.constant 1.000000e+00 : f32
    %20 = vector.broadcast %cst_17 : f32 to vector<16x1xf32>
    %21 = arith.divf %20, %19 : vector<16x1xf32>
    %22 = vector.broadcast %21 : vector<16x1xf32> to vector<16x48xf32>
    %23 = arith.mulf %11, %22 : vector<16x48xf32>
    %24 = vector.broadcast %4 : vector<1x48xf32> to vector<16x48xf32>
    %25 = arith.mulf %24, %23 : vector<16x48xf32>
    %26 = vector.broadcast %5 : vector<1x48xf32> to vector<16x48xf32>
    %27 = arith.addf %25, %26 : vector<16x48xf32>
    %c0_18 = arith.constant 0 : index
    %c0_19 = arith.constant 0 : index
    %28 = vector.load %arg10[%c0_18, %c0_19] : memref<48x48xf32, #tpu.memory_space<vmem>>, vector<48x48xf32>
    %c0_20 = arith.constant 0 : index
    %c0_21 = arith.constant 0 : index
    %29 = vector.load %arg11[%c0_20, %c0_21] : memref<48x48xf32, #tpu.memory_space<vmem>>, vector<48x48xf32>
    %c0_22 = arith.constant 0 : index
    %c0_23 = arith.constant 0 : index
    %30 = vector.load %arg12[%c0_22, %c0_23] : memref<48x48xf32, #tpu.memory_space<vmem>>, vector<48x48xf32>
    %c0_24 = arith.constant 0 : index
    %c0_25 = arith.constant 0 : index
    %31 = vector.load %arg13[%c0_24, %c0_25] : memref<48x48xf32, #tpu.memory_space<vmem>>, vector<48x48xf32>
    %c0_26 = arith.constant 0 : index
    %c0_27 = arith.constant 0 : index
    %32 = vector.load %arg14[%c0_26, %c0_27] : memref<1x48xf32, #tpu.memory_space<vmem>>, vector<1x48xf32>
    %cst_28 = arith.constant dense<0.000000e+00> : vector<16x48xf32>
    %33 = tpu.matmul %27, %28, %cst_28 {dimension_numbers = #tpu.dot_dimension_numbers<[1], [0], [0], [1], [0, 0, 1, 1], [], []>} : vector<16x48xf32>, vector<48x48xf32>, vector<16x48xf32> -> vector<16x48xf32>
    %cst_29 = arith.constant 0.353553385 : f32
    %34 = vector.broadcast %cst_29 : f32 to vector<16x48xf32>
    %35 = arith.mulf %33, %34 : vector<16x48xf32>
    %cst_30 = arith.constant dense<0.000000e+00> : vector<16x48xf32>
    %36 = tpu.matmul %27, %29, %cst_30 {dimension_numbers = #tpu.dot_dimension_numbers<[1], [0], [0], [1], [0, 0, 1, 1], [], []>} : vector<16x48xf32>, vector<48x48xf32>, vector<16x48xf32> -> vector<16x48xf32>
    %cst_31 = arith.constant dense<0.000000e+00> : vector<16x48xf32>
    %37 = tpu.matmul %27, %30, %cst_31 {dimension_numbers = #tpu.dot_dimension_numbers<[1], [0], [0], [1], [0, 0, 1, 1], [], []>} : vector<16x48xf32>, vector<48x48xf32>, vector<16x48xf32> -> vector<16x48xf32>
    %38 = vector.extract_strided_slice %35 {offsets = [0, 0], sizes = [8, 48], strides = [1, 1]} : vector<16x48xf32> to vector<8x48xf32>
    %39 = vector.extract_strided_slice %36 {offsets = [0, 0], sizes = [8, 48], strides = [1, 1]} : vector<16x48xf32> to vector<8x48xf32>
    %40 = vector.extract_strided_slice %37 {offsets = [0, 0], sizes = [8, 48], strides = [1, 1]} : vector<16x48xf32> to vector<8x48xf32>
    %41 = vector.extract_strided_slice %2 {offsets = [0, 0, 0], sizes = [1, 8, 8], strides = [1, 1, 1]} : vector<2x8x8xf32> to vector<1x8x8xf32>
    %42 = vector.shape_cast %41 : vector<1x8x8xf32> to vector<8x8xf32>
    %cst_32 = arith.constant 0.000000e+00 : f32
    %43 = vector.broadcast %cst_32 : f32 to vector<8x8xf32>
    %44 = arith.cmpf oeq, %42, %43 : vector<8x8xf32>
    %cst_33 = arith.constant -1.000000e+09 : f32
    %cst_34 = arith.constant 0.000000e+00 : f32
    %45 = vector.broadcast %cst_33 : f32 to vector<8x8xf32>
    %46 = vector.broadcast %cst_34 : f32 to vector<8x8xf32>
    %47 = arith.select %44, %45, %46 : vector<8x8xi1>, vector<8x8xf32>
    %48 = vector.extract_strided_slice %38 {offsets = [0, 0], sizes = [8, 8], strides = [1, 1]} : vector<8x48xf32> to vector<8x8xf32>
    %49 = vector.extract_strided_slice %39 {offsets = [0, 0], sizes = [8, 8], strides = [1, 1]} : vector<8x48xf32> to vector<8x8xf32>
    %cst_35 = arith.constant dense<0.000000e+00> : vector<8x8xf32>
    %50 = tpu.matmul %48, %49, %cst_35 {dimension_numbers = #tpu.dot_dimension_numbers<[1], [1], [0], [0], [0, 0, 1, 0], [], []>} : vector<8x8xf32>, vector<8x8xf32>, vector<8x8xf32> -> vector<8x8xf32>
    %51 = arith.addf %50, %47 : vector<8x8xf32>
    %cst_36 = arith.constant dense<0xFF800000> : vector<8xf32>
    %52 = vector.multi_reduction <maximumf>, %51, %cst_36 [1] : vector<8x8xf32> to vector<8xf32>
    %53 = vector.shape_cast %52 : vector<8xf32> to vector<8x1xf32>
    %54 = vector.broadcast %53 : vector<8x1xf32> to vector<8x8xf32>
    %55 = arith.subf %51, %54 : vector<8x8xf32>
    %56 = math.exp %55 : vector<8x8xf32>
    %cst_37 = arith.constant dense<0.000000e+00> : vector<8xf32>
    %57 = vector.multi_reduction <add>, %56, %cst_37 [1] : vector<8x8xf32> to vector<8xf32>
    %58 = vector.shape_cast %57 : vector<8xf32> to vector<8x1xf32>
    %59 = tpu.reciprocal %58 {approx = true} : vector<8x1xf32> -> vector<8x1xf32>
    %60 = vector.broadcast %59 : vector<8x1xf32> to vector<8x8xf32>
    %61 = arith.mulf %56, %60 : vector<8x8xf32>
    %62 = vector.extract_strided_slice %40 {offsets = [0, 0], sizes = [8, 8], strides = [1, 1]} : vector<8x48xf32> to vector<8x8xf32>
    %cst_38 = arith.constant dense<0.000000e+00> : vector<8x8xf32>
    %63 = tpu.matmul %61, %62, %cst_38 {dimension_numbers = #tpu.dot_dimension_numbers<[1], [0], [0], [1], [0, 0, 1, 1], [], []>} : vector<8x8xf32>, vector<8x8xf32>, vector<8x8xf32> -> vector<8x8xf32>
    %64 = vector.extract_strided_slice %31 {offsets = [0, 0], sizes = [8, 48], strides = [1, 1]} : vector<48x48xf32> to vector<8x48xf32>
    %cst_39 = arith.constant dense<0.000000e+00> : vector<8x48xf32>
    %65 = tpu.matmul %63, %64, %cst_39 {dimension_numbers = #tpu.dot_dimension_numbers<[1], [0], [0], [1], [0, 0, 1, 1], [], []>} : vector<8x8xf32>, vector<8x48xf32>, vector<8x48xf32> -> vector<8x48xf32>
    %66 = vector.extract_strided_slice %38 {offsets = [0, 8], sizes = [8, 8], strides = [1, 1]} : vector<8x48xf32> to vector<8x8xf32>
    %67 = vector.extract_strided_slice %39 {offsets = [0, 8], sizes = [8, 8], strides = [1, 1]} : vector<8x48xf32> to vector<8x8xf32>
    %cst_40 = arith.constant dense<0.000000e+00> : vector<8x8xf32>
    %68 = tpu.matmul %66, %67, %cst_40 {dimension_numbers = #tpu.dot_dimension_numbers<[1], [1], [0], [0], [0, 0, 1, 0], [], []>} : vector<8x8xf32>, vector<8x8xf32>, vector<8x8xf32> -> vector<8x8xf32>
    %69 = arith.addf %68, %47 : vector<8x8xf32>
    %cst_41 = arith.constant dense<0xFF800000> : vector<8xf32>
    %70 = vector.multi_reduction <maximumf>, %69, %cst_41 [1] : vector<8x8xf32> to vector<8xf32>
    %71 = vector.shape_cast %70 : vector<8xf32> to vector<8x1xf32>
    %72 = vector.broadcast %71 : vector<8x1xf32> to vector<8x8xf32>
    %73 = arith.subf %69, %72 : vector<8x8xf32>
    %74 = math.exp %73 : vector<8x8xf32>
    %cst_42 = arith.constant dense<0.000000e+00> : vector<8xf32>
    %75 = vector.multi_reduction <add>, %74, %cst_42 [1] : vector<8x8xf32> to vector<8xf32>
    %76 = vector.shape_cast %75 : vector<8xf32> to vector<8x1xf32>
    %77 = tpu.reciprocal %76 {approx = true} : vector<8x1xf32> -> vector<8x1xf32>
    %78 = vector.broadcast %77 : vector<8x1xf32> to vector<8x8xf32>
    %79 = arith.mulf %74, %78 : vector<8x8xf32>
    %80 = vector.extract_strided_slice %40 {offsets = [0, 8], sizes = [8, 8], strides = [1, 1]} : vector<8x48xf32> to vector<8x8xf32>
    %cst_43 = arith.constant dense<0.000000e+00> : vector<8x8xf32>
    %81 = tpu.matmul %79, %80, %cst_43 {dimension_numbers = #tpu.dot_dimension_numbers<[1], [0], [0], [1], [0, 0, 1, 1], [], []>} : vector<8x8xf32>, vector<8x8xf32>, vector<8x8xf32> -> vector<8x8xf32>
    %82 = vector.extract_strided_slice %31 {offsets = [8, 0], sizes = [8, 48], strides = [1, 1]} : vector<48x48xf32> to vector<8x48xf32>
    %cst_44 = arith.constant dense<0.000000e+00> : vector<8x48xf32>
    %83 = tpu.matmul %81, %82, %cst_44 {dimension_numbers = #tpu.dot_dimension_numbers<[1], [0], [0], [1], [0, 0, 1, 1], [], []>} : vector<8x8xf32>, vector<8x48xf32>, vector<8x48xf32> -> vector<8x48xf32>
    %84 = arith.addf %65, %83 : vector<8x48xf32>
    %85 = vector.extract_strided_slice %38 {offsets = [0, 16], sizes = [8, 8], strides = [1, 1]} : vector<8x48xf32> to vector<8x8xf32>
    %86 = vector.extract_strided_slice %39 {offsets = [0, 16], sizes = [8, 8], strides = [1, 1]} : vector<8x48xf32> to vector<8x8xf32>
    %cst_45 = arith.constant dense<0.000000e+00> : vector<8x8xf32>
    %87 = tpu.matmul %85, %86, %cst_45 {dimension_numbers = #tpu.dot_dimension_numbers<[1], [1], [0], [0], [0, 0, 1, 0], [], []>} : vector<8x8xf32>, vector<8x8xf32>, vector<8x8xf32> -> vector<8x8xf32>
    %88 = arith.addf %87, %47 : vector<8x8xf32>
    %cst_46 = arith.constant dense<0xFF800000> : vector<8xf32>
    %89 = vector.multi_reduction <maximumf>, %88, %cst_46 [1] : vector<8x8xf32> to vector<8xf32>
    %90 = vector.shape_cast %89 : vector<8xf32> to vector<8x1xf32>
    %91 = vector.broadcast %90 : vector<8x1xf32> to vector<8x8xf32>
    %92 = arith.subf %88, %91 : vector<8x8xf32>
    %93 = math.exp %92 : vector<8x8xf32>
    %cst_47 = arith.constant dense<0.000000e+00> : vector<8xf32>
    %94 = vector.multi_reduction <add>, %93, %cst_47 [1] : vector<8x8xf32> to vector<8xf32>
    %95 = vector.shape_cast %94 : vector<8xf32> to vector<8x1xf32>
    %96 = tpu.reciprocal %95 {approx = true} : vector<8x1xf32> -> vector<8x1xf32>
    %97 = vector.broadcast %96 : vector<8x1xf32> to vector<8x8xf32>
    %98 = arith.mulf %93, %97 : vector<8x8xf32>
    %99 = vector.extract_strided_slice %40 {offsets = [0, 16], sizes = [8, 8], strides = [1, 1]} : vector<8x48xf32> to vector<8x8xf32>
    %cst_48 = arith.constant dense<0.000000e+00> : vector<8x8xf32>
    %100 = tpu.matmul %98, %99, %cst_48 {dimension_numbers = #tpu.dot_dimension_numbers<[1], [0], [0], [1], [0, 0, 1, 1], [], []>} : vector<8x8xf32>, vector<8x8xf32>, vector<8x8xf32> -> vector<8x8xf32>
    %101 = vector.extract_strided_slice %31 {offsets = [16, 0], sizes = [8, 48], strides = [1, 1]} : vector<48x48xf32> to vector<8x48xf32>
    %cst_49 = arith.constant dense<0.000000e+00> : vector<8x48xf32>
    %102 = tpu.matmul %100, %101, %cst_49 {dimension_numbers = #tpu.dot_dimension_numbers<[1], [0], [0], [1], [0, 0, 1, 1], [], []>} : vector<8x8xf32>, vector<8x48xf32>, vector<8x48xf32> -> vector<8x48xf32>
    %103 = arith.addf %84, %102 : vector<8x48xf32>
    %104 = vector.extract_strided_slice %38 {offsets = [0, 24], sizes = [8, 8], strides = [1, 1]} : vector<8x48xf32> to vector<8x8xf32>
    %105 = vector.extract_strided_slice %39 {offsets = [0, 24], sizes = [8, 8], strides = [1, 1]} : vector<8x48xf32> to vector<8x8xf32>
    %cst_50 = arith.constant dense<0.000000e+00> : vector<8x8xf32>
    %106 = tpu.matmul %104, %105, %cst_50 {dimension_numbers = #tpu.dot_dimension_numbers<[1], [1], [0], [0], [0, 0, 1, 0], [], []>} : vector<8x8xf32>, vector<8x8xf32>, vector<8x8xf32> -> vector<8x8xf32>
    %107 = arith.addf %106, %47 : vector<8x8xf32>
    %cst_51 = arith.constant dense<0xFF800000> : vector<8xf32>
    %108 = vector.multi_reduction <maximumf>, %107, %cst_51 [1] : vector<8x8xf32> to vector<8xf32>
    %109 = vector.shape_cast %108 : vector<8xf32> to vector<8x1xf32>
    %110 = vector.broadcast %109 : vector<8x1xf32> to vector<8x8xf32>
    %111 = arith.subf %107, %110 : vector<8x8xf32>
    %112 = math.exp %111 : vector<8x8xf32>
    %cst_52 = arith.constant dense<0.000000e+00> : vector<8xf32>
    %113 = vector.multi_reduction <add>, %112, %cst_52 [1] : vector<8x8xf32> to vector<8xf32>
    %114 = vector.shape_cast %113 : vector<8xf32> to vector<8x1xf32>
    %115 = tpu.reciprocal %114 {approx = true} : vector<8x1xf32> -> vector<8x1xf32>
    %116 = vector.broadcast %115 : vector<8x1xf32> to vector<8x8xf32>
    %117 = arith.mulf %112, %116 : vector<8x8xf32>
    %118 = vector.extract_strided_slice %40 {offsets = [0, 24], sizes = [8, 8], strides = [1, 1]} : vector<8x48xf32> to vector<8x8xf32>
    %cst_53 = arith.constant dense<0.000000e+00> : vector<8x8xf32>
    %119 = tpu.matmul %117, %118, %cst_53 {dimension_numbers = #tpu.dot_dimension_numbers<[1], [0], [0], [1], [0, 0, 1, 1], [], []>} : vector<8x8xf32>, vector<8x8xf32>, vector<8x8xf32> -> vector<8x8xf32>
    %120 = vector.extract_strided_slice %31 {offsets = [24, 0], sizes = [8, 48], strides = [1, 1]} : vector<48x48xf32> to vector<8x48xf32>
    %cst_54 = arith.constant dense<0.000000e+00> : vector<8x48xf32>
    %121 = tpu.matmul %119, %120, %cst_54 {dimension_numbers = #tpu.dot_dimension_numbers<[1], [0], [0], [1], [0, 0, 1, 1], [], []>} : vector<8x8xf32>, vector<8x48xf32>, vector<8x48xf32> -> vector<8x48xf32>
    %122 = arith.addf %103, %121 : vector<8x48xf32>
    %123 = vector.extract_strided_slice %38 {offsets = [0, 32], sizes = [8, 8], strides = [1, 1]} : vector<8x48xf32> to vector<8x8xf32>
    %124 = vector.extract_strided_slice %39 {offsets = [0, 32], sizes = [8, 8], strides = [1, 1]} : vector<8x48xf32> to vector<8x8xf32>
    %cst_55 = arith.constant dense<0.000000e+00> : vector<8x8xf32>
    %125 = tpu.matmul %123, %124, %cst_55 {dimension_numbers = #tpu.dot_dimension_numbers<[1], [1], [0], [0], [0, 0, 1, 0], [], []>} : vector<8x8xf32>, vector<8x8xf32>, vector<8x8xf32> -> vector<8x8xf32>
    %126 = arith.addf %125, %47 : vector<8x8xf32>
    %cst_56 = arith.constant dense<0xFF800000> : vector<8xf32>
    %127 = vector.multi_reduction <maximumf>, %126, %cst_56 [1] : vector<8x8xf32> to vector<8xf32>
    %128 = vector.shape_cast %127 : vector<8xf32> to vector<8x1xf32>
    %129 = vector.broadcast %128 : vector<8x1xf32> to vector<8x8xf32>
    %130 = arith.subf %126, %129 : vector<8x8xf32>
    %131 = math.exp %130 : vector<8x8xf32>
    %cst_57 = arith.constant dense<0.000000e+00> : vector<8xf32>
    %132 = vector.multi_reduction <add>, %131, %cst_57 [1] : vector<8x8xf32> to vector<8xf32>
    %133 = vector.shape_cast %132 : vector<8xf32> to vector<8x1xf32>
    %134 = tpu.reciprocal %133 {approx = true} : vector<8x1xf32> -> vector<8x1xf32>
    %135 = vector.broadcast %134 : vector<8x1xf32> to vector<8x8xf32>
    %136 = arith.mulf %131, %135 : vector<8x8xf32>
    %137 = vector.extract_strided_slice %40 {offsets = [0, 32], sizes = [8, 8], strides = [1, 1]} : vector<8x48xf32> to vector<8x8xf32>
    %cst_58 = arith.constant dense<0.000000e+00> : vector<8x8xf32>
    %138 = tpu.matmul %136, %137, %cst_58 {dimension_numbers = #tpu.dot_dimension_numbers<[1], [0], [0], [1], [0, 0, 1, 1], [], []>} : vector<8x8xf32>, vector<8x8xf32>, vector<8x8xf32> -> vector<8x8xf32>
    %139 = vector.extract_strided_slice %31 {offsets = [32, 0], sizes = [8, 48], strides = [1, 1]} : vector<48x48xf32> to vector<8x48xf32>
    %cst_59 = arith.constant dense<0.000000e+00> : vector<8x48xf32>
    %140 = tpu.matmul %138, %139, %cst_59 {dimension_numbers = #tpu.dot_dimension_numbers<[1], [0], [0], [1], [0, 0, 1, 1], [], []>} : vector<8x8xf32>, vector<8x48xf32>, vector<8x48xf32> -> vector<8x48xf32>
    %141 = arith.addf %122, %140 : vector<8x48xf32>
    %142 = vector.extract_strided_slice %38 {offsets = [0, 40], sizes = [8, 8], strides = [1, 1]} : vector<8x48xf32> to vector<8x8xf32>
    %143 = vector.extract_strided_slice %39 {offsets = [0, 40], sizes = [8, 8], strides = [1, 1]} : vector<8x48xf32> to vector<8x8xf32>
    %cst_60 = arith.constant dense<0.000000e+00> : vector<8x8xf32>
    %144 = tpu.matmul %142, %143, %cst_60 {dimension_numbers = #tpu.dot_dimension_numbers<[1], [1], [0], [0], [0, 0, 1, 0], [], []>} : vector<8x8xf32>, vector<8x8xf32>, vector<8x8xf32> -> vector<8x8xf32>
    %145 = arith.addf %144, %47 : vector<8x8xf32>
    %cst_61 = arith.constant dense<0xFF800000> : vector<8xf32>
    %146 = vector.multi_reduction <maximumf>, %145, %cst_61 [1] : vector<8x8xf32> to vector<8xf32>
    %147 = vector.shape_cast %146 : vector<8xf32> to vector<8x1xf32>
    %148 = vector.broadcast %147 : vector<8x1xf32> to vector<8x8xf32>
    %149 = arith.subf %145, %148 : vector<8x8xf32>
    %150 = math.exp %149 : vector<8x8xf32>
    %cst_62 = arith.constant dense<0.000000e+00> : vector<8xf32>
    %151 = vector.multi_reduction <add>, %150, %cst_62 [1] : vector<8x8xf32> to vector<8xf32>
    %152 = vector.shape_cast %151 : vector<8xf32> to vector<8x1xf32>
    %153 = tpu.reciprocal %152 {approx = true} : vector<8x1xf32> -> vector<8x1xf32>
    %154 = vector.broadcast %153 : vector<8x1xf32> to vector<8x8xf32>
    %155 = arith.mulf %150, %154 : vector<8x8xf32>
    %156 = vector.extract_strided_slice %40 {offsets = [0, 40], sizes = [8, 8], strides = [1, 1]} : vector<8x48xf32> to vector<8x8xf32>
    %cst_63 = arith.constant dense<0.000000e+00> : vector<8x8xf32>
    %157 = tpu.matmul %155, %156, %cst_63 {dimension_numbers = #tpu.dot_dimension_numbers<[1], [0], [0], [1], [0, 0, 1, 1], [], []>} : vector<8x8xf32>, vector<8x8xf32>, vector<8x8xf32> -> vector<8x8xf32>
    %158 = vector.extract_strided_slice %31 {offsets = [40, 0], sizes = [8, 48], strides = [1, 1]} : vector<48x48xf32> to vector<8x48xf32>
    %cst_64 = arith.constant dense<0.000000e+00> : vector<8x48xf32>
    %159 = tpu.matmul %157, %158, %cst_64 {dimension_numbers = #tpu.dot_dimension_numbers<[1], [0], [0], [1], [0, 0, 1, 1], [], []>} : vector<8x8xf32>, vector<8x48xf32>, vector<8x48xf32> -> vector<8x48xf32>
    %160 = arith.addf %141, %159 : vector<8x48xf32>
    %161 = vector.extract_strided_slice %35 {offsets = [8, 0], sizes = [8, 48], strides = [1, 1]} : vector<16x48xf32> to vector<8x48xf32>
    %162 = vector.extract_strided_slice %36 {offsets = [8, 0], sizes = [8, 48], strides = [1, 1]} : vector<16x48xf32> to vector<8x48xf32>
    %163 = vector.extract_strided_slice %37 {offsets = [8, 0], sizes = [8, 48], strides = [1, 1]} : vector<16x48xf32> to vector<8x48xf32>
    %164 = vector.extract_strided_slice %2 {offsets = [1, 0, 0], sizes = [1, 8, 8], strides = [1, 1, 1]} : vector<2x8x8xf32> to vector<1x8x8xf32>
    %165 = vector.shape_cast %164 : vector<1x8x8xf32> to vector<8x8xf32>
    %cst_65 = arith.constant 0.000000e+00 : f32
    %166 = vector.broadcast %cst_65 : f32 to vector<8x8xf32>
    %167 = arith.cmpf oeq, %165, %166 : vector<8x8xf32>
    %cst_66 = arith.constant -1.000000e+09 : f32
    %cst_67 = arith.constant 0.000000e+00 : f32
    %168 = vector.broadcast %cst_66 : f32 to vector<8x8xf32>
    %169 = vector.broadcast %cst_67 : f32 to vector<8x8xf32>
    %170 = arith.select %167, %168, %169 : vector<8x8xi1>, vector<8x8xf32>
    %171 = vector.extract_strided_slice %161 {offsets = [0, 0], sizes = [8, 8], strides = [1, 1]} : vector<8x48xf32> to vector<8x8xf32>
    %172 = vector.extract_strided_slice %162 {offsets = [0, 0], sizes = [8, 8], strides = [1, 1]} : vector<8x48xf32> to vector<8x8xf32>
    %cst_68 = arith.constant dense<0.000000e+00> : vector<8x8xf32>
    %173 = tpu.matmul %171, %172, %cst_68 {dimension_numbers = #tpu.dot_dimension_numbers<[1], [1], [0], [0], [0, 0, 1, 0], [], []>} : vector<8x8xf32>, vector<8x8xf32>, vector<8x8xf32> -> vector<8x8xf32>
    %174 = arith.addf %173, %170 : vector<8x8xf32>
    %cst_69 = arith.constant dense<0xFF800000> : vector<8xf32>
    %175 = vector.multi_reduction <maximumf>, %174, %cst_69 [1] : vector<8x8xf32> to vector<8xf32>
    %176 = vector.shape_cast %175 : vector<8xf32> to vector<8x1xf32>
    %177 = vector.broadcast %176 : vector<8x1xf32> to vector<8x8xf32>
    %178 = arith.subf %174, %177 : vector<8x8xf32>
    %179 = math.exp %178 : vector<8x8xf32>
    %cst_70 = arith.constant dense<0.000000e+00> : vector<8xf32>
    %180 = vector.multi_reduction <add>, %179, %cst_70 [1] : vector<8x8xf32> to vector<8xf32>
    %181 = vector.shape_cast %180 : vector<8xf32> to vector<8x1xf32>
    %182 = tpu.reciprocal %181 {approx = true} : vector<8x1xf32> -> vector<8x1xf32>
    %183 = vector.broadcast %182 : vector<8x1xf32> to vector<8x8xf32>
    %184 = arith.mulf %179, %183 : vector<8x8xf32>
    %185 = vector.extract_strided_slice %163 {offsets = [0, 0], sizes = [8, 8], strides = [1, 1]} : vector<8x48xf32> to vector<8x8xf32>
    %cst_71 = arith.constant dense<0.000000e+00> : vector<8x8xf32>
    %186 = tpu.matmul %184, %185, %cst_71 {dimension_numbers = #tpu.dot_dimension_numbers<[1], [0], [0], [1], [0, 0, 1, 1], [], []>} : vector<8x8xf32>, vector<8x8xf32>, vector<8x8xf32> -> vector<8x8xf32>
    %187 = vector.extract_strided_slice %31 {offsets = [0, 0], sizes = [8, 48], strides = [1, 1]} : vector<48x48xf32> to vector<8x48xf32>
    %cst_72 = arith.constant dense<0.000000e+00> : vector<8x48xf32>
    %188 = tpu.matmul %186, %187, %cst_72 {dimension_numbers = #tpu.dot_dimension_numbers<[1], [0], [0], [1], [0, 0, 1, 1], [], []>} : vector<8x8xf32>, vector<8x48xf32>, vector<8x48xf32> -> vector<8x48xf32>
    %189 = vector.extract_strided_slice %161 {offsets = [0, 8], sizes = [8, 8], strides = [1, 1]} : vector<8x48xf32> to vector<8x8xf32>
    %190 = vector.extract_strided_slice %162 {offsets = [0, 8], sizes = [8, 8], strides = [1, 1]} : vector<8x48xf32> to vector<8x8xf32>
    %cst_73 = arith.constant dense<0.000000e+00> : vector<8x8xf32>
    %191 = tpu.matmul %189, %190, %cst_73 {dimension_numbers = #tpu.dot_dimension_numbers<[1], [1], [0], [0], [0, 0, 1, 0], [], []>} : vector<8x8xf32>, vector<8x8xf32>, vector<8x8xf32> -> vector<8x8xf32>
    %192 = arith.addf %191, %170 : vector<8x8xf32>
    %cst_74 = arith.constant dense<0xFF800000> : vector<8xf32>
    %193 = vector.multi_reduction <maximumf>, %192, %cst_74 [1] : vector<8x8xf32> to vector<8xf32>
    %194 = vector.shape_cast %193 : vector<8xf32> to vector<8x1xf32>
    %195 = vector.broadcast %194 : vector<8x1xf32> to vector<8x8xf32>
    %196 = arith.subf %192, %195 : vector<8x8xf32>
    %197 = math.exp %196 : vector<8x8xf32>
    %cst_75 = arith.constant dense<0.000000e+00> : vector<8xf32>
    %198 = vector.multi_reduction <add>, %197, %cst_75 [1] : vector<8x8xf32> to vector<8xf32>
    %199 = vector.shape_cast %198 : vector<8xf32> to vector<8x1xf32>
    %200 = tpu.reciprocal %199 {approx = true} : vector<8x1xf32> -> vector<8x1xf32>
    %201 = vector.broadcast %200 : vector<8x1xf32> to vector<8x8xf32>
    %202 = arith.mulf %197, %201 : vector<8x8xf32>
    %203 = vector.extract_strided_slice %163 {offsets = [0, 8], sizes = [8, 8], strides = [1, 1]} : vector<8x48xf32> to vector<8x8xf32>
    %cst_76 = arith.constant dense<0.000000e+00> : vector<8x8xf32>
    %204 = tpu.matmul %202, %203, %cst_76 {dimension_numbers = #tpu.dot_dimension_numbers<[1], [0], [0], [1], [0, 0, 1, 1], [], []>} : vector<8x8xf32>, vector<8x8xf32>, vector<8x8xf32> -> vector<8x8xf32>
    %205 = vector.extract_strided_slice %31 {offsets = [8, 0], sizes = [8, 48], strides = [1, 1]} : vector<48x48xf32> to vector<8x48xf32>
    %cst_77 = arith.constant dense<0.000000e+00> : vector<8x48xf32>
    %206 = tpu.matmul %204, %205, %cst_77 {dimension_numbers = #tpu.dot_dimension_numbers<[1], [0], [0], [1], [0, 0, 1, 1], [], []>} : vector<8x8xf32>, vector<8x48xf32>, vector<8x48xf32> -> vector<8x48xf32>
    %207 = arith.addf %188, %206 : vector<8x48xf32>
    %208 = vector.extract_strided_slice %161 {offsets = [0, 16], sizes = [8, 8], strides = [1, 1]} : vector<8x48xf32> to vector<8x8xf32>
    %209 = vector.extract_strided_slice %162 {offsets = [0, 16], sizes = [8, 8], strides = [1, 1]} : vector<8x48xf32> to vector<8x8xf32>
    %cst_78 = arith.constant dense<0.000000e+00> : vector<8x8xf32>
    %210 = tpu.matmul %208, %209, %cst_78 {dimension_numbers = #tpu.dot_dimension_numbers<[1], [1], [0], [0], [0, 0, 1, 0], [], []>} : vector<8x8xf32>, vector<8x8xf32>, vector<8x8xf32> -> vector<8x8xf32>
    %211 = arith.addf %210, %170 : vector<8x8xf32>
    %cst_79 = arith.constant dense<0xFF800000> : vector<8xf32>
    %212 = vector.multi_reduction <maximumf>, %211, %cst_79 [1] : vector<8x8xf32> to vector<8xf32>
    %213 = vector.shape_cast %212 : vector<8xf32> to vector<8x1xf32>
    %214 = vector.broadcast %213 : vector<8x1xf32> to vector<8x8xf32>
    %215 = arith.subf %211, %214 : vector<8x8xf32>
    %216 = math.exp %215 : vector<8x8xf32>
    %cst_80 = arith.constant dense<0.000000e+00> : vector<8xf32>
    %217 = vector.multi_reduction <add>, %216, %cst_80 [1] : vector<8x8xf32> to vector<8xf32>
    %218 = vector.shape_cast %217 : vector<8xf32> to vector<8x1xf32>
    %219 = tpu.reciprocal %218 {approx = true} : vector<8x1xf32> -> vector<8x1xf32>
    %220 = vector.broadcast %219 : vector<8x1xf32> to vector<8x8xf32>
    %221 = arith.mulf %216, %220 : vector<8x8xf32>
    %222 = vector.extract_strided_slice %163 {offsets = [0, 16], sizes = [8, 8], strides = [1, 1]} : vector<8x48xf32> to vector<8x8xf32>
    %cst_81 = arith.constant dense<0.000000e+00> : vector<8x8xf32>
    %223 = tpu.matmul %221, %222, %cst_81 {dimension_numbers = #tpu.dot_dimension_numbers<[1], [0], [0], [1], [0, 0, 1, 1], [], []>} : vector<8x8xf32>, vector<8x8xf32>, vector<8x8xf32> -> vector<8x8xf32>
    %224 = vector.extract_strided_slice %31 {offsets = [16, 0], sizes = [8, 48], strides = [1, 1]} : vector<48x48xf32> to vector<8x48xf32>
    %cst_82 = arith.constant dense<0.000000e+00> : vector<8x48xf32>
    %225 = tpu.matmul %223, %224, %cst_82 {dimension_numbers = #tpu.dot_dimension_numbers<[1], [0], [0], [1], [0, 0, 1, 1], [], []>} : vector<8x8xf32>, vector<8x48xf32>, vector<8x48xf32> -> vector<8x48xf32>
    %226 = arith.addf %207, %225 : vector<8x48xf32>
    %227 = vector.extract_strided_slice %161 {offsets = [0, 24], sizes = [8, 8], strides = [1, 1]} : vector<8x48xf32> to vector<8x8xf32>
    %228 = vector.extract_strided_slice %162 {offsets = [0, 24], sizes = [8, 8], strides = [1, 1]} : vector<8x48xf32> to vector<8x8xf32>
    %cst_83 = arith.constant dense<0.000000e+00> : vector<8x8xf32>
    %229 = tpu.matmul %227, %228, %cst_83 {dimension_numbers = #tpu.dot_dimension_numbers<[1], [1], [0], [0], [0, 0, 1, 0], [], []>} : vector<8x8xf32>, vector<8x8xf32>, vector<8x8xf32> -> vector<8x8xf32>
    %230 = arith.addf %229, %170 : vector<8x8xf32>
    %cst_84 = arith.constant dense<0xFF800000> : vector<8xf32>
    %231 = vector.multi_reduction <maximumf>, %230, %cst_84 [1] : vector<8x8xf32> to vector<8xf32>
    %232 = vector.shape_cast %231 : vector<8xf32> to vector<8x1xf32>
    %233 = vector.broadcast %232 : vector<8x1xf32> to vector<8x8xf32>
    %234 = arith.subf %230, %233 : vector<8x8xf32>
    %235 = math.exp %234 : vector<8x8xf32>
    %cst_85 = arith.constant dense<0.000000e+00> : vector<8xf32>
    %236 = vector.multi_reduction <add>, %235, %cst_85 [1] : vector<8x8xf32> to vector<8xf32>
    %237 = vector.shape_cast %236 : vector<8xf32> to vector<8x1xf32>
    %238 = tpu.reciprocal %237 {approx = true} : vector<8x1xf32> -> vector<8x1xf32>
    %239 = vector.broadcast %238 : vector<8x1xf32> to vector<8x8xf32>
    %240 = arith.mulf %235, %239 : vector<8x8xf32>
    %241 = vector.extract_strided_slice %163 {offsets = [0, 24], sizes = [8, 8], strides = [1, 1]} : vector<8x48xf32> to vector<8x8xf32>
    %cst_86 = arith.constant dense<0.000000e+00> : vector<8x8xf32>
    %242 = tpu.matmul %240, %241, %cst_86 {dimension_numbers = #tpu.dot_dimension_numbers<[1], [0], [0], [1], [0, 0, 1, 1], [], []>} : vector<8x8xf32>, vector<8x8xf32>, vector<8x8xf32> -> vector<8x8xf32>
    %243 = vector.extract_strided_slice %31 {offsets = [24, 0], sizes = [8, 48], strides = [1, 1]} : vector<48x48xf32> to vector<8x48xf32>
    %cst_87 = arith.constant dense<0.000000e+00> : vector<8x48xf32>
    %244 = tpu.matmul %242, %243, %cst_87 {dimension_numbers = #tpu.dot_dimension_numbers<[1], [0], [0], [1], [0, 0, 1, 1], [], []>} : vector<8x8xf32>, vector<8x48xf32>, vector<8x48xf32> -> vector<8x48xf32>
    %245 = arith.addf %226, %244 : vector<8x48xf32>
    %246 = vector.extract_strided_slice %161 {offsets = [0, 32], sizes = [8, 8], strides = [1, 1]} : vector<8x48xf32> to vector<8x8xf32>
    %247 = vector.extract_strided_slice %162 {offsets = [0, 32], sizes = [8, 8], strides = [1, 1]} : vector<8x48xf32> to vector<8x8xf32>
    %cst_88 = arith.constant dense<0.000000e+00> : vector<8x8xf32>
    %248 = tpu.matmul %246, %247, %cst_88 {dimension_numbers = #tpu.dot_dimension_numbers<[1], [1], [0], [0], [0, 0, 1, 0], [], []>} : vector<8x8xf32>, vector<8x8xf32>, vector<8x8xf32> -> vector<8x8xf32>
    %249 = arith.addf %248, %170 : vector<8x8xf32>
    %cst_89 = arith.constant dense<0xFF800000> : vector<8xf32>
    %250 = vector.multi_reduction <maximumf>, %249, %cst_89 [1] : vector<8x8xf32> to vector<8xf32>
    %251 = vector.shape_cast %250 : vector<8xf32> to vector<8x1xf32>
    %252 = vector.broadcast %251 : vector<8x1xf32> to vector<8x8xf32>
    %253 = arith.subf %249, %252 : vector<8x8xf32>
    %254 = math.exp %253 : vector<8x8xf32>
    %cst_90 = arith.constant dense<0.000000e+00> : vector<8xf32>
    %255 = vector.multi_reduction <add>, %254, %cst_90 [1] : vector<8x8xf32> to vector<8xf32>
    %256 = vector.shape_cast %255 : vector<8xf32> to vector<8x1xf32>
    %257 = tpu.reciprocal %256 {approx = true} : vector<8x1xf32> -> vector<8x1xf32>
    %258 = vector.broadcast %257 : vector<8x1xf32> to vector<8x8xf32>
    %259 = arith.mulf %254, %258 : vector<8x8xf32>
    %260 = vector.extract_strided_slice %163 {offsets = [0, 32], sizes = [8, 8], strides = [1, 1]} : vector<8x48xf32> to vector<8x8xf32>
    %cst_91 = arith.constant dense<0.000000e+00> : vector<8x8xf32>
    %261 = tpu.matmul %259, %260, %cst_91 {dimension_numbers = #tpu.dot_dimension_numbers<[1], [0], [0], [1], [0, 0, 1, 1], [], []>} : vector<8x8xf32>, vector<8x8xf32>, vector<8x8xf32> -> vector<8x8xf32>
    %262 = vector.extract_strided_slice %31 {offsets = [32, 0], sizes = [8, 48], strides = [1, 1]} : vector<48x48xf32> to vector<8x48xf32>
    %cst_92 = arith.constant dense<0.000000e+00> : vector<8x48xf32>
    %263 = tpu.matmul %261, %262, %cst_92 {dimension_numbers = #tpu.dot_dimension_numbers<[1], [0], [0], [1], [0, 0, 1, 1], [], []>} : vector<8x8xf32>, vector<8x48xf32>, vector<8x48xf32> -> vector<8x48xf32>
    %264 = arith.addf %245, %263 : vector<8x48xf32>
    %265 = vector.extract_strided_slice %161 {offsets = [0, 40], sizes = [8, 8], strides = [1, 1]} : vector<8x48xf32> to vector<8x8xf32>
    %266 = vector.extract_strided_slice %162 {offsets = [0, 40], sizes = [8, 8], strides = [1, 1]} : vector<8x48xf32> to vector<8x8xf32>
    %cst_93 = arith.constant dense<0.000000e+00> : vector<8x8xf32>
    %267 = tpu.matmul %265, %266, %cst_93 {dimension_numbers = #tpu.dot_dimension_numbers<[1], [1], [0], [0], [0, 0, 1, 0], [], []>} : vector<8x8xf32>, vector<8x8xf32>, vector<8x8xf32> -> vector<8x8xf32>
    %268 = arith.addf %267, %170 : vector<8x8xf32>
    %cst_94 = arith.constant dense<0xFF800000> : vector<8xf32>
    %269 = vector.multi_reduction <maximumf>, %268, %cst_94 [1] : vector<8x8xf32> to vector<8xf32>
    %270 = vector.shape_cast %269 : vector<8xf32> to vector<8x1xf32>
    %271 = vector.broadcast %270 : vector<8x1xf32> to vector<8x8xf32>
    %272 = arith.subf %268, %271 : vector<8x8xf32>
    %273 = math.exp %272 : vector<8x8xf32>
    %cst_95 = arith.constant dense<0.000000e+00> : vector<8xf32>
    %274 = vector.multi_reduction <add>, %273, %cst_95 [1] : vector<8x8xf32> to vector<8xf32>
    %275 = vector.shape_cast %274 : vector<8xf32> to vector<8x1xf32>
    %276 = tpu.reciprocal %275 {approx = true} : vector<8x1xf32> -> vector<8x1xf32>
    %277 = vector.broadcast %276 : vector<8x1xf32> to vector<8x8xf32>
    %278 = arith.mulf %273, %277 : vector<8x8xf32>
    %279 = vector.extract_strided_slice %163 {offsets = [0, 40], sizes = [8, 8], strides = [1, 1]} : vector<8x48xf32> to vector<8x8xf32>
    %cst_96 = arith.constant dense<0.000000e+00> : vector<8x8xf32>
    %280 = tpu.matmul %278, %279, %cst_96 {dimension_numbers = #tpu.dot_dimension_numbers<[1], [0], [0], [1], [0, 0, 1, 1], [], []>} : vector<8x8xf32>, vector<8x8xf32>, vector<8x8xf32> -> vector<8x8xf32>
    %281 = vector.extract_strided_slice %31 {offsets = [40, 0], sizes = [8, 48], strides = [1, 1]} : vector<48x48xf32> to vector<8x48xf32>
    %cst_97 = arith.constant dense<0.000000e+00> : vector<8x48xf32>
    %282 = tpu.matmul %280, %281, %cst_97 {dimension_numbers = #tpu.dot_dimension_numbers<[1], [0], [0], [1], [0, 0, 1, 1], [], []>} : vector<8x8xf32>, vector<8x48xf32>, vector<8x48xf32> -> vector<8x48xf32>
    %283 = arith.addf %264, %282 : vector<8x48xf32>
    %284 = tpu.concatenate %160, %283 in 0 : vector<8x48xf32>, vector<8x48xf32> -> vector<16x48xf32>
    %285 = vector.broadcast %32 : vector<1x48xf32> to vector<16x48xf32>
    %286 = arith.addf %284, %285 : vector<16x48xf32>
    %287 = arith.addf %0, %286 : vector<16x48xf32>
    %c0_98 = arith.constant 0 : index
    %c0_99 = arith.constant 0 : index
    %288 = vector.load %arg6[%c0_98, %c0_99] : memref<1x48xf32, #tpu.memory_space<vmem>>, vector<1x48xf32>
    %c0_100 = arith.constant 0 : index
    %c0_101 = arith.constant 0 : index
    %289 = vector.load %arg7[%c0_100, %c0_101] : memref<1x48xf32, #tpu.memory_space<vmem>>, vector<1x48xf32>
    %cst_102 = arith.constant dense<0.000000e+00> : vector<16xf32>
    %290 = vector.multi_reduction <add>, %287, %cst_102 [1] : vector<16x48xf32> to vector<16xf32>
    %291 = vector.shape_cast %290 : vector<16xf32> to vector<16x1xf32>
    %cst_103 = arith.constant 4.800000e+01 : f32
    %292 = vector.broadcast %cst_103 : f32 to vector<16x1xf32>
    %293 = arith.divf %291, %292 : vector<16x1xf32>
    %294 = vector.broadcast %293 : vector<16x1xf32> to vector<16x48xf32>
    %295 = arith.subf %287, %294 : vector<16x48xf32>
    %296 = arith.mulf %295, %295 : vector<16x48xf32>
    %cst_104 = arith.constant dense<0.000000e+00> : vector<16xf32>
    %297 = vector.multi_reduction <add>, %296, %cst_104 [1] : vector<16x48xf32> to vector<16xf32>
    %298 = vector.shape_cast %297 : vector<16xf32> to vector<16x1xf32>
    %cst_105 = arith.constant 0.0212765951 : f32
    %299 = vector.broadcast %cst_105 : f32 to vector<16x1xf32>
    %300 = arith.mulf %298, %299 : vector<16x1xf32>
    %301 = math.sqrt %300 : vector<16x1xf32>
    %cst_106 = arith.constant 9.99999997E-7 : f32
    %302 = vector.broadcast %cst_106 : f32 to vector<16x1xf32>
    %303 = arith.addf %301, %302 : vector<16x1xf32>
    %cst_107 = arith.constant 1.000000e+00 : f32
    %304 = vector.broadcast %cst_107 : f32 to vector<16x1xf32>
    %305 = arith.divf %304, %303 : vector<16x1xf32>
    %306 = vector.broadcast %305 : vector<16x1xf32> to vector<16x48xf32>
    %307 = arith.mulf %295, %306 : vector<16x48xf32>
    %308 = vector.broadcast %288 : vector<1x48xf32> to vector<16x48xf32>
    %309 = arith.mulf %308, %307 : vector<16x48xf32>
    %310 = vector.broadcast %289 : vector<1x48xf32> to vector<16x48xf32>
    %311 = arith.addf %309, %310 : vector<16x48xf32>
    %c0_108 = arith.constant 0 : index
    %c0_109 = arith.constant 0 : index
    %312 = vector.load %arg15[%c0_108, %c0_109] : memref<48x48xf32, #tpu.memory_space<vmem>>, vector<48x48xf32>
    %c0_110 = arith.constant 0 : index
    %c0_111 = arith.constant 0 : index
    %313 = vector.load %arg16[%c0_110, %c0_111] : memref<48x48xf32, #tpu.memory_space<vmem>>, vector<48x48xf32>
    %c0_112 = arith.constant 0 : index
    %c0_113 = arith.constant 0 : index
    %314 = vector.load %arg17[%c0_112, %c0_113] : memref<48x48xf32, #tpu.memory_space<vmem>>, vector<48x48xf32>
    %c0_114 = arith.constant 0 : index
    %c0_115 = arith.constant 0 : index
    %315 = vector.load %arg18[%c0_114, %c0_115] : memref<48x48xf32, #tpu.memory_space<vmem>>, vector<48x48xf32>
    %c0_116 = arith.constant 0 : index
    %c0_117 = arith.constant 0 : index
    %316 = vector.load %arg19[%c0_116, %c0_117] : memref<1x48xf32, #tpu.memory_space<vmem>>, vector<1x48xf32>
    %cst_118 = arith.constant dense<0.000000e+00> : vector<16x48xf32>
    %317 = tpu.matmul %311, %312, %cst_118 {dimension_numbers = #tpu.dot_dimension_numbers<[1], [0], [0], [1], [0, 0, 1, 1], [], []>} : vector<16x48xf32>, vector<48x48xf32>, vector<16x48xf32> -> vector<16x48xf32>
    %cst_119 = arith.constant 0.353553385 : f32
    %318 = vector.broadcast %cst_119 : f32 to vector<16x48xf32>
    %319 = arith.mulf %317, %318 : vector<16x48xf32>
    %cst_120 = arith.constant dense<0.000000e+00> : vector<24x48xf32>
    %320 = tpu.matmul %1, %313, %cst_120 {dimension_numbers = #tpu.dot_dimension_numbers<[1], [0], [0], [1], [0, 0, 1, 1], [], []>} : vector<24x48xf32>, vector<48x48xf32>, vector<24x48xf32> -> vector<24x48xf32>
    %cst_121 = arith.constant dense<0.000000e+00> : vector<24x48xf32>
    %321 = tpu.matmul %1, %314, %cst_121 {dimension_numbers = #tpu.dot_dimension_numbers<[1], [0], [0], [1], [0, 0, 1, 1], [], []>} : vector<24x48xf32>, vector<48x48xf32>, vector<24x48xf32> -> vector<24x48xf32>
    %322 = vector.extract_strided_slice %319 {offsets = [0, 0], sizes = [8, 48], strides = [1, 1]} : vector<16x48xf32> to vector<8x48xf32>
    %323 = vector.extract_strided_slice %320 {offsets = [0, 0], sizes = [12, 48], strides = [1, 1]} : vector<24x48xf32> to vector<12x48xf32>
    %324 = vector.extract_strided_slice %321 {offsets = [0, 0], sizes = [12, 48], strides = [1, 1]} : vector<24x48xf32> to vector<12x48xf32>
    %325 = vector.extract_strided_slice %3 {offsets = [0, 0, 0], sizes = [1, 8, 12], strides = [1, 1, 1]} : vector<2x8x12xf32> to vector<1x8x12xf32>
    %326 = vector.shape_cast %325 : vector<1x8x12xf32> to vector<8x12xf32>
    %cst_122 = arith.constant 0.000000e+00 : f32
    %327 = vector.broadcast %cst_122 : f32 to vector<8x12xf32>
    %328 = arith.cmpf oeq, %326, %327 : vector<8x12xf32>
    %cst_123 = arith.constant -1.000000e+09 : f32
    %cst_124 = arith.constant 0.000000e+00 : f32
    %329 = vector.broadcast %cst_123 : f32 to vector<8x12xf32>
    %330 = vector.broadcast %cst_124 : f32 to vector<8x12xf32>
    %331 = arith.select %328, %329, %330 : vector<8x12xi1>, vector<8x12xf32>
    %332 = vector.extract_strided_slice %322 {offsets = [0, 0], sizes = [8, 8], strides = [1, 1]} : vector<8x48xf32> to vector<8x8xf32>
    %333 = vector.extract_strided_slice %323 {offsets = [0, 0], sizes = [12, 8], strides = [1, 1]} : vector<12x48xf32> to vector<12x8xf32>
    %cst_125 = arith.constant dense<0.000000e+00> : vector<8x12xf32>
    %334 = tpu.matmul %332, %333, %cst_125 {dimension_numbers = #tpu.dot_dimension_numbers<[1], [1], [0], [0], [0, 0, 1, 0], [], []>} : vector<8x8xf32>, vector<12x8xf32>, vector<8x12xf32> -> vector<8x12xf32>
    %335 = arith.addf %334, %331 : vector<8x12xf32>
    %cst_126 = arith.constant dense<0xFF800000> : vector<8xf32>
    %336 = vector.multi_reduction <maximumf>, %335, %cst_126 [1] : vector<8x12xf32> to vector<8xf32>
    %337 = vector.shape_cast %336 : vector<8xf32> to vector<8x1xf32>
    %338 = vector.broadcast %337 : vector<8x1xf32> to vector<8x12xf32>
    %339 = arith.subf %335, %338 : vector<8x12xf32>
    %340 = math.exp %339 : vector<8x12xf32>
    %cst_127 = arith.constant dense<0.000000e+00> : vector<8xf32>
    %341 = vector.multi_reduction <add>, %340, %cst_127 [1] : vector<8x12xf32> to vector<8xf32>
    %342 = vector.shape_cast %341 : vector<8xf32> to vector<8x1xf32>
    %343 = tpu.reciprocal %342 {approx = true} : vector<8x1xf32> -> vector<8x1xf32>
    %344 = vector.broadcast %343 : vector<8x1xf32> to vector<8x12xf32>
    %345 = arith.mulf %340, %344 : vector<8x12xf32>
    %346 = vector.extract_strided_slice %324 {offsets = [0, 0], sizes = [12, 8], strides = [1, 1]} : vector<12x48xf32> to vector<12x8xf32>
    %cst_128 = arith.constant dense<0.000000e+00> : vector<8x8xf32>
    %347 = tpu.matmul %345, %346, %cst_128 {dimension_numbers = #tpu.dot_dimension_numbers<[1], [0], [0], [1], [0, 0, 1, 1], [], []>} : vector<8x12xf32>, vector<12x8xf32>, vector<8x8xf32> -> vector<8x8xf32>
    %348 = vector.extract_strided_slice %315 {offsets = [0, 0], sizes = [8, 48], strides = [1, 1]} : vector<48x48xf32> to vector<8x48xf32>
    %cst_129 = arith.constant dense<0.000000e+00> : vector<8x48xf32>
    %349 = tpu.matmul %347, %348, %cst_129 {dimension_numbers = #tpu.dot_dimension_numbers<[1], [0], [0], [1], [0, 0, 1, 1], [], []>} : vector<8x8xf32>, vector<8x48xf32>, vector<8x48xf32> -> vector<8x48xf32>
    %350 = vector.extract_strided_slice %322 {offsets = [0, 8], sizes = [8, 8], strides = [1, 1]} : vector<8x48xf32> to vector<8x8xf32>
    %351 = vector.extract_strided_slice %323 {offsets = [0, 8], sizes = [12, 8], strides = [1, 1]} : vector<12x48xf32> to vector<12x8xf32>
    %cst_130 = arith.constant dense<0.000000e+00> : vector<8x12xf32>
    %352 = tpu.matmul %350, %351, %cst_130 {dimension_numbers = #tpu.dot_dimension_numbers<[1], [1], [0], [0], [0, 0, 1, 0], [], []>} : vector<8x8xf32>, vector<12x8xf32>, vector<8x12xf32> -> vector<8x12xf32>
    %353 = arith.addf %352, %331 : vector<8x12xf32>
    %cst_131 = arith.constant dense<0xFF800000> : vector<8xf32>
    %354 = vector.multi_reduction <maximumf>, %353, %cst_131 [1] : vector<8x12xf32> to vector<8xf32>
    %355 = vector.shape_cast %354 : vector<8xf32> to vector<8x1xf32>
    %356 = vector.broadcast %355 : vector<8x1xf32> to vector<8x12xf32>
    %357 = arith.subf %353, %356 : vector<8x12xf32>
    %358 = math.exp %357 : vector<8x12xf32>
    %cst_132 = arith.constant dense<0.000000e+00> : vector<8xf32>
    %359 = vector.multi_reduction <add>, %358, %cst_132 [1] : vector<8x12xf32> to vector<8xf32>
    %360 = vector.shape_cast %359 : vector<8xf32> to vector<8x1xf32>
    %361 = tpu.reciprocal %360 {approx = true} : vector<8x1xf32> -> vector<8x1xf32>
    %362 = vector.broadcast %361 : vector<8x1xf32> to vector<8x12xf32>
    %363 = arith.mulf %358, %362 : vector<8x12xf32>
    %364 = vector.extract_strided_slice %324 {offsets = [0, 8], sizes = [12, 8], strides = [1, 1]} : vector<12x48xf32> to vector<12x8xf32>
    %cst_133 = arith.constant dense<0.000000e+00> : vector<8x8xf32>
    %365 = tpu.matmul %363, %364, %cst_133 {dimension_numbers = #tpu.dot_dimension_numbers<[1], [0], [0], [1], [0, 0, 1, 1], [], []>} : vector<8x12xf32>, vector<12x8xf32>, vector<8x8xf32> -> vector<8x8xf32>
    %366 = vector.extract_strided_slice %315 {offsets = [8, 0], sizes = [8, 48], strides = [1, 1]} : vector<48x48xf32> to vector<8x48xf32>
    %cst_134 = arith.constant dense<0.000000e+00> : vector<8x48xf32>
    %367 = tpu.matmul %365, %366, %cst_134 {dimension_numbers = #tpu.dot_dimension_numbers<[1], [0], [0], [1], [0, 0, 1, 1], [], []>} : vector<8x8xf32>, vector<8x48xf32>, vector<8x48xf32> -> vector<8x48xf32>
    %368 = arith.addf %349, %367 : vector<8x48xf32>
    %369 = vector.extract_strided_slice %322 {offsets = [0, 16], sizes = [8, 8], strides = [1, 1]} : vector<8x48xf32> to vector<8x8xf32>
    %370 = vector.extract_strided_slice %323 {offsets = [0, 16], sizes = [12, 8], strides = [1, 1]} : vector<12x48xf32> to vector<12x8xf32>
    %cst_135 = arith.constant dense<0.000000e+00> : vector<8x12xf32>
    %371 = tpu.matmul %369, %370, %cst_135 {dimension_numbers = #tpu.dot_dimension_numbers<[1], [1], [0], [0], [0, 0, 1, 0], [], []>} : vector<8x8xf32>, vector<12x8xf32>, vector<8x12xf32> -> vector<8x12xf32>
    %372 = arith.addf %371, %331 : vector<8x12xf32>
    %cst_136 = arith.constant dense<0xFF800000> : vector<8xf32>
    %373 = vector.multi_reduction <maximumf>, %372, %cst_136 [1] : vector<8x12xf32> to vector<8xf32>
    %374 = vector.shape_cast %373 : vector<8xf32> to vector<8x1xf32>
    %375 = vector.broadcast %374 : vector<8x1xf32> to vector<8x12xf32>
    %376 = arith.subf %372, %375 : vector<8x12xf32>
    %377 = math.exp %376 : vector<8x12xf32>
    %cst_137 = arith.constant dense<0.000000e+00> : vector<8xf32>
    %378 = vector.multi_reduction <add>, %377, %cst_137 [1] : vector<8x12xf32> to vector<8xf32>
    %379 = vector.shape_cast %378 : vector<8xf32> to vector<8x1xf32>
    %380 = tpu.reciprocal %379 {approx = true} : vector<8x1xf32> -> vector<8x1xf32>
    %381 = vector.broadcast %380 : vector<8x1xf32> to vector<8x12xf32>
    %382 = arith.mulf %377, %381 : vector<8x12xf32>
    %383 = vector.extract_strided_slice %324 {offsets = [0, 16], sizes = [12, 8], strides = [1, 1]} : vector<12x48xf32> to vector<12x8xf32>
    %cst_138 = arith.constant dense<0.000000e+00> : vector<8x8xf32>
    %384 = tpu.matmul %382, %383, %cst_138 {dimension_numbers = #tpu.dot_dimension_numbers<[1], [0], [0], [1], [0, 0, 1, 1], [], []>} : vector<8x12xf32>, vector<12x8xf32>, vector<8x8xf32> -> vector<8x8xf32>
    %385 = vector.extract_strided_slice %315 {offsets = [16, 0], sizes = [8, 48], strides = [1, 1]} : vector<48x48xf32> to vector<8x48xf32>
    %cst_139 = arith.constant dense<0.000000e+00> : vector<8x48xf32>
    %386 = tpu.matmul %384, %385, %cst_139 {dimension_numbers = #tpu.dot_dimension_numbers<[1], [0], [0], [1], [0, 0, 1, 1], [], []>} : vector<8x8xf32>, vector<8x48xf32>, vector<8x48xf32> -> vector<8x48xf32>
    %387 = arith.addf %368, %386 : vector<8x48xf32>
    %388 = vector.extract_strided_slice %322 {offsets = [0, 24], sizes = [8, 8], strides = [1, 1]} : vector<8x48xf32> to vector<8x8xf32>
    %389 = vector.extract_strided_slice %323 {offsets = [0, 24], sizes = [12, 8], strides = [1, 1]} : vector<12x48xf32> to vector<12x8xf32>
    %cst_140 = arith.constant dense<0.000000e+00> : vector<8x12xf32>
    %390 = tpu.matmul %388, %389, %cst_140 {dimension_numbers = #tpu.dot_dimension_numbers<[1], [1], [0], [0], [0, 0, 1, 0], [], []>} : vector<8x8xf32>, vector<12x8xf32>, vector<8x12xf32> -> vector<8x12xf32>
    %391 = arith.addf %390, %331 : vector<8x12xf32>
    %cst_141 = arith.constant dense<0xFF800000> : vector<8xf32>
    %392 = vector.multi_reduction <maximumf>, %391, %cst_141 [1] : vector<8x12xf32> to vector<8xf32>
    %393 = vector.shape_cast %392 : vector<8xf32> to vector<8x1xf32>
    %394 = vector.broadcast %393 : vector<8x1xf32> to vector<8x12xf32>
    %395 = arith.subf %391, %394 : vector<8x12xf32>
    %396 = math.exp %395 : vector<8x12xf32>
    %cst_142 = arith.constant dense<0.000000e+00> : vector<8xf32>
    %397 = vector.multi_reduction <add>, %396, %cst_142 [1] : vector<8x12xf32> to vector<8xf32>
    %398 = vector.shape_cast %397 : vector<8xf32> to vector<8x1xf32>
    %399 = tpu.reciprocal %398 {approx = true} : vector<8x1xf32> -> vector<8x1xf32>
    %400 = vector.broadcast %399 : vector<8x1xf32> to vector<8x12xf32>
    %401 = arith.mulf %396, %400 : vector<8x12xf32>
    %402 = vector.extract_strided_slice %324 {offsets = [0, 24], sizes = [12, 8], strides = [1, 1]} : vector<12x48xf32> to vector<12x8xf32>
    %cst_143 = arith.constant dense<0.000000e+00> : vector<8x8xf32>
    %403 = tpu.matmul %401, %402, %cst_143 {dimension_numbers = #tpu.dot_dimension_numbers<[1], [0], [0], [1], [0, 0, 1, 1], [], []>} : vector<8x12xf32>, vector<12x8xf32>, vector<8x8xf32> -> vector<8x8xf32>
    %404 = vector.extract_strided_slice %315 {offsets = [24, 0], sizes = [8, 48], strides = [1, 1]} : vector<48x48xf32> to vector<8x48xf32>
    %cst_144 = arith.constant dense<0.000000e+00> : vector<8x48xf32>
    %405 = tpu.matmul %403, %404, %cst_144 {dimension_numbers = #tpu.dot_dimension_numbers<[1], [0], [0], [1], [0, 0, 1, 1], [], []>} : vector<8x8xf32>, vector<8x48xf32>, vector<8x48xf32> -> vector<8x48xf32>
    %406 = arith.addf %387, %405 : vector<8x48xf32>
    %407 = vector.extract_strided_slice %322 {offsets = [0, 32], sizes = [8, 8], strides = [1, 1]} : vector<8x48xf32> to vector<8x8xf32>
    %408 = vector.extract_strided_slice %323 {offsets = [0, 32], sizes = [12, 8], strides = [1, 1]} : vector<12x48xf32> to vector<12x8xf32>
    %cst_145 = arith.constant dense<0.000000e+00> : vector<8x12xf32>
    %409 = tpu.matmul %407, %408, %cst_145 {dimension_numbers = #tpu.dot_dimension_numbers<[1], [1], [0], [0], [0, 0, 1, 0], [], []>} : vector<8x8xf32>, vector<12x8xf32>, vector<8x12xf32> -> vector<8x12xf32>
    %410 = arith.addf %409, %331 : vector<8x12xf32>
    %cst_146 = arith.constant dense<0xFF800000> : vector<8xf32>
    %411 = vector.multi_reduction <maximumf>, %410, %cst_146 [1] : vector<8x12xf32> to vector<8xf32>
    %412 = vector.shape_cast %411 : vector<8xf32> to vector<8x1xf32>
    %413 = vector.broadcast %412 : vector<8x1xf32> to vector<8x12xf32>
    %414 = arith.subf %410, %413 : vector<8x12xf32>
    %415 = math.exp %414 : vector<8x12xf32>
    %cst_147 = arith.constant dense<0.000000e+00> : vector<8xf32>
    %416 = vector.multi_reduction <add>, %415, %cst_147 [1] : vector<8x12xf32> to vector<8xf32>
    %417 = vector.shape_cast %416 : vector<8xf32> to vector<8x1xf32>
    %418 = tpu.reciprocal %417 {approx = true} : vector<8x1xf32> -> vector<8x1xf32>
    %419 = vector.broadcast %418 : vector<8x1xf32> to vector<8x12xf32>
    %420 = arith.mulf %415, %419 : vector<8x12xf32>
    %421 = vector.extract_strided_slice %324 {offsets = [0, 32], sizes = [12, 8], strides = [1, 1]} : vector<12x48xf32> to vector<12x8xf32>
    %cst_148 = arith.constant dense<0.000000e+00> : vector<8x8xf32>
    %422 = tpu.matmul %420, %421, %cst_148 {dimension_numbers = #tpu.dot_dimension_numbers<[1], [0], [0], [1], [0, 0, 1, 1], [], []>} : vector<8x12xf32>, vector<12x8xf32>, vector<8x8xf32> -> vector<8x8xf32>
    %423 = vector.extract_strided_slice %315 {offsets = [32, 0], sizes = [8, 48], strides = [1, 1]} : vector<48x48xf32> to vector<8x48xf32>
    %cst_149 = arith.constant dense<0.000000e+00> : vector<8x48xf32>
    %424 = tpu.matmul %422, %423, %cst_149 {dimension_numbers = #tpu.dot_dimension_numbers<[1], [0], [0], [1], [0, 0, 1, 1], [], []>} : vector<8x8xf32>, vector<8x48xf32>, vector<8x48xf32> -> vector<8x48xf32>
    %425 = arith.addf %406, %424 : vector<8x48xf32>
    %426 = vector.extract_strided_slice %322 {offsets = [0, 40], sizes = [8, 8], strides = [1, 1]} : vector<8x48xf32> to vector<8x8xf32>
    %427 = vector.extract_strided_slice %323 {offsets = [0, 40], sizes = [12, 8], strides = [1, 1]} : vector<12x48xf32> to vector<12x8xf32>
    %cst_150 = arith.constant dense<0.000000e+00> : vector<8x12xf32>
    %428 = tpu.matmul %426, %427, %cst_150 {dimension_numbers = #tpu.dot_dimension_numbers<[1], [1], [0], [0], [0, 0, 1, 0], [], []>} : vector<8x8xf32>, vector<12x8xf32>, vector<8x12xf32> -> vector<8x12xf32>
    %429 = arith.addf %428, %331 : vector<8x12xf32>
    %cst_151 = arith.constant dense<0xFF800000> : vector<8xf32>
    %430 = vector.multi_reduction <maximumf>, %429, %cst_151 [1] : vector<8x12xf32> to vector<8xf32>
    %431 = vector.shape_cast %430 : vector<8xf32> to vector<8x1xf32>
    %432 = vector.broadcast %431 : vector<8x1xf32> to vector<8x12xf32>
    %433 = arith.subf %429, %432 : vector<8x12xf32>
    %434 = math.exp %433 : vector<8x12xf32>
    %cst_152 = arith.constant dense<0.000000e+00> : vector<8xf32>
    %435 = vector.multi_reduction <add>, %434, %cst_152 [1] : vector<8x12xf32> to vector<8xf32>
    %436 = vector.shape_cast %435 : vector<8xf32> to vector<8x1xf32>
    %437 = tpu.reciprocal %436 {approx = true} : vector<8x1xf32> -> vector<8x1xf32>
    %438 = vector.broadcast %437 : vector<8x1xf32> to vector<8x12xf32>
    %439 = arith.mulf %434, %438 : vector<8x12xf32>
    %440 = vector.extract_strided_slice %324 {offsets = [0, 40], sizes = [12, 8], strides = [1, 1]} : vector<12x48xf32> to vector<12x8xf32>
    %cst_153 = arith.constant dense<0.000000e+00> : vector<8x8xf32>
    %441 = tpu.matmul %439, %440, %cst_153 {dimension_numbers = #tpu.dot_dimension_numbers<[1], [0], [0], [1], [0, 0, 1, 1], [], []>} : vector<8x12xf32>, vector<12x8xf32>, vector<8x8xf32> -> vector<8x8xf32>
    %442 = vector.extract_strided_slice %315 {offsets = [40, 0], sizes = [8, 48], strides = [1, 1]} : vector<48x48xf32> to vector<8x48xf32>
    %cst_154 = arith.constant dense<0.000000e+00> : vector<8x48xf32>
    %443 = tpu.matmul %441, %442, %cst_154 {dimension_numbers = #tpu.dot_dimension_numbers<[1], [0], [0], [1], [0, 0, 1, 1], [], []>} : vector<8x8xf32>, vector<8x48xf32>, vector<8x48xf32> -> vector<8x48xf32>
    %444 = arith.addf %425, %443 : vector<8x48xf32>
    %445 = vector.extract_strided_slice %319 {offsets = [8, 0], sizes = [8, 48], strides = [1, 1]} : vector<16x48xf32> to vector<8x48xf32>
    %446 = vector.extract_strided_slice %320 {offsets = [12, 0], sizes = [12, 48], strides = [1, 1]} : vector<24x48xf32> to vector<12x48xf32>
    %447 = vector.extract_strided_slice %321 {offsets = [12, 0], sizes = [12, 48], strides = [1, 1]} : vector<24x48xf32> to vector<12x48xf32>
    %448 = vector.extract_strided_slice %3 {offsets = [1, 0, 0], sizes = [1, 8, 12], strides = [1, 1, 1]} : vector<2x8x12xf32> to vector<1x8x12xf32>
    %449 = vector.shape_cast %448 : vector<1x8x12xf32> to vector<8x12xf32>
    %cst_155 = arith.constant 0.000000e+00 : f32
    %450 = vector.broadcast %cst_155 : f32 to vector<8x12xf32>
    %451 = arith.cmpf oeq, %449, %450 : vector<8x12xf32>
    %cst_156 = arith.constant -1.000000e+09 : f32
    %cst_157 = arith.constant 0.000000e+00 : f32
    %452 = vector.broadcast %cst_156 : f32 to vector<8x12xf32>
    %453 = vector.broadcast %cst_157 : f32 to vector<8x12xf32>
    %454 = arith.select %451, %452, %453 : vector<8x12xi1>, vector<8x12xf32>
    %455 = vector.extract_strided_slice %445 {offsets = [0, 0], sizes = [8, 8], strides = [1, 1]} : vector<8x48xf32> to vector<8x8xf32>
    %456 = vector.extract_strided_slice %446 {offsets = [0, 0], sizes = [12, 8], strides = [1, 1]} : vector<12x48xf32> to vector<12x8xf32>
    %cst_158 = arith.constant dense<0.000000e+00> : vector<8x12xf32>
    %457 = tpu.matmul %455, %456, %cst_158 {dimension_numbers = #tpu.dot_dimension_numbers<[1], [1], [0], [0], [0, 0, 1, 0], [], []>} : vector<8x8xf32>, vector<12x8xf32>, vector<8x12xf32> -> vector<8x12xf32>
    %458 = arith.addf %457, %454 : vector<8x12xf32>
    %cst_159 = arith.constant dense<0xFF800000> : vector<8xf32>
    %459 = vector.multi_reduction <maximumf>, %458, %cst_159 [1] : vector<8x12xf32> to vector<8xf32>
    %460 = vector.shape_cast %459 : vector<8xf32> to vector<8x1xf32>
    %461 = vector.broadcast %460 : vector<8x1xf32> to vector<8x12xf32>
    %462 = arith.subf %458, %461 : vector<8x12xf32>
    %463 = math.exp %462 : vector<8x12xf32>
    %cst_160 = arith.constant dense<0.000000e+00> : vector<8xf32>
    %464 = vector.multi_reduction <add>, %463, %cst_160 [1] : vector<8x12xf32> to vector<8xf32>
    %465 = vector.shape_cast %464 : vector<8xf32> to vector<8x1xf32>
    %466 = tpu.reciprocal %465 {approx = true} : vector<8x1xf32> -> vector<8x1xf32>
    %467 = vector.broadcast %466 : vector<8x1xf32> to vector<8x12xf32>
    %468 = arith.mulf %463, %467 : vector<8x12xf32>
    %469 = vector.extract_strided_slice %447 {offsets = [0, 0], sizes = [12, 8], strides = [1, 1]} : vector<12x48xf32> to vector<12x8xf32>
    %cst_161 = arith.constant dense<0.000000e+00> : vector<8x8xf32>
    %470 = tpu.matmul %468, %469, %cst_161 {dimension_numbers = #tpu.dot_dimension_numbers<[1], [0], [0], [1], [0, 0, 1, 1], [], []>} : vector<8x12xf32>, vector<12x8xf32>, vector<8x8xf32> -> vector<8x8xf32>
    %471 = vector.extract_strided_slice %315 {offsets = [0, 0], sizes = [8, 48], strides = [1, 1]} : vector<48x48xf32> to vector<8x48xf32>
    %cst_162 = arith.constant dense<0.000000e+00> : vector<8x48xf32>
    %472 = tpu.matmul %470, %471, %cst_162 {dimension_numbers = #tpu.dot_dimension_numbers<[1], [0], [0], [1], [0, 0, 1, 1], [], []>} : vector<8x8xf32>, vector<8x48xf32>, vector<8x48xf32> -> vector<8x48xf32>
    %473 = vector.extract_strided_slice %445 {offsets = [0, 8], sizes = [8, 8], strides = [1, 1]} : vector<8x48xf32> to vector<8x8xf32>
    %474 = vector.extract_strided_slice %446 {offsets = [0, 8], sizes = [12, 8], strides = [1, 1]} : vector<12x48xf32> to vector<12x8xf32>
    %cst_163 = arith.constant dense<0.000000e+00> : vector<8x12xf32>
    %475 = tpu.matmul %473, %474, %cst_163 {dimension_numbers = #tpu.dot_dimension_numbers<[1], [1], [0], [0], [0, 0, 1, 0], [], []>} : vector<8x8xf32>, vector<12x8xf32>, vector<8x12xf32> -> vector<8x12xf32>
    %476 = arith.addf %475, %454 : vector<8x12xf32>
    %cst_164 = arith.constant dense<0xFF800000> : vector<8xf32>
    %477 = vector.multi_reduction <maximumf>, %476, %cst_164 [1] : vector<8x12xf32> to vector<8xf32>
    %478 = vector.shape_cast %477 : vector<8xf32> to vector<8x1xf32>
    %479 = vector.broadcast %478 : vector<8x1xf32> to vector<8x12xf32>
    %480 = arith.subf %476, %479 : vector<8x12xf32>
    %481 = math.exp %480 : vector<8x12xf32>
    %cst_165 = arith.constant dense<0.000000e+00> : vector<8xf32>
    %482 = vector.multi_reduction <add>, %481, %cst_165 [1] : vector<8x12xf32> to vector<8xf32>
    %483 = vector.shape_cast %482 : vector<8xf32> to vector<8x1xf32>
    %484 = tpu.reciprocal %483 {approx = true} : vector<8x1xf32> -> vector<8x1xf32>
    %485 = vector.broadcast %484 : vector<8x1xf32> to vector<8x12xf32>
    %486 = arith.mulf %481, %485 : vector<8x12xf32>
    %487 = vector.extract_strided_slice %447 {offsets = [0, 8], sizes = [12, 8], strides = [1, 1]} : vector<12x48xf32> to vector<12x8xf32>
    %cst_166 = arith.constant dense<0.000000e+00> : vector<8x8xf32>
    %488 = tpu.matmul %486, %487, %cst_166 {dimension_numbers = #tpu.dot_dimension_numbers<[1], [0], [0], [1], [0, 0, 1, 1], [], []>} : vector<8x12xf32>, vector<12x8xf32>, vector<8x8xf32> -> vector<8x8xf32>
    %489 = vector.extract_strided_slice %315 {offsets = [8, 0], sizes = [8, 48], strides = [1, 1]} : vector<48x48xf32> to vector<8x48xf32>
    %cst_167 = arith.constant dense<0.000000e+00> : vector<8x48xf32>
    %490 = tpu.matmul %488, %489, %cst_167 {dimension_numbers = #tpu.dot_dimension_numbers<[1], [0], [0], [1], [0, 0, 1, 1], [], []>} : vector<8x8xf32>, vector<8x48xf32>, vector<8x48xf32> -> vector<8x48xf32>
    %491 = arith.addf %472, %490 : vector<8x48xf32>
    %492 = vector.extract_strided_slice %445 {offsets = [0, 16], sizes = [8, 8], strides = [1, 1]} : vector<8x48xf32> to vector<8x8xf32>
    %493 = vector.extract_strided_slice %446 {offsets = [0, 16], sizes = [12, 8], strides = [1, 1]} : vector<12x48xf32> to vector<12x8xf32>
    %cst_168 = arith.constant dense<0.000000e+00> : vector<8x12xf32>
    %494 = tpu.matmul %492, %493, %cst_168 {dimension_numbers = #tpu.dot_dimension_numbers<[1], [1], [0], [0], [0, 0, 1, 0], [], []>} : vector<8x8xf32>, vector<12x8xf32>, vector<8x12xf32> -> vector<8x12xf32>
    %495 = arith.addf %494, %454 : vector<8x12xf32>
    %cst_169 = arith.constant dense<0xFF800000> : vector<8xf32>
    %496 = vector.multi_reduction <maximumf>, %495, %cst_169 [1] : vector<8x12xf32> to vector<8xf32>
    %497 = vector.shape_cast %496 : vector<8xf32> to vector<8x1xf32>
    %498 = vector.broadcast %497 : vector<8x1xf32> to vector<8x12xf32>
    %499 = arith.subf %495, %498 : vector<8x12xf32>
    %500 = math.exp %499 : vector<8x12xf32>
    %cst_170 = arith.constant dense<0.000000e+00> : vector<8xf32>
    %501 = vector.multi_reduction <add>, %500, %cst_170 [1] : vector<8x12xf32> to vector<8xf32>
    %502 = vector.shape_cast %501 : vector<8xf32> to vector<8x1xf32>
    %503 = tpu.reciprocal %502 {approx = true} : vector<8x1xf32> -> vector<8x1xf32>
    %504 = vector.broadcast %503 : vector<8x1xf32> to vector<8x12xf32>
    %505 = arith.mulf %500, %504 : vector<8x12xf32>
    %506 = vector.extract_strided_slice %447 {offsets = [0, 16], sizes = [12, 8], strides = [1, 1]} : vector<12x48xf32> to vector<12x8xf32>
    %cst_171 = arith.constant dense<0.000000e+00> : vector<8x8xf32>
    %507 = tpu.matmul %505, %506, %cst_171 {dimension_numbers = #tpu.dot_dimension_numbers<[1], [0], [0], [1], [0, 0, 1, 1], [], []>} : vector<8x12xf32>, vector<12x8xf32>, vector<8x8xf32> -> vector<8x8xf32>
    %508 = vector.extract_strided_slice %315 {offsets = [16, 0], sizes = [8, 48], strides = [1, 1]} : vector<48x48xf32> to vector<8x48xf32>
    %cst_172 = arith.constant dense<0.000000e+00> : vector<8x48xf32>
    %509 = tpu.matmul %507, %508, %cst_172 {dimension_numbers = #tpu.dot_dimension_numbers<[1], [0], [0], [1], [0, 0, 1, 1], [], []>} : vector<8x8xf32>, vector<8x48xf32>, vector<8x48xf32> -> vector<8x48xf32>
    %510 = arith.addf %491, %509 : vector<8x48xf32>
    %511 = vector.extract_strided_slice %445 {offsets = [0, 24], sizes = [8, 8], strides = [1, 1]} : vector<8x48xf32> to vector<8x8xf32>
    %512 = vector.extract_strided_slice %446 {offsets = [0, 24], sizes = [12, 8], strides = [1, 1]} : vector<12x48xf32> to vector<12x8xf32>
    %cst_173 = arith.constant dense<0.000000e+00> : vector<8x12xf32>
    %513 = tpu.matmul %511, %512, %cst_173 {dimension_numbers = #tpu.dot_dimension_numbers<[1], [1], [0], [0], [0, 0, 1, 0], [], []>} : vector<8x8xf32>, vector<12x8xf32>, vector<8x12xf32> -> vector<8x12xf32>
    %514 = arith.addf %513, %454 : vector<8x12xf32>
    %cst_174 = arith.constant dense<0xFF800000> : vector<8xf32>
    %515 = vector.multi_reduction <maximumf>, %514, %cst_174 [1] : vector<8x12xf32> to vector<8xf32>
    %516 = vector.shape_cast %515 : vector<8xf32> to vector<8x1xf32>
    %517 = vector.broadcast %516 : vector<8x1xf32> to vector<8x12xf32>
    %518 = arith.subf %514, %517 : vector<8x12xf32>
    %519 = math.exp %518 : vector<8x12xf32>
    %cst_175 = arith.constant dense<0.000000e+00> : vector<8xf32>
    %520 = vector.multi_reduction <add>, %519, %cst_175 [1] : vector<8x12xf32> to vector<8xf32>
    %521 = vector.shape_cast %520 : vector<8xf32> to vector<8x1xf32>
    %522 = tpu.reciprocal %521 {approx = true} : vector<8x1xf32> -> vector<8x1xf32>
    %523 = vector.broadcast %522 : vector<8x1xf32> to vector<8x12xf32>
    %524 = arith.mulf %519, %523 : vector<8x12xf32>
    %525 = vector.extract_strided_slice %447 {offsets = [0, 24], sizes = [12, 8], strides = [1, 1]} : vector<12x48xf32> to vector<12x8xf32>
    %cst_176 = arith.constant dense<0.000000e+00> : vector<8x8xf32>
    %526 = tpu.matmul %524, %525, %cst_176 {dimension_numbers = #tpu.dot_dimension_numbers<[1], [0], [0], [1], [0, 0, 1, 1], [], []>} : vector<8x12xf32>, vector<12x8xf32>, vector<8x8xf32> -> vector<8x8xf32>
    %527 = vector.extract_strided_slice %315 {offsets = [24, 0], sizes = [8, 48], strides = [1, 1]} : vector<48x48xf32> to vector<8x48xf32>
    %cst_177 = arith.constant dense<0.000000e+00> : vector<8x48xf32>
    %528 = tpu.matmul %526, %527, %cst_177 {dimension_numbers = #tpu.dot_dimension_numbers<[1], [0], [0], [1], [0, 0, 1, 1], [], []>} : vector<8x8xf32>, vector<8x48xf32>, vector<8x48xf32> -> vector<8x48xf32>
    %529 = arith.addf %510, %528 : vector<8x48xf32>
    %530 = vector.extract_strided_slice %445 {offsets = [0, 32], sizes = [8, 8], strides = [1, 1]} : vector<8x48xf32> to vector<8x8xf32>
    %531 = vector.extract_strided_slice %446 {offsets = [0, 32], sizes = [12, 8], strides = [1, 1]} : vector<12x48xf32> to vector<12x8xf32>
    %cst_178 = arith.constant dense<0.000000e+00> : vector<8x12xf32>
    %532 = tpu.matmul %530, %531, %cst_178 {dimension_numbers = #tpu.dot_dimension_numbers<[1], [1], [0], [0], [0, 0, 1, 0], [], []>} : vector<8x8xf32>, vector<12x8xf32>, vector<8x12xf32> -> vector<8x12xf32>
    %533 = arith.addf %532, %454 : vector<8x12xf32>
    %cst_179 = arith.constant dense<0xFF800000> : vector<8xf32>
    %534 = vector.multi_reduction <maximumf>, %533, %cst_179 [1] : vector<8x12xf32> to vector<8xf32>
    %535 = vector.shape_cast %534 : vector<8xf32> to vector<8x1xf32>
    %536 = vector.broadcast %535 : vector<8x1xf32> to vector<8x12xf32>
    %537 = arith.subf %533, %536 : vector<8x12xf32>
    %538 = math.exp %537 : vector<8x12xf32>
    %cst_180 = arith.constant dense<0.000000e+00> : vector<8xf32>
    %539 = vector.multi_reduction <add>, %538, %cst_180 [1] : vector<8x12xf32> to vector<8xf32>
    %540 = vector.shape_cast %539 : vector<8xf32> to vector<8x1xf32>
    %541 = tpu.reciprocal %540 {approx = true} : vector<8x1xf32> -> vector<8x1xf32>
    %542 = vector.broadcast %541 : vector<8x1xf32> to vector<8x12xf32>
    %543 = arith.mulf %538, %542 : vector<8x12xf32>
    %544 = vector.extract_strided_slice %447 {offsets = [0, 32], sizes = [12, 8], strides = [1, 1]} : vector<12x48xf32> to vector<12x8xf32>
    %cst_181 = arith.constant dense<0.000000e+00> : vector<8x8xf32>
    %545 = tpu.matmul %543, %544, %cst_181 {dimension_numbers = #tpu.dot_dimension_numbers<[1], [0], [0], [1], [0, 0, 1, 1], [], []>} : vector<8x12xf32>, vector<12x8xf32>, vector<8x8xf32> -> vector<8x8xf32>
    %546 = vector.extract_strided_slice %315 {offsets = [32, 0], sizes = [8, 48], strides = [1, 1]} : vector<48x48xf32> to vector<8x48xf32>
    %cst_182 = arith.constant dense<0.000000e+00> : vector<8x48xf32>
    %547 = tpu.matmul %545, %546, %cst_182 {dimension_numbers = #tpu.dot_dimension_numbers<[1], [0], [0], [1], [0, 0, 1, 1], [], []>} : vector<8x8xf32>, vector<8x48xf32>, vector<8x48xf32> -> vector<8x48xf32>
    %548 = arith.addf %529, %547 : vector<8x48xf32>
    %549 = vector.extract_strided_slice %445 {offsets = [0, 40], sizes = [8, 8], strides = [1, 1]} : vector<8x48xf32> to vector<8x8xf32>
    %550 = vector.extract_strided_slice %446 {offsets = [0, 40], sizes = [12, 8], strides = [1, 1]} : vector<12x48xf32> to vector<12x8xf32>
    %cst_183 = arith.constant dense<0.000000e+00> : vector<8x12xf32>
    %551 = tpu.matmul %549, %550, %cst_183 {dimension_numbers = #tpu.dot_dimension_numbers<[1], [1], [0], [0], [0, 0, 1, 0], [], []>} : vector<8x8xf32>, vector<12x8xf32>, vector<8x12xf32> -> vector<8x12xf32>
    %552 = arith.addf %551, %454 : vector<8x12xf32>
    %cst_184 = arith.constant dense<0xFF800000> : vector<8xf32>
    %553 = vector.multi_reduction <maximumf>, %552, %cst_184 [1] : vector<8x12xf32> to vector<8xf32>
    %554 = vector.shape_cast %553 : vector<8xf32> to vector<8x1xf32>
    %555 = vector.broadcast %554 : vector<8x1xf32> to vector<8x12xf32>
    %556 = arith.subf %552, %555 : vector<8x12xf32>
    %557 = math.exp %556 : vector<8x12xf32>
    %cst_185 = arith.constant dense<0.000000e+00> : vector<8xf32>
    %558 = vector.multi_reduction <add>, %557, %cst_185 [1] : vector<8x12xf32> to vector<8xf32>
    %559 = vector.shape_cast %558 : vector<8xf32> to vector<8x1xf32>
    %560 = tpu.reciprocal %559 {approx = true} : vector<8x1xf32> -> vector<8x1xf32>
    %561 = vector.broadcast %560 : vector<8x1xf32> to vector<8x12xf32>
    %562 = arith.mulf %557, %561 : vector<8x12xf32>
    %563 = vector.extract_strided_slice %447 {offsets = [0, 40], sizes = [12, 8], strides = [1, 1]} : vector<12x48xf32> to vector<12x8xf32>
    %cst_186 = arith.constant dense<0.000000e+00> : vector<8x8xf32>
    %564 = tpu.matmul %562, %563, %cst_186 {dimension_numbers = #tpu.dot_dimension_numbers<[1], [0], [0], [1], [0, 0, 1, 1], [], []>} : vector<8x12xf32>, vector<12x8xf32>, vector<8x8xf32> -> vector<8x8xf32>
    %565 = vector.extract_strided_slice %315 {offsets = [40, 0], sizes = [8, 48], strides = [1, 1]} : vector<48x48xf32> to vector<8x48xf32>
    %cst_187 = arith.constant dense<0.000000e+00> : vector<8x48xf32>
    %566 = tpu.matmul %564, %565, %cst_187 {dimension_numbers = #tpu.dot_dimension_numbers<[1], [0], [0], [1], [0, 0, 1, 1], [], []>} : vector<8x8xf32>, vector<8x48xf32>, vector<8x48xf32> -> vector<8x48xf32>
    %567 = arith.addf %548, %566 : vector<8x48xf32>
    %568 = tpu.concatenate %444, %567 in 0 : vector<8x48xf32>, vector<8x48xf32> -> vector<16x48xf32>
    %569 = vector.broadcast %316 : vector<1x48xf32> to vector<16x48xf32>
    %570 = arith.addf %568, %569 : vector<16x48xf32>
    %571 = arith.addf %287, %570 : vector<16x48xf32>
    %c0_188 = arith.constant 0 : index
    %c0_189 = arith.constant 0 : index
    %572 = vector.load %arg8[%c0_188, %c0_189] : memref<1x48xf32, #tpu.memory_space<vmem>>, vector<1x48xf32>
    %c0_190 = arith.constant 0 : index
    %c0_191 = arith.constant 0 : index
    %573 = vector.load %arg9[%c0_190, %c0_191] : memref<1x48xf32, #tpu.memory_space<vmem>>, vector<1x48xf32>
    %cst_192 = arith.constant dense<0.000000e+00> : vector<16xf32>
    %574 = vector.multi_reduction <add>, %571, %cst_192 [1] : vector<16x48xf32> to vector<16xf32>
    %575 = vector.shape_cast %574 : vector<16xf32> to vector<16x1xf32>
    %cst_193 = arith.constant 4.800000e+01 : f32
    %576 = vector.broadcast %cst_193 : f32 to vector<16x1xf32>
    %577 = arith.divf %575, %576 : vector<16x1xf32>
    %578 = vector.broadcast %577 : vector<16x1xf32> to vector<16x48xf32>
    %579 = arith.subf %571, %578 : vector<16x48xf32>
    %580 = arith.mulf %579, %579 : vector<16x48xf32>
    %cst_194 = arith.constant dense<0.000000e+00> : vector<16xf32>
    %581 = vector.multi_reduction <add>, %580, %cst_194 [1] : vector<16x48xf32> to vector<16xf32>
    %582 = vector.shape_cast %581 : vector<16xf32> to vector<16x1xf32>
    %cst_195 = arith.constant 0.0212765951 : f32
    %583 = vector.broadcast %cst_195 : f32 to vector<16x1xf32>
    %584 = arith.mulf %582, %583 : vector<16x1xf32>
    %585 = math.sqrt %584 : vector<16x1xf32>
    %cst_196 = arith.constant 9.99999997E-7 : f32
    %586 = vector.broadcast %cst_196 : f32 to vector<16x1xf32>
    %587 = arith.addf %585, %586 : vector<16x1xf32>
    %cst_197 = arith.constant 1.000000e+00 : f32
    %588 = vector.broadcast %cst_197 : f32 to vector<16x1xf32>
    %589 = arith.divf %588, %587 : vector<16x1xf32>
    %590 = vector.broadcast %589 : vector<16x1xf32> to vector<16x48xf32>
    %591 = arith.mulf %579, %590 : vector<16x48xf32>
    %592 = vector.broadcast %572 : vector<1x48xf32> to vector<16x48xf32>
    %593 = arith.mulf %592, %591 : vector<16x48xf32>
    %594 = vector.broadcast %573 : vector<1x48xf32> to vector<16x48xf32>
    %595 = arith.addf %593, %594 : vector<16x48xf32>
    %c0_198 = arith.constant 0 : index
    %c0_199 = arith.constant 0 : index
    %596 = vector.load %arg20[%c0_198, %c0_199] : memref<48x2048xf32, #tpu.memory_space<vmem>>, vector<48x2048xf32>
    %cst_200 = arith.constant dense<0.000000e+00> : vector<16x2048xf32>
    %597 = tpu.matmul %595, %596, %cst_200 {dimension_numbers = #tpu.dot_dimension_numbers<[1], [0], [0], [1], [0, 0, 1, 1], [], []>} : vector<16x48xf32>, vector<48x2048xf32>, vector<16x2048xf32> -> vector<16x2048xf32>
    %c0_201 = arith.constant 0 : index
    %c0_202 = arith.constant 0 : index
    %598 = vector.load %arg21[%c0_201, %c0_202] : memref<1x2048xf32, #tpu.memory_space<vmem>>, vector<1x2048xf32>
    %599 = vector.broadcast %598 : vector<1x2048xf32> to vector<16x2048xf32>
    %600 = arith.addf %597, %599 : vector<16x2048xf32>
    %cst_203 = arith.constant 0.000000e+00 : f32
    %601 = vector.broadcast %cst_203 : f32 to vector<16x2048xf32>
    %602 = arith.maximumf %600, %601 : vector<16x2048xf32>
    %c0_204 = arith.constant 0 : index
    %c0_205 = arith.constant 0 : index
    %603 = vector.load %arg22[%c0_204, %c0_205] : memref<2048x48xf32, #tpu.memory_space<vmem>>, vector<2048x48xf32>
    %cst_206 = arith.constant dense<0.000000e+00> : vector<16x48xf32>
    %604 = tpu.matmul %602, %603, %cst_206 {dimension_numbers = #tpu.dot_dimension_numbers<[1], [0], [0], [1], [0, 0, 1, 1], [], []>} : vector<16x2048xf32>, vector<2048x48xf32>, vector<16x48xf32> -> vector<16x48xf32>
    %605 = arith.addf %571, %604 : vector<16x48xf32>
    %c0_207 = arith.constant 0 : index
    %c0_208 = arith.constant 0 : index
    %606 = vector.load %arg23[%c0_207, %c0_208] : memref<1x48xf32, #tpu.memory_space<vmem>>, vector<1x48xf32>
    %607 = vector.broadcast %606 : vector<1x48xf32> to vector<16x48xf32>
    %608 = arith.addf %605, %607 : vector<16x48xf32>
    %c0_209 = arith.constant 0 : index
    %c0_210 = arith.constant 0 : index
    %609 = vector.load %arg24[%c0_209, %c0_210] : memref<16x48xf32, #tpu.memory_space<vmem>>, vector<16x48xf32>
    tpu.vector_store %arg24[%c0_209, %c0_210], %608 {strides = array<i32>} : memref<16x48xf32, #tpu.memory_space<vmem>>, vector<16x48xf32>,
    return
  }
}

</mosaic_0001>

<bundles_post_ra>
// kernel: tpu_custom_call.1
= control target key start
LH: loop header
LB: loop body
LE: loop exit
PB: predicated region body
PF: predicated region fallthrough
CT: control target
= control target key end

     0   :  { %s12746_s0 = inlined_call_operand.vmem [shape: f32[16,48], index: 0, kind: input, shape index: {}]   ;;  %s12747_s1 = inlined_call_operand.vmem [shape: f32[24,48], index: 1, kind: input, shape index: {}]   ;;  %s12748_s2 = inlined_call_operand.vmem [shape: f32[2,8,8], index: 2, kind: input, shape index: {}]   ;;  %s12749_s3 = inlined_call_operand.vmem [shape: f32[2,8,12], index: 3, kind: input, shape index: {}]   ;;  %s12750_s4 = inlined_call_operand.vmem [shape: f32[1,48], index: 4, kind: input, shape index: {}]   ;;  %s12751_s5 = inlined_call_operand.vmem [shape: f32[1,48], index: 5, kind: input, shape index: {}]   ;;  %s12752_s6 = inlined_call_operand.vmem [shape: f32[1,48], index: 6, kind: input, shape index: {}]   ;;  %s12753_s7 = inlined_call_operand.vmem [shape: f32[1,48], index: 7, kind: input, shape index: {}]   ;;  %s12754_s8 = inlined_call_operand.vmem [shape: f32[1,48], index: 8, kind: input, shape index: {}]   ;;  %s12755_s9 = inlined_call_operand.vmem [shape: f32[1,48], index: 9, kind: input, shape index: {}]   ;;  %s12756_s10 = inlined_call_operand.vmem [shape: f32[48,48], index: 10, kind: input, shape index: {}]   ;;  %s12757_s11 = inlined_call_operand.vmem [shape: f32[48,48], index: 11, kind: input, shape index: {}]   ;;  %s12758_s12 = inlined_call_operand.vmem [shape: f32[48,48], index: 12, kind: input, shape index: {}]   ;;  %s12759_s13 = inlined_call_operand.vmem [shape: f32[48,48], index: 13, kind: input, shape index: {}]   ;;  %s12760_s14 = inlined_call_operand.vmem [shape: f32[1,48], index: 14, kind: input, shape index: {}]   ;;  %s12761_s15 = inlined_call_operand.vmem [shape: f32[48,48], index: 15, kind: input, shape index: {}]   ;;  %s12762_s16 = inlined_call_operand.vmem [shape: f32[48,48], index: 16, kind: input, shape index: {}]   ;;  %s12763_s17 = inlined_call_operand.vmem [shape: f32[48,48], index: 17, kind: input, shape index: {}]   ;;  %s12764_s18 = inlined_call_operand.vmem [shape: f32[48,48], index: 18, kind: input, shape index: {}]   ;;  %s12765_s19 = inlined_call_operand.vmem [shape: f32[1,48], index: 19, kind: input, shape index: {}]   ;;  %s12766_s20 = inlined_call_operand.vmem [shape: f32[48,2048], index: 20, kind: input, shape index: {}]   ;;  %s12767_s21 = inlined_call_operand.vmem [shape: f32[1,2048], index: 21, kind: input, shape index: {}]   ;;  %s12768_s22 = inlined_call_operand.vmem [shape: f32[2048,48], index: 22, kind: input, shape index: {}]   ;;  %s12769_s23 = inlined_call_operand.vmem [shape: f32[1,48], index: 23, kind: input, shape index: {}]   ;;  %s12770_s24 = inlined_call_operand.hbm [shape: f32[16,48], index: 24, kind: output, shape index: {}]  }
   0x1   :  { %12775 = sst [smem:[#allocation5_spill]] %s12746_s0 }
   0x2   :  { %12776 = sst [smem:[#allocation6_spill]] %s12747_s1 }
   0x3   :  { %12777 = sst [smem:[#allocation7_spill]] %s12748_s2 }
   0x4   :  { %12778 = sst [smem:[#allocation8_spill]] %s12749_s3 }
   0x5   :  { %12779 = sst [smem:[#allocation9_spill]] %s12750_s4 }
   0x6   :  { %12780 = sst [smem:[#allocation10_spill]] %s12751_s5 }
   0x7   :  { %12781 = sst [smem:[#allocation11_spill]] %s12752_s6 }
   0x8   :  { %12782 = sst [smem:[#allocation12_spill]] %s12753_s7 }
   0x9   :  { %12783 = sst [smem:[#allocation13_spill]] %s12754_s8 }
   0xa   :  { %s12784_s27 = sld [smem:[#allocation5_spill]]  ;;  %vm89_vm0 = vcmask 392192  }
  0x10   :  { %v78_v0 = vld [vmem:[%s12784_s27] sm:$0xff]  ;;  %v79_v1 = vld [vmem:[%s12784_s27 + $0x8] sm:$0xff] }
  0x11   :  { %29 = vsyncpa [#allocation3], 0  ;;  %v90_v2 = vsel %vm89_vm0, %v78_v0, 0.0  ;;  %v93_v3 = vsel %vm89_vm0, %v79_v1, 0.0  ;;  %v149_v14 = vld [vmem:[%s12756_s10] sm:$0xff]  ;;  %v150_v15 = vld [vmem:[%s12756_s10 + $0x8] sm:$0xff] }
  0x12   :  { %91 = vadd.xlane.f32.xlu0 %v90_v2  ;;  %v155_v16 = vld [vmem:[%s12757_s11] sm:$0xff]  ;;  %v9554_v17 = vpack.c.bf16 %v150_v15, %v149_v14  ;;  %v156_v18 = vld [vmem:[%s12757_s11 + $0x8] sm:$0xff]  ;;  %v151_v19 = vld [vmem:[%s12756_s10 + $0x10] sm:$0xff]  ;;  %s12785_s2 = sld [smem:[#allocation9_spill]]  ;;  %s12786_s7 = sld [smem:[#allocation10_spill]]  ;;  %vm10327_vm5 = vmmov 0  }
  0x13   :  { %v152_v20 = vld [vmem:[%s12756_s10 + $0x18] sm:$0xff]  ;;  %v9566_v21 = vpack.c.bf16 %v156_v18, %v155_v16  ;;  %v157_v23 = vld [vmem:[%s12757_s11 + $0x10] sm:$0xff]  ;;  %v153_v25 = vld [vmem:[%s12756_s10 + $0x20] sm:$0xff]  ;;  %vm409_vm6 = vcmask 64512   ;;  %s12787_s28 = sld [smem:[#allocation7_spill]]  ;;  %s10329_s6 = smov 112  }
  0x14   :  { %v9558_v22 = vpack.c.bf16 %v152_v20, %v151_v19  ;;  %v158_v24 = vld [vmem:[%s12757_s11 + $0x18] sm:$0xff]  ;;  %9555 = vmatprep.subr.bf16.mxu0 %v9554_v17  ;;  %v154_v27 = vld [vmem:[%s12756_s10 + $0x28] sm:$0xff]  ;;  %v159_v29 = vld [vmem:[%s12757_s11 + $0x20] sm:$0xff]  ;;  %s10330_s30 = smov 104   ;;  %s10331_s8 = smov 96   ;;  %vm3711_vm14 = vcmask 1043456  }
  0x15   :  { %v9570_v26 = vpack.c.bf16 %v158_v24, %v157_v23  ;;  %9557 = vmatpush3.bf16.msra.mxu0 %v9554_v17  ;;  %9567 = vmatprep.subr.bf16.mxu1 %v9566_v21  ;;  %v9562_v28 = vpack.c.bf16 %v154_v27, %v153_v25  ;;  %v160_v30 = vld [vmem:[%s12757_s11 + $0x28] sm:$0xff]  ;;  %v161_v32 = vld [vmem:[%s12758_s12] sm:$0xff]  ;;  %v163_v59 = vld [vmem:[%s12758_s12 + $0x10] sm:$0xff]  ;;  %s10328_s11 = smov 120   ;;  %s10332_s10 = smov 88   ;;  %vm10334_vm15 = vmmov 1  }
  0x16   :  { %94 = vadd.xlane.f32.xlu0 %v93_v3  ;;  %9569 = vmatpush3.bf16.msra.mxu1 %v9566_v21  ;;  %v9574_v31 = vpack.c.bf16 %v160_v30, %v159_v29  ;;  %v162_v33 = vld [vmem:[%s12758_s12 + $0x8] sm:$0xff]  ;;  %v164_v60 = vld [vmem:[%s12758_s12 + $0x18] sm:$0xff]  ;;  %v10326_v3 = vmov 0.0   ;;  %s12788_s0 = sld [smem:[#allocation11_spill]]  ;;  %s12789_s1 = sld [smem:[#allocation12_spill]]  ;;  %vm10987_vm13 = vmpackc.low %vm409_vm6, %vm409_vm6 }
  0x17   :  { %9559 = vmatprep.subr.bf16.mxu0 %v9558_v22  ;;  %9571 = vmatprep.subr.bf16.mxu1 %v9570_v26  ;;  %v9578_v34 = vpack.c.bf16 %v162_v33, %v161_v32  ;;  %v9582_v63 = vpack.c.bf16 %v164_v60, %v163_v59  ;;  %s12790_s26 = sld [smem:[#allocation6_spill]] }
  0x18   :  { %v8363_v52 = vld [vmem:[%s12785_s2] ss:$0 sm:$0xff] }
  0x19   :  { %9561 = vmatpush3.bf16.msra.mxu0 %v9558_v22  ;;  %v8364_v54 = vld [vmem:[%s12786_s7] ss:$0 sm:$0xff] }
  0x1a   :  { %9573 = vmatpush3.bf16.msra.mxu1 %v9570_v26  ;;  %9563 = vmatprep.subr.bf16.mxu0 %v9562_v28 }
  0x1b   :  { %9575 = vmatprep.subr.bf16.mxu1 %v9574_v31 }
  0x1d   :  { %9565 = vmatpush3.bf16.msra.mxu0 %v9562_v28 }
  0x1e   :  { %9577 = vmatpush3.bf16.msra.mxu1 %v9574_v31  ;;  %9579 = vmatprep.subr.bf16.mxu0 %v9578_v34 }
  0x1f   :  { %9089 = vmatprep.subr.mxu1 %v10326_v3 }
  0x9f   :  { %v92_v4 = vpop.xlane.xlu0 %91 }
  0xa0   :  { %v97_v5 = vmul.f32 0.020833334, %v92_v4 }
  0xa2   :  { %v10471_v6 = vsub.f32 %v78_v0, %v97_v5  ;;  %v165_v0 = vld [vmem:[%s12758_s12 + $0x20] sm:$0xff] }
  0xa3   :  { %v95_v7 = vpop.xlane.xlu0 %94 }
  0xa4   :  { %v98_v8 = vmul.f32 0.020833334, %v95_v7  ;;  %v101_v9 = vmul.f32 %v10471_v6, %v10471_v6 }
  0xa6   :  { %v10475_v10 = vsub.f32 %v79_v1, %v98_v8  ;;  %v103_v11 = vsel %vm89_vm0, %v101_v9, 0.0  ;;  %v166_v1 = vld [vmem:[%s12758_s12 + $0x28] sm:$0xff] }
  0xa7   :  { %104 = vadd.xlane.f32.xlu1 %v103_v11  ;;  %v9586_v2 = vpack.c.bf16 %v166_v1, %v165_v0  ;;  %v83_v11 = vld [vmem:[%s12787_s28] sm:$0xff] }
  0xa8   :  { %v102_v12 = vmul.f32 %v10475_v10, %v10475_v10  ;;  %vm407_vm7 = vcmp.eq.f32.partialorder %v83_v11, 0.0  ;;  %v10656_v11 = vld [vmem:[%s12759_s13 + $0x10] sm:$0xff] }
  0xaa   :  { %v106_v13 = vsel %vm89_vm0, %v102_v12, 0.0  ;;  %v10580_v12 = vsel %vm407_vm7, -1e+09, %v10326_v3 }
  0xab   :  { %107 = vadd.xlane.f32.xlu1 %v106_v13 }
 0x134   :  { %v105_v35 = vpop.xlane.xlu1 %104 }
 0x135   :  { %v109_v36 = vmul.f32 0.021276595, %v105_v35 }
 0x137   :  { %10180 = vrsqrt.f32 %v109_v36  ;;  %vm113_vm1 = vcmp.eq.f32.partialorder %v109_v36, inf  ;;  %v116_v41 = vand.u32 2147483648, %v109_v36  ;;  %vm115_vm2 = vcmp.eq.f32.partialorder %v109_v36, 0.0 }
 0x138   :  { %v108_v37 = vpop.xlane.xlu1 %107 }
 0x139   :  { %v110_v38 = vmul.f32 0.021276595, %v108_v37 }
 0x13b   :  { %10182 = vrsqrt.f32 %v110_v38  ;;  %vm120_vm3 = vcmp.eq.f32.partialorder %v110_v38, inf  ;;  %v123_v47 = vand.u32 2147483648, %v110_v38  ;;  %vm122_vm4 = vcmp.eq.f32.partialorder %v110_v38, 0.0 }
 0x141   :  { %v10181_v39 = vpop.eup %10180 }
 0x142   :  { %v112_v40 = vmul.f32 %v10181_v39, %v109_v36 }
 0x144   :  { %v114_v42 = vsel %vm113_vm1, %v109_v36, %v112_v40  ;;  %vm11057_vm1 = vmpackc.low %vm3711_vm14, %vm10334_vm15 }
 0x145   :  { %v10183_v43 = vpop.eup %10182  ;;  %v117_v44 = vsel %vm115_vm2, %v116_v41, %v114_v42 }
 0x146   :  { %v119_v45 = vmul.f32 %v10183_v43, %v110_v38  ;;  %v125_v46 = vadd.f32 1e-06, %v117_v44  ;;  %v10617_v43 = vld [vmem:[%s12759_s13] sm:$0xff] }
 0x148   :  { %v121_v48 = vsel %vm120_vm3, %v110_v38, %v119_v45  ;;  %10184 = vrcp.f32 %v125_v46  ;;  %v10609_v38 = vld [vmem:[%s12759_s13 + $0x8] sm:$0xff]  ;;  %vm3696_vm3 = vcmask 97280  }
 0x149   :  { %v124_v49 = vsel %vm122_vm4, %v123_v47, %v121_v48 }
 0x14a   :  { %v126_v50 = vadd.f32 1e-06, %v124_v49 }
 0x14c   :  { %10186 = vrcp.f32 %v126_v50 }
 0x152   :  { %v10185_v51 = vpop.eup %10184 }
 0x153   :  { %v131_v53 = vmul.f32 %v10185_v51, %v10471_v6 }
 0x155   :  { %v139_v55 = vmul.f32 %v8363_v52, %v131_v53 }
 0x156   :  { %v10187_v56 = vpop.eup %10186 }
 0x157   :  { %v132_v57 = vmul.f32 %v10187_v56, %v10475_v10  ;;  %v147_v58 = vadd.f32 %v8364_v54, %v139_v55 }
 0x159   :  { %v140_v61 = vmul.f32 %v8363_v52, %v132_v57  ;;  %9056 = vmatprep.mubr.msk.f32.mxu0 %vm89_vm0, %v147_v58  ;;  %9071 = vmatprep.mubr.msk.f32.mxu1 %vm89_vm0, %v147_v58 }
 0x15b   :  { %v148_v62 = vadd.f32 %v8364_v54, %v140_v61 }
 0x15d   :  { %9057 = vmatmul.mubr.msk.f32.vlgmr.msra.gmra.mrb[0].mxu0 %vm89_vm0, %v148_v62  ;;  %9072 = vmatmul.mubr.msk.f32.vlgmr.msra.gmra.mrb[0].mxu1 %vm89_vm0, %v148_v62 }
 0x15e   :  { %9581 = vmatpush3.bf16.msra.mxu0 %v9578_v34  ;;  %9086 = vmatprep.mubr.msk.f32.mxu0 %vm89_vm0, %v147_v58 }
 0x15f   :  { %9583 = vmatprep.subr.bf16.mxu0 %v9582_v63  ;;  %9091 = vmatprep.mubr.msk.f32.mxu1 %vm10327_vm5, %v10326_v3 }
 0x162   :  { %9585 = vmatpush3.bf16.msra.mxu0 %v9582_v63 }
 0x163   :  { %9587 = vmatprep.subr.bf16.mxu0 %v9586_v2 }
 0x166   :  { %9589 = vmatpush3.bf16.msra.mxu0 %v9586_v2 }
 0x167   :  { %9104 = vmatprep.subr.mxu0 %v10326_v3 }
 0x169   :  { %9087 = vmatmul.mubr.msk.f32.vlgmr.msra.gmra.mrb[2].mxu0 %vm89_vm0, %v148_v62 }
 0x16a   :  { %9106 = vmatprep.mubr.msk.f32.mxu0 %vm10327_vm5, %v10326_v3 }
 0x230   :  { %v10555_v4 = vpop.f32.mrb[0].mxu0  ;;  %v10557_v5 = vpop.f32.mrb[0].mxu1 }
 0x231   :  { %v246_v6 = vpop.f32.mrb[1].mxu0  ;;  %v10559_v7 = vpop.f32.mrb[1].mxu1 }
 0x232   :  { %v10561_v8 = vmul.f32 0.35355338, %v246_v6  ;;  %9090 = vmatpush3.xpose.msk.msra.mxu1 %vm409_vm6, %v10559_v7 }
 0x233   :  { %9094 = vmatprep.subr.mxu1 %v10326_v3 }
 0x235   :  { %9092 = vmatmul.mubr.msk.f32.vlgmr.msra.gmra.mrb[2].mxu1 %vm409_vm6, %v10561_v8 }
 0x236   :  { %9096 = vmatprep.mubr.msk.f32.mxu1 %vm10327_vm5, %v10326_v3 }
 0x23c   :  { %v10570_v9 = vpop.f32.mrb[2].mxu0 }
 0x23d   :  { %v10572_v10 = vpop.f32.mrb[3].mxu0 }
 0x23e   :  { %9095 = vmatpush3.msra.mxu1 %v10572_v10 }
 0x23f   :  { %9099 = vmatprep.subr.mxu1 %v10326_v3 }
 0x308   :  { %v482_v13 = vpop.f32.mrb[2].mxu1 }
 0x309   :  { %v483_v14 = vadd.f32 %v482_v13, %v10580_v12  ;;  %v9093_v15 = vpop.f32.mrb[3].mxu1 }
 0x30b   :  { %v486_v16 = vsel %vm409_vm6, %v483_v14, -inf }
 0x30c   :  { %487 = vmax.xlane.f32.xlu0 %v486_v16 }
 0x322   :  { %572 = vrot.lane.b32.xlu0 %v10559_v7, %s10328_s11 }
 0x399   :  { %v488_v17 = vpop.xlane.xlu0 %487 }
 0x39a   :  { %v489_v18 = vsub.f32 %v483_v14, %v488_v17 }
 0x39c   :  { %v490_v19 = vmul.f32 1.442695, %v489_v18 }
 0x39d   :  { %v573_v25 = vpop.permute.xlu0 %572 }
 0x39e   :  { %10188 = vpow2.f32 %v490_v19 }
 0x3a8   :  { %v10189_v20 = vpop.eup %10188 }
 0x3a9   :  { %v492_v21 = vsel %vm409_vm6, %v10189_v20, 0.0 }
 0x3aa   :  { %493 = vadd.xlane.f32.xlu1 %v492_v21 }
 0x3bb   :  { %570 = vrot.lane.b32.xlu1 %v10561_v8, %s10328_s11 }
 0x437   :  { %v494_v22 = vpop.xlane.xlu1 %493 }
 0x438   :  { %10190 = vrcp.f32 %v494_v22 }
 0x43b   :  { %v571_v26 = vpop.permute.xlu1 %570 }
 0x442   :  { %v10191_v23 = vpop.eup %10190 }
 0x443   :  { %v496_v24 = vmul.f32 %v10191_v23, %v10189_v20 }
 0x445   :  { %9097 = vmatmul.mubr.msk.f32.vlgmr.msra.gmra.mrb[4].mxu1 %vm409_vm6, %v496_v24 }
 0x446   :  { %9100 = vmatpush3.xpose.msk.msra.mxu1 %vm409_vm6, %v573_v25  ;;  %9101 = vmatprep.mubr.msk.f32.mxu1 %vm10327_vm5, %v10326_v3 }
 0x447   :  { %9109 = vmatprep.subr.mxu1 %v10326_v3 }
 0x449   :  { %9102 = vmatmul.mubr.msk.f32.vlgmr.msra.gmra.mrb[6].mxu1 %vm409_vm6, %v571_v26 }
 0x44a   :  { %9111 = vmatprep.mubr.msk.f32.mxu1 %vm10327_vm5, %v10326_v3  ;;  %9110 = vmatpush3.msra.mxu1 %v10609_v38 }
 0x44b   :  { %9119 = vmatprep.subr.mxu1 %v10326_v3 }
 0x518   :  { %v566_v27 = vpop.f32.mrb[4].mxu1 }
 0x519   :  { %v9098_v28 = vpop.f32.mrb[5].mxu1 }
 0x51c   :  { %v644_v29 = vpop.f32.mrb[6].mxu1 }
 0x51d   :  { %v645_v30 = vadd.f32 %v644_v29, %v10580_v12  ;;  %v9103_v31 = vpop.f32.mrb[7].mxu1 }
 0x51f   :  { %v648_v32 = vsel %vm409_vm6, %v645_v30, -inf }
 0x520   :  { %649 = vmax.xlane.f32.xlu1 %v648_v32 }
 0x531   :  { %884 = vrot.lane.b32.xlu1 %v10559_v7, %s10329_s6 }
 0x535   :  { %882 = vrot.lane.b32.xlu1 %v10561_v8, %s10329_s6 }
 0x5ad   :  { %v650_v33 = vpop.xlane.xlu1 %649 }
 0x5ae   :  { %v651_v34 = vsub.f32 %v645_v30, %v650_v33  ;;  %v10684_v33 = vld [vmem:[%s12759_s13 + $0x18] sm:$0xff] }
 0x5b0   :  { %v652_v35 = vmul.f32 1.442695, %v651_v34 }
 0x5b1   :  { %v885_v44 = vpop.permute.xlu1 %884 }
 0x5b2   :  { %10192 = vpow2.f32 %v652_v35 }
 0x5b5   :  { %v883_v47 = vpop.permute.xlu1 %882 }
 0x5bc   :  { %v10193_v36 = vpop.eup %10192 }
 0x5bd   :  { %v654_v37 = vsel %vm409_vm6, %v10193_v36, 0.0 }
 0x5be   :  { %655 = vadd.xlane.f32.xlu0 %v654_v37 }
 0x5d4   :  { %660 = vrot.lane.b32.xlu0 %v10572_v10, %s10328_s11 }
 0x64b   :  { %v656_v39 = vpop.xlane.xlu0 %655 }
 0x64c   :  { %10194 = vrcp.f32 %v656_v39 }
 0x64f   :  { %v661_v40 = vpop.permute.xlu0 %660 }
 0x650   :  { %9105 = vmatpush3.msra.mxu0 %v661_v40 }
 0x651   :  { %9114 = vmatprep.subr.mxu0 %v10326_v3 }
 0x656   :  { %v10195_v41 = vpop.eup %10194 }
 0x657   :  { %v658_v42 = vmul.f32 %v10195_v41, %v10193_v36 }
 0x659   :  { %9107 = vmatmul.mubr.msk.f32.vlgmr.msra.gmra.mrb[4].mxu0 %vm409_vm6, %v658_v42 }
 0x65a   :  { %9115 = vmatpush3.msra.mxu0 %v10617_v43  ;;  %9116 = vmatprep.mubr.msk.f32.mxu0 %vm10327_vm5, %v10326_v3 }
 0x65b   :  { %9124 = vmatprep.subr.mxu0 %v10326_v3 }
 0x65d   :  { %9117 = vmatmul.mubr.msk.f32.vlgmr.msra.gmra.mrb[6].mxu0 %vm409_vm6, %v566_v27 }
 0x65e   :  { %9126 = vmatprep.mubr.msk.f32.mxu0 %vm10327_vm5, %v10326_v3 }
 0x72c   :  { %v732_v45 = vpop.f32.mrb[4].mxu0 }
 0x72d   :  { %v9108_v46 = vpop.f32.mrb[5].mxu0  ;;  %9112 = vmatmul.mubr.msk.f32.vlgmr.msra.gmra.mrb[8].mxu1 %vm409_vm6, %v732_v45 }
 0x72e   :  { %9120 = vmatpush3.xpose.msk.msra.mxu1 %vm409_vm6, %v885_v44  ;;  %9121 = vmatprep.mubr.msk.f32.mxu1 %vm10327_vm5, %v10326_v3 }
 0x72f   :  { %9129 = vmatprep.subr.mxu1 %v10326_v3 }
 0x730   :  { %v878_v48 = vpop.f32.mrb[6].mxu0 }
 0x731   :  { %v9118_v49 = vpop.f32.mrb[7].mxu0  ;;  %9122 = vmatmul.mubr.msk.f32.vlgmr.msra.gmra.mrb[10].mxu1 %vm409_vm6, %v883_v47 }
 0x732   :  { %9131 = vmatprep.mubr.msk.f32.mxu1 %vm10327_vm5, %v10326_v3  ;;  %9130 = vmatpush3.msra.mxu1 %v10656_v11 }
 0x733   :  { %9139 = vmatprep.subr.mxu1 %v10326_v3 }
 0x800   :  { %v805_v50 = vpop.f32.mrb[8].mxu1 }
 0x801   :  { %v879_v51 = vadd.f32 %v878_v48, %v805_v50  ;;  %v9113_v52 = vpop.f32.mrb[9].mxu1 }
 0x804   :  { %v956_v53 = vpop.f32.mrb[10].mxu1 }
 0x805   :  { %v957_v54 = vadd.f32 %v956_v53, %v10580_v12  ;;  %v9123_v55 = vpop.f32.mrb[11].mxu1 }
 0x807   :  { %v960_v56 = vsel %vm409_vm6, %v957_v54, -inf }
 0x808   :  { %961 = vmax.xlane.f32.xlu1 %v960_v56 }
 0x819   :  { %1123 = vrot.lane.b32.xlu1 %v10559_v7, %s10330_s30 }
 0x81d   :  { %1121 = vrot.lane.b32.xlu1 %v10561_v8, %s10330_s30 }
 0x895   :  { %v962_v57 = vpop.xlane.xlu1 %961 }
 0x896   :  { %v963_v58 = vsub.f32 %v957_v54, %v962_v57  ;;  %v10712_v54 = vld [vmem:[%s12759_s13 + $0x20] sm:$0xff] }
 0x898   :  { %v964_v59 = vmul.f32 1.442695, %v963_v58 }
 0x899   :  { %v1124_v1 = vpop.permute.xlu1 %1123 }
 0x89a   :  { %10196 = vpow2.f32 %v964_v59 }
 0x89d   :  { %v1122_v6 = vpop.permute.xlu1 %1121 }
 0x8a4   :  { %v10197_v60 = vpop.eup %10196 }
 0x8a5   :  { %v966_v61 = vsel %vm409_vm6, %v10197_v60, 0.0 }
 0x8a6   :  { %967 = vadd.xlane.f32.xlu0 %v966_v61  ;;  %v10724_v61 = vmul.f32 0.35355338, %v10555_v4  ;;  %v10735_v4 = vld [vmem:[%s12759_s13 + $0x28] sm:$0xff] }
 0x8bc   :  { %971 = vrot.lane.b32.xlu0 %v10572_v10, %s10329_s6 }
 0x933   :  { %v968_v62 = vpop.xlane.xlu0 %967 }
 0x934   :  { %10198 = vrcp.f32 %v968_v62 }
 0x937   :  { %v972_v63 = vpop.permute.xlu0 %971 }
 0x938   :  { %9125 = vmatpush3.msra.mxu0 %v972_v63 }
 0x939   :  { %9134 = vmatprep.subr.mxu0 %v10326_v3 }
 0x93e   :  { %v10199_v0 = vpop.eup %10198 }
 0x93f   :  { %v970_v2 = vmul.f32 %v10199_v0, %v10197_v60 }
 0x941   :  { %9127 = vmatmul.mubr.msk.f32.vlgmr.msra.gmra.mrb[8].mxu0 %vm409_vm6, %v970_v2 }
 0x942   :  { %9135 = vmatpush3.xpose.msk.msra.mxu0 %vm409_vm6, %v1124_v1  ;;  %9136 = vmatprep.mubr.msk.f32.mxu0 %vm10327_vm5, %v10326_v3 }
 0x943   :  { %9144 = vmatprep.subr.mxu0 %v10326_v3 }
 0x945   :  { %9137 = vmatmul.mubr.msk.f32.vlgmr.msra.gmra.mrb[10].mxu0 %vm409_vm6, %v1122_v6 }
 0x946   :  { %9146 = vmatprep.mubr.msk.f32.mxu0 %vm10327_vm5, %v10326_v3  ;;  %9145 = vmatpush3.msra.mxu0 %v10684_v33 }
 0x947   :  { %9154 = vmatprep.subr.mxu0 %v10326_v3 }
 0xa14   :  { %v1043_v13 = vpop.f32.mrb[8].mxu0 }
 0xa15   :  { %v9128_v14 = vpop.f32.mrb[9].mxu0  ;;  %9132 = vmatmul.mubr.msk.f32.vlgmr.msra.gmra.mrb[12].mxu1 %vm409_vm6, %v1043_v13 }
 0xa16   :  { %9141 = vmatprep.mubr.msk.f32.mxu1 %vm10327_vm5, %v10326_v3 }
 0xa18   :  { %v1195_v15 = vpop.f32.mrb[10].mxu0 }
 0xa19   :  { %v1196_v16 = vadd.f32 %v1195_v15, %v10580_v12  ;;  %v9138_v17 = vpop.f32.mrb[11].mxu0 }
 0xa1b   :  { %v1199_v18 = vsel %vm409_vm6, %v1196_v16, -inf }
 0xa1c   :  { %1200 = vmax.xlane.f32.xlu0 %v1199_v18 }
 0xa32   :  { %1210 = vrot.lane.b32.xlu0 %v10572_v10, %s10330_s30 }
 0xa36   :  { %1360 = vrot.lane.b32.xlu0 %v10561_v8, %s10331_s8 }
 0xaa9   :  { %v1201_v19 = vpop.xlane.xlu0 %1200 }
 0xaaa   :  { %v1202_v20 = vsub.f32 %v1196_v16, %v1201_v19  ;;  %v84_v19 = vld [vmem:[%s12787_s28 + $0x8] sm:$0xff] }
 0xaab   :  { %vm1838_vm8 = vcmp.eq.f32.partialorder %v84_v19, 0.0 }
 0xaac   :  { %v1203_v21 = vmul.f32 1.442695, %v1202_v20 }
 0xaad   :  { %v1211_v22 = vpop.permute.xlu0 %1210 }
 0xaae   :  { %10200 = vpow2.f32 %v1203_v21  ;;  %9140 = vmatpush3.msra.mxu1 %v1211_v22  ;;  %v10762_v22 = vsel %vm1838_vm8, -1e+09, %v10326_v3 }
 0xaaf   :  { %9149 = vmatprep.subr.mxu1 %v10326_v3 }
 0xab1   :  { %v1361_v32 = vpop.permute.xlu0 %1360 }
 0xab8   :  { %v10201_v23 = vpop.eup %10200 }
 0xab9   :  { %v1205_v24 = vsel %vm409_vm6, %v10201_v23, 0.0 }
 0xaba   :  { %1206 = vadd.xlane.f32.xlu1 %v1205_v24 }
 0xacb   :  { %1362 = vrot.lane.b32.xlu1 %v10559_v7, %s10331_s8 }
 0xae8   :  { %v1116_v25 = vpop.f32.mrb[12].mxu1 }
 0xae9   :  { %v1120_v26 = vadd.f32 %v1116_v25, %v879_v51  ;;  %v9133_v27 = vpop.f32.mrb[13].mxu1 }
 0xb47   :  { %v1207_v28 = vpop.xlane.xlu1 %1206 }
 0xb48   :  { %10202 = vrcp.f32 %v1207_v28 }
 0xb4b   :  { %v1363_v31 = vpop.permute.xlu1 %1362 }
 0xb52   :  { %v10203_v29 = vpop.eup %10202 }
 0xb53   :  { %v1209_v30 = vmul.f32 %v10203_v29, %v10201_v23 }
 0xb55   :  { %9142 = vmatmul.mubr.msk.f32.vlgmr.msra.gmra.mrb[14].mxu1 %vm409_vm6, %v1209_v30 }
 0xb56   :  { %9150 = vmatpush3.xpose.msk.msra.mxu1 %vm409_vm6, %v1363_v31  ;;  %9151 = vmatprep.mubr.msk.f32.mxu1 %vm10327_vm5, %v10326_v3 }
 0xb57   :  { %9159 = vmatprep.subr.mxu1 %v10326_v3 }
 0xb59   :  { %9152 = vmatmul.mubr.msk.f32.vlgmr.msra.gmra.mrb[16].mxu1 %vm409_vm6, %v1361_v32 }
 0xb5a   :  { %9161 = vmatprep.mubr.msk.f32.mxu1 %vm10327_vm5, %v10326_v3  ;;  %9160 = vmatpush3.msra.mxu1 %v10712_v54 }
 0xb5b   :  { %9169 = vmatprep.subr.mxu1 %v10326_v3 }
 0xc28   :  { %v1282_v34 = vpop.f32.mrb[14].mxu1 }
 0xc29   :  { %v9143_v35 = vpop.f32.mrb[15].mxu1  ;;  %9147 = vmatmul.mubr.msk.f32.vlgmr.msra.gmra.mrb[12].mxu0 %vm409_vm6, %v1282_v34 }
 0xc2a   :  { %9156 = vmatprep.mubr.msk.f32.mxu0 %vm10327_vm5, %v10326_v3 }
 0xc2c   :  { %v1434_v36 = vpop.f32.mrb[16].mxu1 }
 0xc2d   :  { %v1435_v37 = vadd.f32 %v1434_v36, %v10580_v12  ;;  %v9153_v39 = vpop.f32.mrb[17].mxu1 }
 0xc2f   :  { %v1438_v40 = vsel %vm409_vm6, %v1435_v37, -inf }
 0xc30   :  { %1439 = vmax.xlane.f32.xlu1 %v1438_v40 }
 0xc41   :  { %1601 = vrot.lane.b32.xlu1 %v10559_v7, %s10332_s10 }
 0xc45   :  { %1599 = vrot.lane.b32.xlu1 %v10561_v8, %s10332_s10 }
 0xcbd   :  { %v1440_v41 = vpop.xlane.xlu1 %1439 }
 0xcbe   :  { %v1441_v42 = vsub.f32 %v1435_v37, %v1440_v41 }
 0xcc0   :  { %v1442_v44 = vmul.f32 1.442695, %v1441_v42 }
 0xcc1   :  { %v1602_v51 = vpop.permute.xlu1 %1601 }
 0xcc2   :  { %10204 = vpow2.f32 %v1442_v44 }
 0xcc5   :  { %v1600_v53 = vpop.permute.xlu1 %1599 }
 0xccc   :  { %v10205_v45 = vpop.eup %10204 }
 0xccd   :  { %v1444_v46 = vsel %vm409_vm6, %v10205_v45, 0.0 }
 0xcce   :  { %1445 = vadd.xlane.f32.xlu0 %v1444_v46 }
 0xce4   :  { %1449 = vrot.lane.b32.xlu0 %v10572_v10, %s10331_s8 }
 0xcfc   :  { %v1355_v47 = vpop.f32.mrb[12].mxu0 }
 0xcfd   :  { %v1359_v48 = vadd.f32 %v1355_v47, %v1120_v26  ;;  %v9148_v49 = vpop.f32.mrb[13].mxu0 }
 0xd5b   :  { %v1446_v50 = vpop.xlane.xlu0 %1445 }
 0xd5c   :  { %10206 = vrcp.f32 %v1446_v50 }
 0xd5f   :  { %v1450_v7 = vpop.permute.xlu0 %1449 }
 0xd60   :  { %9155 = vmatpush3.msra.mxu0 %v1450_v7 }
 0xd61   :  { %9164 = vmatprep.subr.mxu0 %v10326_v3 }
 0xd66   :  { %v10207_v8 = vpop.eup %10206 }
 0xd67   :  { %v1448_v52 = vmul.f32 %v10207_v8, %v10205_v45 }
 0xd69   :  { %9157 = vmatmul.mubr.msk.f32.vlgmr.msra.gmra.mrb[14].mxu0 %vm409_vm6, %v1448_v52 }
 0xd6a   :  { %9165 = vmatpush3.xpose.msk.msra.mxu0 %vm409_vm6, %v1602_v51  ;;  %9166 = vmatprep.mubr.msk.f32.mxu0 %vm10327_vm5, %v10326_v3 }
 0xd6b   :  { %9174 = vmatprep.subr.mxu0 %v10326_v3 }
 0xd6d   :  { %9167 = vmatmul.mubr.msk.f32.vlgmr.msra.gmra.mrb[16].mxu0 %vm409_vm6, %v1600_v53 }
 0xd6e   :  { %9176 = vmatprep.mubr.msk.f32.mxu0 %vm10327_vm5, %v10326_v3  ;;  %9175 = vmatpush3.msra.mxu0 %v10735_v4 }
 0xd6f   :  { %9184 = vmatprep.subr.mxu0 %v10326_v3 }
 0xe3c   :  { %v1521_v55 = vpop.f32.mrb[14].mxu0 }
 0xe3d   :  { %v9158_v56 = vpop.f32.mrb[15].mxu0  ;;  %9162 = vmatmul.mubr.msk.f32.vlgmr.msra.gmra.mrb[18].mxu1 %vm409_vm6, %v1521_v55 }
 0xe3e   :  { %9171 = vmatprep.mubr.msk.f32.mxu1 %vm10327_vm5, %v10326_v3 }
 0xe40   :  { %v1673_v57 = vpop.f32.mrb[16].mxu0 }
 0xe41   :  { %v1674_v58 = vadd.f32 %v1673_v57, %v10580_v12  ;;  %v9168_v59 = vpop.f32.mrb[17].mxu0 }
 0xe43   :  { %v1677_v60 = vsel %vm409_vm6, %v1674_v58, -inf }
 0xe44   :  { %1678 = vmax.xlane.f32.xlu0 %v1677_v60 }
 0xe5a   :  { %1688 = vrot.lane.b32.xlu0 %v10572_v10, %s10332_s10 }
 0xe5e   :  { %2000 = vrot.lane.b32.xlu0 %v10724_v61, %s10328_s11 }
 0xed1   :  { %v1679_v62 = vpop.xlane.xlu0 %1678 }
 0xed2   :  { %v1680_v63 = vsub.f32 %v1674_v58, %v1679_v62 }
 0xed4   :  { %v1681_v0 = vmul.f32 1.442695, %v1680_v63 }
 0xed5   :  { %v1689_v1 = vpop.permute.xlu0 %1688 }
 0xed6   :  { %10208 = vpow2.f32 %v1681_v0  ;;  %9170 = vmatpush3.msra.mxu1 %v1689_v1 }
 0xed7   :  { %9179 = vmatprep.subr.mxu1 %v10326_v3 }
 0xed9   :  { %v2001_v18 = vpop.permute.xlu0 %2000 }
 0xee0   :  { %v10209_v12 = vpop.eup %10208 }
 0xee1   :  { %v1683_v2 = vsel %vm409_vm6, %v10209_v12, 0.0 }
 0xee2   :  { %1684 = vadd.xlane.f32.xlu1 %v1683_v2 }
 0xef3   :  { %2002 = vrot.lane.b32.xlu1 %v10557_v5, %s10328_s11 }
 0xf10   :  { %v1594_v10 = vpop.f32.mrb[18].mxu1 }
 0xf11   :  { %v1598_v6 = vadd.f32 %v1594_v10, %v1359_v48  ;;  %v9163_v13 = vpop.f32.mrb[19].mxu1 }
 0xf6f   :  { %v1685_v14 = vpop.xlane.xlu1 %1684 }
 0xf70   :  { %10210 = vrcp.f32 %v1685_v14 }
 0xf73   :  { %v2003_v17 = vpop.permute.xlu1 %2002 }
 0xf7a   :  { %v10211_v15 = vpop.eup %10210 }
 0xf7b   :  { %v1687_v16 = vmul.f32 %v10211_v15, %v10209_v12 }
 0xf7d   :  { %9172 = vmatmul.mubr.msk.f32.vlgmr.msra.gmra.mrb[20].mxu1 %vm409_vm6, %v1687_v16 }
 0xf7e   :  { %9180 = vmatpush3.xpose.msk.msra.mxu1 %vm409_vm6, %v10557_v5  ;;  %9181 = vmatprep.mubr.msk.f32.mxu1 %vm10327_vm5, %v10326_v3 }
 0xf7f   :  { %9189 = vmatprep.subr.mxu1 %v10326_v3 }
 0xf81   :  { %9182 = vmatmul.mubr.msk.f32.vlgmr.msra.gmra.mrb[22].mxu1 %vm409_vm6, %v10724_v61 }
 0xf82   :  { %9190 = vmatpush3.xpose.msk.msra.mxu1 %vm409_vm6, %v2003_v17  ;;  %9191 = vmatprep.mubr.msk.f32.mxu1 %vm10327_vm5, %v10326_v3 }
 0xf83   :  { %9199 = vmatprep.subr.mxu1 %v10326_v3 }
 0xf85   :  { %9192 = vmatmul.mubr.msk.f32.vlgmr.msra.gmra.mrb[24].mxu1 %vm409_vm6, %v2001_v18 }
 0xf86   :  { %9200 = vmatpush3.msra.mxu1 %v10609_v38  ;;  %9201 = vmatprep.mubr.msk.f32.mxu1 %vm10327_vm5, %v10326_v3 }
 0xf87   :  { %9209 = vmatprep.subr.mxu1 %v10326_v3 }
0x1050   :  { %v1760_v20 = vpop.f32.mrb[20].mxu1 }
0x1051   :  { %v9173_v21 = vpop.f32.mrb[21].mxu1  ;;  %9177 = vmatmul.mubr.msk.f32.vlgmr.msra.gmra.mrb[18].mxu0 %vm409_vm6, %v1760_v20 }
0x1052   :  { %9185 = vmatpush3.msra.mxu0 %v10570_v9  ;;  %9186 = vmatprep.mubr.msk.f32.mxu0 %vm10327_vm5, %v10326_v3 }
0x1053   :  { %9194 = vmatprep.subr.mxu0 %v10326_v3 }
0x1054   :  { %v1912_v38 = vpop.f32.mrb[22].mxu1 }
0x1055   :  { %v1913_v23 = vadd.f32 %v1912_v38, %v10762_v22  ;;  %v9183_v24 = vpop.f32.mrb[23].mxu1 }
0x1057   :  { %v1916_v25 = vsel %vm409_vm6, %v1913_v23, -inf }
0x1058   :  { %1917 = vmax.xlane.f32.xlu1 %v1916_v25  ;;  %v2074_v26 = vpop.f32.mrb[24].mxu1 }
0x1059   :  { %v2075_v27 = vadd.f32 %v2074_v26, %v10762_v22  ;;  %v9193_v28 = vpop.f32.mrb[25].mxu1 }
0x105b   :  { %v2078_v29 = vsel %vm409_vm6, %v2075_v27, -inf }
0x105c   :  { %2079 = vmax.xlane.f32.xlu0 %v2078_v29 }
0x1069   :  { %2090 = vrot.lane.b32.xlu1 %v10570_v9, %s10328_s11 }
0x106d   :  { %2312 = vrot.lane.b32.xlu1 %v10724_v61, %s10329_s6 }
0x10e5   :  { %v1918_v30 = vpop.xlane.xlu1 %1917 }
0x10e6   :  { %v1919_v31 = vsub.f32 %v1913_v23, %v1918_v30 }
0x10e8   :  { %v1920_v32 = vmul.f32 1.442695, %v1919_v31 }
0x10e9   :  { %v2080_v34 = vpop.xlane.xlu0 %2079  ;;  %v2091_v50 = vpop.permute.xlu1 %2090 }
0x10ea   :  { %10212 = vpow2.f32 %v1920_v32  ;;  %v2081_v35 = vsub.f32 %v2075_v27, %v2080_v34 }
0x10ec   :  { %v2082_v36 = vmul.f32 1.442695, %v2081_v35 }
0x10ee   :  { %10214 = vpow2.f32 %v2082_v36 }
0x10f4   :  { %v10213_v37 = vpop.eup %10212 }
0x10f5   :  { %v1922_v39 = vsel %vm409_vm6, %v10213_v37, 0.0 }
0x10f6   :  { %1923 = vadd.xlane.f32.xlu0 %v1922_v39 }
0x10f8   :  { %v10215_v40 = vpop.eup %10214 }
0x10f9   :  { %v2084_v41 = vsel %vm409_vm6, %v10215_v40, 0.0 }
0x10fa   :  { %2085 = vadd.xlane.f32.xlu0 %v2084_v41 }
0x1110   :  { %2314 = vrot.lane.b32.xlu0 %v10557_v5, %s10329_s6 }
0x1124   :  { %v1833_v42 = vpop.f32.mrb[18].mxu0 }
0x1125   :  { %v10779_v44 = vadd.f32 %v1833_v42, %v1598_v6  ;;  %v9178_v45 = vpop.f32.mrb[19].mxu0 }
0x1183   :  { %v1924_v46 = vpop.xlane.xlu0 %1923 }
0x1184   :  { %10216 = vrcp.f32 %v1924_v46 }
0x1187   :  { %v2086_v47 = vpop.xlane.xlu0 %2085 }
0x1188   :  { %10218 = vrcp.f32 %v2086_v47 }
0x118b   :  { %v2315_v55 = vpop.permute.xlu0 %2314 }
0x118e   :  { %v10217_v48 = vpop.eup %10216 }
0x118f   :  { %v1926_v49 = vmul.f32 %v10217_v48, %v10213_v37 }
0x1191   :  { %9187 = vmatmul.mubr.msk.f32.vlgmr.msra.gmra.mrb[20].mxu0 %vm409_vm6, %v1926_v49 }
0x1192   :  { %v10219_v7 = vpop.eup %10218  ;;  %9195 = vmatpush3.msra.mxu0 %v2091_v50  ;;  %9196 = vmatprep.mubr.msk.f32.mxu0 %vm10327_vm5, %v10326_v3 }
0x1193   :  { %v2088_v8 = vmul.f32 %v10219_v7, %v10215_v40  ;;  %9204 = vmatprep.subr.mxu0 %v10326_v3 }
0x1195   :  { %9197 = vmatmul.mubr.msk.f32.vlgmr.msra.gmra.mrb[22].mxu0 %vm409_vm6, %v2088_v8 }
0x1196   :  { %9205 = vmatpush3.msra.mxu0 %v10617_v43  ;;  %9206 = vmatprep.mubr.msk.f32.mxu0 %vm10327_vm5, %v10326_v3  ;;  %v2313_v43 = vpop.permute.xlu1 %2312 }
0x1197   :  { %9214 = vmatprep.subr.mxu0 %v10326_v3 }
0x1264   :  { %v1996_v51 = vpop.f32.mrb[20].mxu0 }
0x1265   :  { %v9188_v52 = vpop.f32.mrb[21].mxu0  ;;  %9207 = vmatmul.mubr.msk.f32.vlgmr.msra.gmra.mrb[24].mxu0 %vm409_vm6, %v1996_v51 }
0x1266   :  { %9216 = vmatprep.mubr.msk.f32.mxu0 %vm10327_vm5, %v10326_v3 }
0x1268   :  { %v2162_v53 = vpop.f32.mrb[22].mxu0 }
0x1269   :  { %v9198_v56 = vpop.f32.mrb[23].mxu0  ;;  %9202 = vmatmul.mubr.msk.f32.vlgmr.msra.gmra.mrb[26].mxu1 %vm409_vm6, %v2162_v53 }
0x126a   :  { %9210 = vmatpush3.xpose.msk.msra.mxu1 %vm409_vm6, %v2315_v55  ;;  %9211 = vmatprep.mubr.msk.f32.mxu1 %vm10327_vm5, %v10326_v3 }
0x126b   :  { %9219 = vmatprep.subr.mxu1 %v10326_v3 }
0x126d   :  { %9212 = vmatmul.mubr.msk.f32.vlgmr.msra.gmra.mrb[28].mxu1 %vm409_vm6, %v2313_v43 }
0x126e   :  { %9220 = vmatpush3.msra.mxu1 %v10656_v11  ;;  %9221 = vmatprep.mubr.msk.f32.mxu1 %vm10327_vm5, %v10326_v3 }
0x126f   :  { %9229 = vmatprep.subr.mxu1 %v10326_v3 }
0x1338   :  { %v2308_v57 = vpop.f32.mrb[24].mxu0 }
0x1339   :  { %v9208_v58 = vpop.f32.mrb[25].mxu0 }
0x133c   :  { %v2235_v59 = vpop.f32.mrb[26].mxu1 }
0x133d   :  { %v2309_v60 = vadd.f32 %v2308_v57, %v2235_v59  ;;  %v9203_v62 = vpop.f32.mrb[27].mxu1 }
0x1340   :  { %v2386_v63 = vpop.f32.mrb[28].mxu1 }
0x1341   :  { %v2387_v0 = vadd.f32 %v2386_v63, %v10762_v22  ;;  %v9213_v1 = vpop.f32.mrb[29].mxu1 }
0x1342   :  { %v10300_v1 = vld [vmem:[%s12784_s27] sm:$0xff] }
0x1343   :  { %v2390_v12 = vsel %vm409_vm6, %v2387_v0, -inf }
0x1344   :  { %2391 = vmax.xlane.f32.xlu1 %v2390_v12 }
0x1355   :  { %2553 = vrot.lane.b32.xlu1 %v10557_v5, %s10330_s30 }
0x1359   :  { %2551 = vrot.lane.b32.xlu1 %v10724_v61, %s10330_s30 }
0x13d1   :  { %v2392_v11 = vpop.xlane.xlu1 %2391 }
0x13d2   :  { %v2393_v2 = vsub.f32 %v2387_v0, %v2392_v11 }
0x13d4   :  { %v2394_v10 = vmul.f32 1.442695, %v2393_v2 }
0x13d5   :  { %v2554_v17 = vpop.permute.xlu1 %2553 }
0x13d6   :  { %10220 = vpow2.f32 %v2394_v10 }
0x13d9   :  { %v2552_v19 = vpop.permute.xlu1 %2551 }
0x13e0   :  { %v10221_v6 = vpop.eup %10220 }
0x13e1   :  { %v2396_v13 = vsel %vm409_vm6, %v10221_v6, 0.0 }
0x13e2   :  { %2397 = vadd.xlane.f32.xlu0 %v2396_v13 }
0x13f8   :  { %2401 = vrot.lane.b32.xlu0 %v10570_v9, %s10329_s6 }
0x146f   :  { %v2398_v14 = vpop.xlane.xlu0 %2397 }
0x1470   :  { %10222 = vrcp.f32 %v2398_v14 }
0x1473   :  { %v2402_v15 = vpop.permute.xlu0 %2401 }
0x1474   :  { %9215 = vmatpush3.msra.mxu0 %v2402_v15 }
0x1475   :  { %9224 = vmatprep.subr.mxu0 %v10326_v3 }
0x147a   :  { %v10223_v16 = vpop.eup %10222 }
0x147b   :  { %v2400_v18 = vmul.f32 %v10223_v16, %v10221_v6 }
0x147d   :  { %9217 = vmatmul.mubr.msk.f32.vlgmr.msra.gmra.mrb[26].mxu0 %vm409_vm6, %v2400_v18 }
0x147e   :  { %9225 = vmatpush3.xpose.msk.msra.mxu0 %vm409_vm6, %v2554_v17  ;;  %9226 = vmatprep.mubr.msk.f32.mxu0 %vm10327_vm5, %v10326_v3 }
0x147f   :  { %9234 = vmatprep.subr.mxu0 %v10326_v3 }
0x1481   :  { %9227 = vmatmul.mubr.msk.f32.vlgmr.msra.gmra.mrb[28].mxu0 %vm409_vm6, %v2552_v19 }
0x1482   :  { %9235 = vmatpush3.msra.mxu0 %v10684_v33  ;;  %9236 = vmatprep.mubr.msk.f32.mxu0 %vm10327_vm5, %v10326_v3 }
0x1483   :  { %9244 = vmatprep.subr.mxu0 %v10326_v3 }
0x1550   :  { %v2473_v20 = vpop.f32.mrb[26].mxu0 }
0x1551   :  { %v9218_v21 = vpop.f32.mrb[27].mxu0  ;;  %9222 = vmatmul.mubr.msk.f32.vlgmr.msra.gmra.mrb[30].mxu1 %vm409_vm6, %v2473_v20 }
0x1552   :  { %9231 = vmatprep.mubr.msk.f32.mxu1 %vm10327_vm5, %v10326_v3 }
0x1554   :  { %v2625_v38 = vpop.f32.mrb[28].mxu0 }
0x1555   :  { %v2626_v23 = vadd.f32 %v2625_v38, %v10762_v22  ;;  %v9228_v24 = vpop.f32.mrb[29].mxu0 }
0x1557   :  { %v2629_v25 = vsel %vm409_vm6, %v2626_v23, -inf }
0x1558   :  { %2630 = vmax.xlane.f32.xlu1 %v2629_v25 }
0x1569   :  { %2792 = vrot.lane.b32.xlu1 %v10557_v5, %s10331_s8 }
0x156d   :  { %2790 = vrot.lane.b32.xlu1 %v10724_v61, %s10331_s8 }
0x15e5   :  { %v2631_v33 = vpop.xlane.xlu1 %2630 }
0x15e6   :  { %v2632_v26 = vsub.f32 %v2626_v23, %v2631_v33 }
0x15e8   :  { %v2633_v27 = vmul.f32 1.442695, %v2632_v26 }
0x15e9   :  { %v2793_v37 = vpop.permute.xlu1 %2792 }
0x15ea   :  { %10224 = vpow2.f32 %v2633_v27 }
0x15ed   :  { %v2791_v40 = vpop.permute.xlu1 %2790 }
0x15f4   :  { %v10225_v28 = vpop.eup %10224 }
0x15f5   :  { %v2635_v29 = vsel %vm409_vm6, %v10225_v28, 0.0 }
0x15f6   :  { %2636 = vadd.xlane.f32.xlu0 %v2635_v29 }
0x160c   :  { %2640 = vrot.lane.b32.xlu0 %v10570_v9, %s10330_s30 }
0x1624   :  { %v2546_v30 = vpop.f32.mrb[30].mxu1 }
0x1625   :  { %v2550_v31 = vadd.f32 %v2546_v30, %v2309_v60  ;;  %v9223_v32 = vpop.f32.mrb[31].mxu1 }
0x1683   :  { %v2637_v34 = vpop.xlane.xlu0 %2636 }
0x1684   :  { %10226 = vrcp.f32 %v2637_v34 }
0x1687   :  { %v2641_v35 = vpop.permute.xlu0 %2640 }
0x1688   :  { %9230 = vmatpush3.msra.mxu1 %v2641_v35 }
0x1689   :  { %9239 = vmatprep.subr.mxu1 %v10326_v3 }
0x168e   :  { %v10227_v36 = vpop.eup %10226 }
0x168f   :  { %v2639_v39 = vmul.f32 %v10227_v36, %v10225_v28  ;;  %v10301_v28 = vld [vmem:[%s12784_s27 + $0x8] sm:$0xff] }
0x1691   :  { %9232 = vmatmul.mubr.msk.f32.vlgmr.msra.gmra.mrb[32].mxu1 %vm409_vm6, %v2639_v39 }
0x1692   :  { %9240 = vmatpush3.xpose.msk.msra.mxu1 %vm409_vm6, %v2793_v37  ;;  %9241 = vmatprep.mubr.msk.f32.mxu1 %vm10327_vm5, %v10326_v3 }
0x1693   :  { %9249 = vmatprep.subr.mxu1 %v10326_v3 }
0x1695   :  { %9242 = vmatmul.mubr.msk.f32.vlgmr.msra.gmra.mrb[34].mxu1 %vm409_vm6, %v2791_v40 }
0x1696   :  { %9250 = vmatpush3.msra.mxu1 %v10712_v54  ;;  %9251 = vmatprep.mubr.msk.f32.mxu1 %vm10327_vm5, %v10326_v3 }
0x1697   :  { %9259 = vmatprep.subr.mxu1 %v10326_v3 }
0x1764   :  { %v2712_v41 = vpop.f32.mrb[32].mxu1 }
0x1765   :  { %v9233_v42 = vpop.f32.mrb[33].mxu1  ;;  %9237 = vmatmul.mubr.msk.f32.vlgmr.msra.gmra.mrb[30].mxu0 %vm409_vm6, %v2712_v41 }
0x1766   :  { %9246 = vmatprep.mubr.msk.f32.mxu0 %vm10327_vm5, %v10326_v3 }
0x1768   :  { %v2864_v45 = vpop.f32.mrb[34].mxu1 }
0x1769   :  { %v2865_v46 = vadd.f32 %v2864_v45, %v10762_v22  ;;  %v9243_v47 = vpop.f32.mrb[35].mxu1 }
0x176b   :  { %v2868_v48 = vsel %vm409_vm6, %v2865_v46, -inf }
0x176c   :  { %2869 = vmax.xlane.f32.xlu0 %v2868_v48 }
0x1782   :  { %2879 = vrot.lane.b32.xlu0 %v10570_v9, %s10331_s8 }
0x1786   :  { %3029 = vrot.lane.b32.xlu0 %v10724_v61, %s10332_s10 }
0x17f9   :  { %v2870_v54 = vpop.xlane.xlu0 %2869 }
0x17fa   :  { %v2871_v49 = vsub.f32 %v2865_v46, %v2870_v54 }
0x17fc   :  { %v2872_v50 = vmul.f32 1.442695, %v2871_v49  ;;  %v3344_v49 = vld [vmem:[%s12762_s16] sm:$0xff] }
0x17fd   :  { %v2880_v7 = vpop.permute.xlu0 %2879 }
0x17fe   :  { %10228 = vpow2.f32 %v2872_v50  ;;  %9245 = vmatpush3.msra.mxu0 %v2880_v7  ;;  %v3345_v50 = vld [vmem:[%s12762_s16 + $0x8] sm:$0xff] }
0x17ff   :  { %9254 = vmatprep.subr.mxu0 %v10326_v3  ;;  %v9603_v7 = vpack.c.bf16 %v3345_v50, %v3344_v49  ;;  %v3355_v49 = vld [vmem:[%s12763_s17 + $0x28] sm:$0xff] }
0x1801   :  { %v3030_v58 = vpop.permute.xlu0 %3029 }
0x1808   :  { %v10229_v8 = vpop.eup %10228 }
0x1809   :  { %v2874_v51 = vsel %vm409_vm6, %v10229_v8, 0.0 }
0x180a   :  { %2875 = vadd.xlane.f32.xlu1 %v2874_v51  ;;  %v3346_v51 = vld [vmem:[%s12762_s16 + $0x10] sm:$0xff] }
0x181b   :  { %3031 = vrot.lane.b32.xlu1 %v10557_v5, %s10332_s10  ;;  %v8419_v5 = vld [vmem:[%s12760_s14] ss:$0 sm:$0xff] }
0x181c   :  { %v3274_v62 = vadd.f32 %v8419_v5, %v10779_v44 }
0x181e   :  { %v10879_v12 = vadd.f32 %v10300_v1, %v3274_v62  ;;  %v10937_v62 = vld [vmem:[%s12790_s26] sm:$0xff]  ;;  %v3340_v1 = vld [vmem:[%s12761_s15 + $0x10] sm:$0xff] }
0x1820   :  { %v3280_v2 = vsel %vm89_vm0, %v10879_v12, 0.0 }
0x1838   :  { %v2785_v52 = vpop.f32.mrb[30].mxu0 }
0x1839   :  { %v2789_v53 = vadd.f32 %v2785_v52, %v2550_v31  ;;  %v9238_v55 = vpop.f32.mrb[31].mxu0  ;;  %v3347_v52 = vld [vmem:[%s12762_s16 + $0x18] sm:$0xff] }
0x1897   :  { %v2876_v56 = vpop.xlane.xlu1 %2875 }
0x1898   :  { %10230 = vrcp.f32 %v2876_v56  ;;  %v8420_v56 = vld [vmem:[%s12788_s0] ss:$0 sm:$0xff] }
0x189b   :  { %v3032_v57 = vpop.permute.xlu1 %3031 }
0x18a2   :  { %v10231_v61 = vpop.eup %10230 }
0x18a3   :  { %v2878_v43 = vmul.f32 %v10231_v61, %v10229_v8  ;;  %v10333_v8 = vmov 0.0|0.0  }
0x18a5   :  { %9247 = vmatmul.mubr.msk.f32.vlgmr.msra.gmra.mrb[32].mxu0 %vm409_vm6, %v2878_v43  ;;  %v3348_v43 = vld [vmem:[%s12762_s16 + $0x20] sm:$0xff] }
0x18a6   :  { %9255 = vmatpush3.xpose.msk.msra.mxu0 %vm409_vm6, %v3032_v57  ;;  %9256 = vmatprep.mubr.msk.f32.mxu0 %vm10327_vm5, %v10326_v3  ;;  %v3349_v57 = vld [vmem:[%s12762_s16 + $0x28] sm:$0xff] }
0x18a7   :  { %9264 = vmatprep.subr.mxu0 %v10326_v3 }
0x18a9   :  { %9257 = vmatmul.mubr.msk.f32.vlgmr.msra.gmra.mrb[34].mxu0 %vm409_vm6, %v3030_v58  ;;  %v8421_v58 = vld [vmem:[%s12789_s1] ss:$0 sm:$0xff]  ;;  %s12795_s1 = sld [smem:[#allocation8_spill]] }
0x18aa   :  { %9265 = vmatpush3.msra.mxu0 %v10735_v4  ;;  %9266 = vmatprep.mubr.msk.f32.mxu0 %vm10327_vm5, %v10326_v3 }
0x18ab   :  { %9602 = vmatprep.subr.bf16.mxu0 %v10333_v8 }
0x1978   :  { %v2951_v59 = vpop.f32.mrb[32].mxu0 }
0x1979   :  { %v9248_v60 = vpop.f32.mrb[33].mxu0  ;;  %9252 = vmatmul.mubr.msk.f32.vlgmr.msra.gmra.mrb[36].mxu1 %vm409_vm6, %v2951_v59 }
0x197a   :  { %9261 = vmatprep.mubr.msk.f32.mxu1 %vm10327_vm5, %v10326_v3 }
0x197c   :  { %v3103_v63 = vpop.f32.mrb[34].mxu0 }
0x197d   :  { %v3104_v0 = vadd.f32 %v3103_v63, %v10762_v22  ;;  %v9258_v4 = vpop.f32.mrb[35].mxu0  ;;  %v10947_v63 = vld [vmem:[%s12790_s26 + $0x8] sm:$0xff] }
0x197e   :  { %v3339_v4 = vld [vmem:[%s12761_s15 + $0x8] sm:$0xff] }
0x197f   :  { %v3107_v11 = vsel %vm409_vm6, %v3104_v0, -inf }
0x1980   :  { %3108 = vmax.xlane.f32.xlu1 %v3107_v11  ;;  %v3341_v11 = vld [vmem:[%s12761_s15 + $0x18] sm:$0xff] }
0x1984   :  { %3281 = vadd.xlane.f32.xlu1 %v3280_v2 }
0x1a0d   :  { %v3109_v10 = vpop.xlane.xlu1 %3108 }
0x1a0e   :  { %v3110_v6 = vsub.f32 %v3104_v0, %v3109_v10  ;;  %v3338_v0 = vld [vmem:[%s12761_s15] sm:$0xff]  ;;  %v9594_v10 = vpack.c.bf16 %v3341_v11, %v3340_v1 }
0x1a0f   :  { %v9590_v2 = vpack.c.bf16 %v3339_v4, %v3338_v0 }
0x1a10   :  { %v3111_v44 = vmul.f32 1.442695, %v3110_v6  ;;  %v3342_v6 = vld [vmem:[%s12761_s15 + $0x20] sm:$0xff] }
0x1a11   :  { %v3282_v23 = vpop.xlane.xlu1 %3281 }
0x1a12   :  { %10232 = vpow2.f32 %v3111_v44  ;;  %v3343_v44 = vld [vmem:[%s12761_s15 + $0x28] sm:$0xff]  ;;  %s10335_s15 = smov [#allocation2]  }
0x1a1c   :  { %v10233_v13 = vpop.eup %10232 }
0x1a1d   :  { %v3113_v22 = vsel %vm409_vm6, %v10233_v13, 0.0 }
0x1a1e   :  { %3114 = vadd.xlane.f32.xlu0 %v3113_v22  ;;  %v9598_v22 = vpack.c.bf16 %v3343_v44, %v3342_v6  ;;  %v85_v44 = vld [vmem:[%s12795_s1] sm:$0xff] }
0x1a1f   :  { %vm3615_vm2 = vcmp.eq.f32.partialorder %v85_v44, 0.0 }
0x1a34   :  { %3118 = vrot.lane.b32.xlu0 %v10570_v9, %s10332_s10  ;;  %v3286_v9 = vmul.f32 0.020833334, %v3282_v23 }
0x1a36   :  { %v3288_v26 = vsub.f32 %v10879_v12, %v3286_v9 }
0x1a38   :  { %v3290_v31 = vmul.f32 %v3288_v26, %v3288_v26 }
0x1a3a   :  { %v3292_v32 = vsel %vm89_vm0, %v3290_v31, 0.0 }
0x1a4c   :  { %v3024_v14 = vpop.f32.mrb[36].mxu1 }
0x1a4d   :  { %v3028_v15 = vadd.f32 %v3024_v14, %v2789_v53  ;;  %v9253_v16 = vpop.f32.mrb[37].mxu1  ;;  %v9606_v53 = vpack.c.bf16 %v3347_v52, %v3346_v51 }
0x1aab   :  { %v3115_v17 = vpop.xlane.xlu0 %3114 }
0x1aac   :  { %10234 = vrcp.f32 %v3115_v17 }
0x1aaf   :  { %v3119_v18 = vpop.permute.xlu0 %3118 }
0x1ab0   :  { %9260 = vmatpush3.msra.mxu1 %v3119_v18 }
0x1ab1   :  { %9591 = vmatprep.subr.bf16.mxu1 %v9590_v2 }
0x1ab6   :  { %v10235_v19 = vpop.eup %10234 }
0x1ab7   :  { %v3117_v20 = vmul.f32 %v10235_v19, %v10233_v13  ;;  %v10974_v13 = vld [vmem:[%s12790_s26 + $0x10] sm:$0xff]  ;;  %s8352_s26 = sshll.u32 %s10335_s15, 4  ;;  %s8353_s26 = int_to_ptr.vmem [resolvable:$true] %s8352_s26 }
0x1ab8   :  { %s10302_s2 = scalar_lea.vmem %s8353_s26, 256  ;;  %p10307_p1 = scmp.lt.s32.totalorder %s8353_s26, %s8353_s26 }
0x1ab9   :  { %9262 = vmatmul.mubr.msk.f32.vlgmr.msra.gmra.mrb[38].mxu1 %vm409_vm6, %v3117_v20  ;;  %p10303_p0 = scmp.ne.s32.totalorder %s8353_s26, %s10302_s2  ;;  %p10308_p2 = scmp.lt.s32.totalorder %s10302_s2, %s10302_s2 }
0x1aba   :  { %9593 = vmatpush3.bf16.msra.mxu1 %v9590_v2 }
0x1abb   :  { %9595 = vmatprep.subr.bf16.mxu1 %v9594_v10  ;;  %p10309_p3 = por %p10308_p2, %p10307_p1 }
0x1abd   :  { %p10310_p4 = pnand %p10309_p3, %p10303_p0 }
0x1abe   :  { %9597 = vmatpush3.bf16.msra.mxu1 %v9594_v10 }
0x1abf   :  { %9599 = vmatprep.subr.bf16.mxu1 %v9598_v22 }
0x1ac2   :  { %9601 = vmatpush3.bf16.msra.mxu1 %v9598_v22 }
0x1ac3   :  { %9611 = vmatprep.subr.bf16.mxu1 %v10333_v8 }
0x1b8c   :  { %v3190_v21 = vpop.f32.mrb[38].mxu1 }
0x1b8d   :  { %v9263_v38 = vpop.f32.mrb[39].mxu1  ;;  %9267 = vmatmul.mubr.msk.f32.vlgmr.msra.gmra.mrb[36].mxu0 %vm409_vm6, %v3190_v21 }
0x1b8e   :  { %9296 = vmatprep.mubr.msk.f32.mxu0 %vm10327_vm5, %v10326_v3  ;;  %9604 = vmatpush3.bf16.msra.mxu0 %v9603_v7 }
0x1b8f   :  { %9605 = vmatprep.subr.bf16.mxu0 %v10333_v8 }
0x1b92   :  { %9607 = vmatpush3.bf16.msra.mxu0 %v9606_v53 }
0x1b93   :  { %9608 = vmatprep.subr.bf16.mxu0 %v10333_v8 }
0x1c60   :  { %v3263_v24 = vpop.f32.mrb[36].mxu0 }
0x1c61   :  { %v3267_v25 = vadd.f32 %v3263_v24, %v3028_v15  ;;  %v9268_v33 = vpop.f32.mrb[37].mxu0 }
0x1c63   :  { %v3275_v27 = vadd.f32 %v8419_v5, %v3267_v25  ;;  %v9609_v5 = vpack.c.bf16 %v3349_v57, %v3348_v43 }
0x1c65   :  { %v10895_v29 = vadd.f32 %v10301_v28, %v3275_v27  ;;  %9610 = vmatpush3.bf16.msra.mxu0 %v9609_v5  ;;  %v6647_v5 = vld [vmem:[%s12766_s20 + $0x18] sm:$0xff] }
0x1c66   :  { %9620 = vmatprep.subr.bf16.mxu0 %v10333_v8 }
0x1c67   :  { %v3283_v30 = vsel %vm89_vm0, %v10895_v29, 0.0 }
0x1c68   :  { %3284 = vadd.xlane.f32.xlu1 %v3283_v30  ;;  %9297 = vmatmul.mubr.msk.f32.vlgmr.msra.gmra.mrb[38].mxu0 %vm89_vm0, %v10937_v62 }
0x1c69   :  { %9299 = vmatprep.mubr.msk.f32.mxu0 %vm10327_vm5, %v10326_v3 }
0x1c6c   :  { %3293 = vadd.xlane.f32.xlu1 %v3292_v32  ;;  %9300 = vmatmul.mubr.msk.f32.gmra.mrb[40].mxu0 %vm89_vm0, %v10947_v63 }
0x1c6d   :  { %9302 = vmatprep.mubr.msk.f32.mxu0 %vm10327_vm5, %v10326_v3 }
0x1c70   :  { %9303 = vmatmul.mubr.msk.f32.gmra.mrb[42].mxu0 %vm89_vm0, %v10974_v13 }
0x1c71   :  { %9330 = vmatprep.mubr.msk.f32.mxu0 %vm10327_vm5, %v10326_v3 }
0x1cf5   :  { %v3285_v34 = vpop.xlane.xlu1 %3284 }
0x1cf6   :  { %v3287_v35 = vmul.f32 0.020833334, %v3285_v34 }
0x1cf8   :  { %v10901_v36 = vsub.f32 %v10895_v29, %v3287_v35 }
0x1cf9   :  { %v3294_v37 = vpop.xlane.xlu1 %3293 }
0x1cfa   :  { %v3298_v39 = vmul.f32 0.021276595, %v3294_v37  ;;  %v3291_v40 = vmul.f32 %v10901_v36, %v10901_v36 }
0x1cfc   :  { %10236 = vrsqrt.f32 %v3298_v39  ;;  %v3295_v41 = vsel %vm89_vm0, %v3291_v40, 0.0  ;;  %vm3302_vm9 = vcmp.eq.f32.partialorder %v3298_v39, inf  ;;  %v3305_v46 = vand.u32 2147483648, %v3298_v39 }
0x1cfd   :  { %3296 = vadd.xlane.f32.xlu1 %v3295_v41  ;;  %vm3304_vm10 = vcmp.eq.f32.partialorder %v3298_v39, 0.0  ;;  %v3350_v41 = vld [vmem:[%s12763_s17] sm:$0xff] }
0x1d06   :  { %v10237_v42 = vpop.eup %10236 }
0x1d07   :  { %v3301_v45 = vmul.f32 %v10237_v42, %v3298_v39  ;;  %v3351_v42 = vld [vmem:[%s12763_s17 + $0x8] sm:$0xff] }
0x1d09   :  { %v3303_v47 = vsel %vm3302_vm9, %v3298_v39, %v3301_v45  ;;  %v3352_v45 = vld [vmem:[%s12763_s17 + $0x10] sm:$0xff] }
0x1d0a   :  { %v3306_v48 = vsel %vm3304_vm10, %v3305_v46, %v3303_v47  ;;  %v9612_v46 = vpack.c.bf16 %v3351_v42, %v3350_v41  ;;  %v3353_v47 = vld [vmem:[%s12763_s17 + $0x18] sm:$0xff]  ;;  %v11109_v41 = vld [vmem:[%s12764_s18] sm:$0xff] }
0x1d0b   :  { %v3314_v54 = vadd.f32 1e-06, %v3306_v48  ;;  %v9615_v48 = vpack.c.bf16 %v3353_v47, %v3352_v45 }
0x1d0d   :  { %10238 = vrcp.f32 %v3314_v54  ;;  %v3354_v54 = vld [vmem:[%s12763_s17 + $0x20] sm:$0xff] }
0x1d0e   :  { %v9618_v50 = vpack.c.bf16 %v3355_v49, %v3354_v54 }
0x1d17   :  { %v10239_v55 = vpop.eup %10238 }
0x1d18   :  { %v3320_v61 = vmul.f32 %v10239_v55, %v3288_v26 }
0x1d1a   :  { %v3328_v59 = vmul.f32 %v8420_v56, %v3320_v61 }
0x1d1c   :  { %v3336_v60 = vadd.f32 %v8421_v58, %v3328_v59 }
0x1d1e   :  { %9281 = vmatprep.mubr.msk.f32.mxu1 %vm89_vm0, %v3336_v60 }
0x1d3b   :  { %v3521_v25 = vpop.f32.mrb[38].mxu0 }
0x1d3c   :  { %v9298_v33 = vpop.f32.mrb[39].mxu0 }
0x1d3f   :  { %v3526_v26 = vpop.f32.mrb[40].mxu0 }
0x1d40   :  { %v10991_v28 = vpack.i.bf16 %v3526_v26, %v3521_v25  ;;  %v9301_v30 = vpop.f32.mrb[41].mxu0  ;;  %v9621_v31 = vpack.c.bf16 %v3526_v26, %v3521_v25  ;;  %v5096_v34 = vrot.slane %v3526_v26, 4 }
0x1d42   :  { %10081 = vrot.lane.b32.xlu1 %v10991_v28, %s10328_s11  ;;  %9623 = vmatpush3.bf16.xpose.msk.msra.mxu0 %vm10987_vm13, %v9621_v31 }
0x1d43   :  { %v3531_v32 = vpop.f32.mrb[42].mxu0  ;;  %9624 = vmatprep.subr.bf16.mxu0 %v10333_v8 }
0x1d44   :  { %v10998_v35 = vrot.slane %v3531_v32, 4 }
0x1d46   :  { %v11002_v37 = vsel %vm3711_vm14, %v5096_v34, %v10998_v35 }
0x1d47   :  { %v9669_v39 = vpack.c.bf16 %v10998_v35, %v11002_v37  ;;  %v11008_v40 = vpack.i.bf16 %v10998_v35, %v11002_v37 }
0x1d8a   :  { %v3297_v14 = vpop.xlane.xlu1 %3296 }
0x1d8b   :  { %v3299_v15 = vmul.f32 0.021276595, %v3297_v14 }
0x1d8d   :  { %10240 = vrsqrt.f32 %v3299_v15  ;;  %vm3309_vm11 = vcmp.eq.f32.partialorder %v3299_v15, inf  ;;  %v3312_v18 = vand.u32 2147483648, %v3299_v15  ;;  %vm3311_vm12 = vcmp.eq.f32.partialorder %v3299_v15, 0.0 }
0x1d97   :  { %v10241_v16 = vpop.eup %10240 }
0x1d98   :  { %v3308_v17 = vmul.f32 %v10241_v16, %v3299_v15 }
0x1d9a   :  { %v3310_v19 = vsel %vm3309_vm11, %v3299_v15, %v3308_v17 }
0x1d9b   :  { %v3313_v20 = vsel %vm3311_vm12, %v3312_v18, %v3310_v19 }
0x1d9c   :  { %v3315_v21 = vadd.f32 1e-06, %v3313_v20 }
0x1d9e   :  { %10242 = vrcp.f32 %v3315_v21 }
0x1da8   :  { %v10243_v38 = vpop.eup %10242 }
0x1da9   :  { %v3321_v23 = vmul.f32 %v10243_v38, %v10901_v36  ;;  %v9304_v36 = vpop.f32.mrb[43].mxu0 }
0x1dab   :  { %v3329_v9 = vmul.f32 %v8420_v56, %v3321_v23 }
0x1dad   :  { %v3337_v24 = vadd.f32 %v8421_v58, %v3329_v9 }
0x1daf   :  { %9282 = vmatmul.mubr.msk.f32.vlgmr.msra.gmra.mrb[40].mxu1 %vm89_vm0, %v3337_v24 }
0x1db0   :  { %9317 = vmatprep.mubr.msk.f32.mxu1 %vm10327_vm5, %v10326_v3  ;;  %9613 = vmatpush3.bf16.msra.mxu1 %v9612_v46 }
0x1db1   :  { %9614 = vmatprep.subr.bf16.mxu1 %v10333_v8 }
0x1db4   :  { %9616 = vmatpush3.bf16.msra.mxu1 %v9615_v48  ;;  %v10082_v7 = vpop.permute.xlu1 %10081 }
0x1db5   :  { %9617 = vmatprep.subr.bf16.mxu1 %v10333_v8  ;;  %v10084_v51 = vunpack.i.h.bf16 %v10082_v7  ;;  %v10083_v52 = vunpack.i.l.bf16 %v10082_v7 }
0x1db7   :  { %v9629_v53 = vpack.c.bf16 %v10084_v51, %v10083_v52 }
0x1db8   :  { %9619 = vmatpush3.bf16.msra.mxu1 %v9618_v50  ;;  %v11119_v50 = vld [vmem:[%s12764_s18 + $0x8] sm:$0xff] }
0x1db9   :  { %9628 = vmatprep.subr.bf16.mxu1 %v10333_v8 }
0x1dbb   :  { %9318 = vmatmul.mubr.msk.f32.vlgmr.msra.gmra.mrb[42].mxu1 %vm89_vm0, %v10937_v62 }
0x1dbc   :  { %9320 = vmatprep.mubr.msk.f32.mxu1 %vm10327_vm5, %v10326_v3 }
0x1dbf   :  { %9321 = vmatmul.mubr.msk.f32.gmra.mrb[44].mxu1 %vm89_vm0, %v10947_v63 }
0x1dc0   :  { %9323 = vmatprep.mubr.msk.f32.mxu1 %vm10327_vm5, %v10326_v3 }
0x1dc1   :  { %9631 = vmatpush3.bf16.xpose.msk.msra.mxu1 %vm10987_vm13, %v9629_v53 }
0x1dc2   :  { %9359 = vmatprep.subr.mxu1 %v10326_v3 }
0x1dc3   :  { %9324 = vmatmul.mubr.msk.f32.gmra.mrb[46].mxu1 %vm89_vm0, %v10974_v13  ;;  %v11085_v13 = vsel %vm3615_vm2, -1e+09, %v10326_v3 }
0x1dc4   :  { %9344 = vmatprep.mubr.msk.f32.mxu1 %vm10327_vm5, %v10326_v3 }
0x1e82   :  { %v11046_v55 = vpop.f32.mrb[40].mxu1 }
0x1e83   :  { %v3435_v56 = vpop.f32.mrb[41].mxu1  ;;  %v11207_v35 = vmul.f32 0.35355338, %v11046_v55  ;;  %v11219_v55 = vld [vmem:[%s12764_s18 + $0x18] sm:$0xff] }
0x1e84   :  { %v11048_v61 = vmul.f32 0.35355338, %v3435_v56 }
0x1e86   :  { %3785 = vrot.lane.b32.xlu0 %v11048_v61, %s10328_s11  ;;  %9331 = vmatmul.mubr.msk.f32.vlgmr.msra.gmra.mrb[44].mxu0 %vm409_vm6, %v11048_v61 }
0x1e87   :  { %9337 = vmatprep.mubr.msk.f32.mxu0 %vm10327_vm5, %v10326_v3 }
0x1e8e   :  { %v3601_v43 = vpop.f32.mrb[42].mxu1 }
0x1e8f   :  { %v9319_v57 = vpop.f32.mrb[43].mxu1 }
0x1e92   :  { %v3606_v58 = vpop.f32.mrb[44].mxu1 }
0x1e93   :  { %v9322_v59 = vpop.f32.mrb[45].mxu1  ;;  %v9625_v60 = vpack.c.bf16 %v3606_v58, %v3601_v43  ;;  %v11067_v4 = vpack.i.bf16 %v3606_v58, %v3601_v43  ;;  %v5188_v1 = vrot.slane %v3606_v58, 4 }
0x1e95   :  { %9627 = vmatpush3.bf16.msk.msra.mxu0 %vm11057_vm1, %v9625_v60 }
0x1e96   :  { %v3611_v62 = vpop.f32.mrb[46].mxu1  ;;  %9632 = vmatprep.subr.bf16.mxu0 %v10333_v8 }
0x1e97   :  { %v9325_v63 = vpop.f32.mrb[47].mxu1  ;;  %v11069_v11 = vrot.slane %v3611_v62, 4 }
0x1e99   :  { %v11073_v2 = vsel %vm3711_vm14, %v5188_v1, %v11069_v11 }
0x1e9a   :  { %v9673_v10 = vpack.c.bf16 %v11069_v11, %v11073_v2  ;;  %v11079_v6 = vpack.i.bf16 %v11069_v11, %v11073_v2 }
0x1ef8   :  { %v3786_v0 = vpop.permute.xlu0 %3785 }
0x1ef9   :  { %9345 = vmatmul.mubr.msk.f32.vlgmr.msra.gmra.mrb[48].mxu1 %vm409_vm6, %v3786_v0 }
0x1efa   :  { %9361 = vmatprep.mubr.msk.f32.mxu1 %vm10327_vm5, %v10326_v3  ;;  %9360 = vmatpush3.msra.mxu1 %v11109_v41 }
0x1efb   :  { %9640 = vmatprep.subr.bf16.mxu1 %v10333_v8 }
0x1f59   :  { %v3692_v22 = vpop.f32.mrb[44].mxu0 }
0x1f5a   :  { %v3693_v14 = vadd.f32 %v3692_v22, %v11085_v13  ;;  %v9332_v15 = vpop.f32.mrb[45].mxu0 }
0x1f5c   :  { %v3697_v16 = vsel %vm3696_vm3, %v3693_v14, -inf }
0x1f5d   :  { %3698 = vmax.xlane.f32.xlu0 %v3697_v16 }
0x1fcc   :  { %v3863_v17 = vpop.f32.mrb[48].mxu1 }
0x1fcd   :  { %v3864_v18 = vadd.f32 %v3863_v17, %v11085_v13  ;;  %v9346_v19 = vpop.f32.mrb[49].mxu1 }
0x1fcf   :  { %v3867_v20 = vsel %vm3696_vm3, %v3864_v18, -inf }
0x1fd0   :  { %3868 = vmax.xlane.f32.xlu1 %v3867_v20 }
0x1fe1   :  { %10091 = vrot.lane.b32.xlu1 %v10991_v28, %s10329_s6 }
0x1fe5   :  { %10096 = vrot.lane.b32.xlu1 %v10991_v28, %s10330_s30 }
0x1fea   :  { %v3699_v21 = vpop.xlane.xlu0 %3698 }
0x1feb   :  { %v3700_v38 = vsub.f32 %v3693_v14, %v3699_v21 }
0x1fed   :  { %v3701_v23 = vmul.f32 1.442695, %v3700_v38 }
0x1fef   :  { %10244 = vpow2.f32 %v3701_v23 }
0x1ff9   :  { %v10245_v9 = vpop.eup %10244 }
0x1ffa   :  { %v3703_v24 = vsel %vm3696_vm3, %v10245_v9, 0.0 }
0x1ffb   :  { %3704 = vadd.xlane.f32.xlu0 %v3703_v24 }
0x205d   :  { %v3869_v25 = vpop.xlane.xlu1 %3868 }
0x205e   :  { %v3870_v33 = vsub.f32 %v3864_v18, %v3869_v25 }
0x2060   :  { %v3871_v26 = vmul.f32 1.442695, %v3870_v33 }
0x2061   :  { %v10092_v52 = vpop.permute.xlu1 %10091 }
0x2062   :  { %10246 = vpow2.f32 %v3871_v26  ;;  %v10094_v53 = vunpack.i.h.bf16 %v10092_v52  ;;  %v10093_v56 = vunpack.i.l.bf16 %v10092_v52 }
0x2064   :  { %v9637_v43 = vpack.c.bf16 %v10094_v53, %v10093_v56 }
0x2065   :  { %v10097_v58 = vpop.permute.xlu1 %10096 }
0x2066   :  { %v10099_v60 = vunpack.i.h.bf16 %v10097_v58  ;;  %v10098_v62 = vunpack.i.l.bf16 %v10097_v58  ;;  %v11179_v58 = vld [vmem:[%s12764_s18 + $0x10] sm:$0xff] }
0x2068   :  { %v9645_v63 = vpack.c.bf16 %v10099_v60, %v10098_v62 }
0x206c   :  { %v10247_v30 = vpop.eup %10246 }
0x206d   :  { %v3873_v31 = vsel %vm3696_vm3, %v10247_v30, 0.0 }
0x206e   :  { %3874 = vadd.xlane.f32.xlu0 %v3873_v31 }
0x2084   :  { %10086 = vrot.lane.b32.xlu0 %v11067_v4, %s10328_s11 }
0x2088   :  { %4105 = vrot.lane.b32.xlu0 %v11048_v61, %s10329_s6  ;;  %v3705_v32 = vpop.xlane.xlu0 %3704 }
0x2089   :  { %10248 = vrcp.f32 %v3705_v32 }
0x208c   :  { %4352 = vrot.lane.b32.xlu0 %v11048_v61, %s10330_s30 }
0x2093   :  { %v10249_v34 = vpop.eup %10248 }
0x2094   :  { %v3707_v36 = vmul.f32 %v10249_v34, %v10245_v9 }
0x2096   :  { %9338 = vmatmul.mubr.msk.f32.vlgmr.msra.gmra.mrb[46].mxu0 %vm3696_vm3, %v3707_v36 }
0x2097   :  { %9351 = vmatprep.mubr.msk.f32.mxu0 %vm10327_vm5, %v10326_v3 }
0x20fb   :  { %v3875_v42 = vpop.xlane.xlu0 %3874 }
0x20fc   :  { %10250 = vrcp.f32 %v3875_v42 }
0x20ff   :  { %v10087_v45 = vpop.permute.xlu0 %10086 }
0x2100   :  { %v10089_v46 = vunpack.i.h.bf16 %v10087_v45  ;;  %v10088_v47 = vunpack.i.l.bf16 %v10087_v45 }
0x2102   :  { %v9633_v48 = vpack.c.bf16 %v10089_v46, %v10088_v47 }
0x2103   :  { %v4106_v0 = vpop.permute.xlu0 %4105 }
0x2104   :  { %9635 = vmatpush3.bf16.msk.msra.mxu0 %vm11057_vm1, %v9633_v48 }
0x2105   :  { %9354 = vmatprep.subr.mxu0 %v10326_v3 }
0x2106   :  { %v10251_v54 = vpop.eup %10250 }
0x2107   :  { %v3877_v49 = vmul.f32 %v10251_v54, %v10247_v30  ;;  %v4353_v1 = vpop.permute.xlu0 %4352 }
0x2109   :  { %9352 = vmatmul.mubr.msk.f32.vlgmr.msra.gmra.mrb[48].mxu0 %vm3696_vm3, %v3877_v49 }
0x210a   :  { %9355 = vmatpush3.msra.mxu0 %v11119_v50  ;;  %9356 = vmatprep.mubr.msk.f32.mxu0 %vm10327_vm5, %v10326_v3 }
0x210b   :  { %9636 = vmatprep.subr.bf16.mxu0 %v10333_v8 }
0x2169   :  { %v3781_v7 = vpop.f32.mrb[46].mxu0 }
0x216a   :  { %v9339_v51 = vpop.f32.mrb[47].mxu0  ;;  %9362 = vmatmul.mubr.msk.f32.vlgmr.msra.gmra.mrb[50].mxu1 %vm409_vm6, %v3781_v7 }
0x216b   :  { %9375 = vmatprep.mubr.msk.f32.mxu1 %vm10327_vm5, %v10326_v3 }
0x21dc   :  { %v3955_v57 = vpop.f32.mrb[48].mxu0 }
0x21dd   :  { %v9353_v59 = vpop.f32.mrb[49].mxu0  ;;  %9357 = vmatmul.mubr.msk.f32.vlgmr.msra.gmra.mrb[50].mxu0 %vm409_vm6, %v3955_v57 }
0x21de   :  { %9639 = vmatpush3.bf16.xpose.msk.msra.mxu0 %vm10987_vm13, %v9637_v43  ;;  %9368 = vmatprep.mubr.msk.f32.mxu0 %vm10327_vm5, %v10326_v3 }
0x21df   :  { %9644 = vmatprep.subr.bf16.mxu0 %v10333_v8 }
0x21e5   :  { %9369 = vmatmul.mubr.msk.f32.vlgmr.msra.gmra.mrb[52].mxu0 %vm409_vm6, %v4106_v0 }
0x21e6   :  { %9647 = vmatpush3.bf16.xpose.msk.msra.mxu0 %vm10987_vm13, %v9645_v63  ;;  %9387 = vmatprep.mubr.msk.f32.mxu0 %vm10327_vm5, %v10326_v3 }
0x21e7   :  { %9652 = vmatprep.subr.bf16.mxu0 %v10333_v8 }
0x21ed   :  { %9388 = vmatmul.mubr.msk.f32.vlgmr.msra.gmra.mrb[54].mxu0 %vm409_vm6, %v4353_v1 }
0x21ee   :  { %9406 = vmatprep.mubr.msk.f32.mxu0 %vm10327_vm5, %v10326_v3 }
0x223d   :  { %v4101_v44 = vpop.f32.mrb[50].mxu1 }
0x223e   :  { %v9363_v22 = vpop.f32.mrb[51].mxu1 }
0x22b0   :  { %v4028_v14 = vpop.f32.mrb[50].mxu0 }
0x22b1   :  { %v11144_v15 = vadd.f32 %v4101_v44, %v4028_v14  ;;  %v9358_v16 = vpop.f32.mrb[51].mxu0 }
0x22b8   :  { %v4183_v17 = vpop.f32.mrb[52].mxu0 }
0x22b9   :  { %v4184_v18 = vadd.f32 %v4183_v17, %v11085_v13  ;;  %v9370_v19 = vpop.f32.mrb[53].mxu0 }
0x22bb   :  { %v4187_v20 = vsel %vm3696_vm3, %v4184_v18, -inf }
0x22bc   :  { %4188 = vmax.xlane.f32.xlu1 %v4187_v20 }
0x22c0   :  { %v4430_v21 = vpop.f32.mrb[54].mxu0 }
0x22c1   :  { %v9389_v38 = vpop.f32.mrb[55].mxu0  ;;  %v4431_v36 = vadd.f32 %v4430_v21, %v11085_v13 }
0x22c3   :  { %v4434_v42 = vsel %vm3696_vm3, %v4431_v36, -inf }
0x22cd   :  { %10106 = vrot.lane.b32.xlu1 %v10991_v28, %s10331_s8 }
0x22d1   :  { %4599 = vrot.lane.b32.xlu1 %v11048_v61, %s10331_s8 }
0x2349   :  { %v4189_v23 = vpop.xlane.xlu1 %4188 }
0x234a   :  { %v4190_v9 = vsub.f32 %v4184_v18, %v4189_v23 }
0x234c   :  { %v4191_v24 = vmul.f32 1.442695, %v4190_v9 }
0x234d   :  { %v10107_v25 = vpop.permute.xlu1 %10106 }
0x234e   :  { %10252 = vpow2.f32 %v4191_v24  ;;  %v10109_v33 = vunpack.i.h.bf16 %v10107_v25  ;;  %v10108_v26 = vunpack.i.l.bf16 %v10107_v25 }
0x2350   :  { %v9653_v30 = vpack.c.bf16 %v10109_v33, %v10108_v26 }
0x2351   :  { %v4600_v32 = vpop.permute.xlu1 %4599 }
0x2352   :  { %9655 = vmatpush3.bf16.xpose.msk.msra.mxu0 %vm10987_vm13, %v9653_v30 }
0x2353   :  { %9660 = vmatprep.subr.bf16.mxu0 %v10333_v8 }
0x2358   :  { %v10253_v31 = vpop.eup %10252 }
0x2359   :  { %9407 = vmatmul.mubr.msk.f32.vlgmr.msra.gmra.mrb[56].mxu0 %vm409_vm6, %v4600_v32  ;;  %v4193_v34 = vsel %vm3696_vm3, %v10253_v31, 0.0 }
0x235a   :  { %4194 = vadd.xlane.f32.xlu0 %v4193_v34  ;;  %9425 = vmatprep.mubr.msk.f32.mxu0 %vm10327_vm5, %v10326_v3 }
0x2370   :  { %10101 = vrot.lane.b32.xlu0 %v11067_v4, %s10329_s6 }
0x238f   :  { %4435 = vmax.xlane.f32.xlu0 %v4434_v42 }
0x23a5   :  { %10111 = vrot.lane.b32.xlu0 %v11067_v4, %s10330_s30 }
0x23a9   :  { %4846 = vrot.lane.b32.xlu0 %v11048_v61, %s10332_s10 }
0x23e7   :  { %v4195_v45 = vpop.xlane.xlu0 %4194 }
0x23e8   :  { %10254 = vrcp.f32 %v4195_v45 }
0x23eb   :  { %v10102_v46 = vpop.permute.xlu0 %10101 }
0x23ec   :  { %v10104_v47 = vunpack.i.h.bf16 %v10102_v46  ;;  %v10103_v48 = vunpack.i.l.bf16 %v10102_v46 }
0x23ee   :  { %v9641_v54 = vpack.c.bf16 %v10104_v47, %v10103_v48 }
0x23f0   :  { %9643 = vmatpush3.bf16.msk.msra.mxu1 %vm11057_vm1, %v9641_v54 }
0x23f1   :  { %9378 = vmatprep.subr.mxu1 %v10326_v3 }
0x23f2   :  { %v10255_v49 = vpop.eup %10254 }
0x23f3   :  { %v4197_v7 = vmul.f32 %v10255_v49, %v10253_v31 }
0x23f5   :  { %9376 = vmatmul.mubr.msk.f32.vlgmr.msra.gmra.mrb[52].mxu1 %vm3696_vm3, %v4197_v7 }
0x23f6   :  { %9380 = vmatprep.mubr.msk.f32.mxu1 %vm10327_vm5, %v10326_v3  ;;  %9379 = vmatpush3.msra.mxu1 %v11179_v58 }
0x23f7   :  { %9648 = vmatprep.subr.bf16.mxu1 %v10333_v8 }
0x241c   :  { %v4436_v51 = vpop.xlane.xlu0 %4435 }
0x241d   :  { %v4437_v61 = vsub.f32 %v4431_v36, %v4436_v51  ;;  %v86_v36 = vld [vmem:[%s12795_s1 + $0x8] sm:$0xff] }
0x241e   :  { %vm5093_vm4 = vcmp.eq.f32.partialorder %v86_v36, 0.0 }
0x241f   :  { %v4438_v52 = vmul.f32 1.442695, %v4437_v61 }
0x2421   :  { %10256 = vpow2.f32 %v4438_v52 }
0x242b   :  { %v10257_v53 = vpop.eup %10256 }
0x242c   :  { %v4677_v56 = vpop.f32.mrb[56].mxu0  ;;  %v4440_v43 = vsel %vm3696_vm3, %v10257_v53, 0.0 }
0x242d   :  { %4441 = vadd.xlane.f32.xlu1 %v4440_v43  ;;  %v9408_v57 = vpop.f32.mrb[57].mxu0  ;;  %v4678_v59 = vadd.f32 %v4677_v56, %v11085_v13 }
0x242f   :  { %v4681_v60 = vsel %vm3696_vm3, %v4678_v59, -inf }
0x243e   :  { %10116 = vrot.lane.b32.xlu1 %v10991_v28, %s10332_s10  ;;  %v10112_v28 = vpop.permute.xlu0 %10111 }
0x243f   :  { %v10114_v22 = vunpack.i.h.bf16 %v10112_v28  ;;  %v10113_v14 = vunpack.i.l.bf16 %v10112_v28 }
0x2441   :  { %v9649_v17 = vpack.c.bf16 %v10114_v22, %v10113_v14 }
0x2442   :  { %v4847_v19 = vpop.permute.xlu0 %4846 }
0x2462   :  { %4682 = vmax.xlane.f32.xlu1 %v4681_v60 }
0x24ba   :  { %v4442_v62 = vpop.xlane.xlu1 %4441 }
0x24bb   :  { %10258 = vrcp.f32 %v4442_v62 }
0x24be   :  { %v10117_v63 = vpop.permute.xlu1 %10116 }
0x24bf   :  { %v10119_v0 = vunpack.i.h.bf16 %v10117_v63  ;;  %v10118_v1 = vunpack.i.l.bf16 %v10117_v63 }
0x24c1   :  { %v9661_v44 = vpack.c.bf16 %v10119_v0, %v10118_v1 }
0x24c3   :  { %9663 = vmatpush3.bf16.xpose.msk.msra.mxu0 %vm10987_vm13, %v9661_v44 }
0x24c4   :  { %9668 = vmatprep.subr.bf16.mxu0 %v10333_v8 }
0x24c5   :  { %v10259_v16 = vpop.eup %10258 }
0x24c6   :  { %v4444_v21 = vmul.f32 %v10259_v16, %v10257_v53  ;;  %v11248_v53 = vld [vmem:[%s12764_s18 + $0x20] sm:$0xff] }
0x24c8   :  { %v4274_v18 = vpop.f32.mrb[52].mxu1 }
0x24c9   :  { %v9377_v20 = vpop.f32.mrb[53].mxu1  ;;  %9381 = vmatmul.mubr.msk.f32.vlgmr.msra.gmra.mrb[54].mxu1 %vm409_vm6, %v4274_v18 }
0x24ca   :  { %9651 = vmatpush3.bf16.msk.msra.mxu1 %vm11057_vm1, %v9649_v17  ;;  %9426 = vmatmul.mubr.msk.f32.vlgmr.msra.gmra.mrb[58].mxu0 %vm409_vm6, %v4847_v19 }
0x24cb   :  { %9671 = vmatpush3.bf16.xpose.msk.msra.mxu0 %vm10987_vm13, %v9669_v39  ;;  %9394 = vmatprep.mubr.msk.f32.mxu1 %vm10327_vm5, %v10326_v3 }
0x24cc   :  { %9444 = vmatprep.mubr.msk.f32.mxu0 %vm10327_vm5, %v10326_v3  ;;  %9397 = vmatprep.subr.mxu1 %v10326_v3 }
0x24cd   :  { %9395 = vmatmul.mubr.msk.f32.vlgmr.msra.gmra.mrb[56].mxu1 %vm3696_vm3, %v4444_v21  ;;  %9680 = vmatprep.subr.bf16.mxu0 %v10333_v8 }
0x24ce   :  { %9399 = vmatprep.mubr.msk.f32.mxu1 %vm10327_vm5, %v10326_v3  ;;  %9398 = vmatpush3.msra.mxu1 %v11219_v55 }
0x24cf   :  { %9656 = vmatprep.subr.bf16.mxu1 %v10333_v8 }
0x24d2   :  { %9445 = vmatmul.mubr.msk.f32.vlgmr.msra.gmra.mrb[60].mxu0 %vm409_vm6, %v11207_v35 }
0x24d3   :  { %9465 = vmatprep.mubr.msk.f32.mxu0 %vm10327_vm5, %v10326_v3 }
0x24ef   :  { %v4683_v37 = vpop.xlane.xlu1 %4682 }
0x24f0   :  { %v4684_v39 = vsub.f32 %v4678_v59, %v4683_v37 }
0x24f2   :  { %v4685_v38 = vmul.f32 1.442695, %v4684_v39 }
0x24f4   :  { %10260 = vpow2.f32 %v4685_v38  ;;  %v11267_v38 = vld [vmem:[%s12764_s18 + $0x28] sm:$0xff] }
0x24fe   :  { %v10261_v23 = vpop.eup %10260 }
0x24ff   :  { %v4687_v9 = vsel %vm3696_vm3, %v10261_v23, 0.0 }
0x2500   :  { %4688 = vadd.xlane.f32.xlu0 %v4687_v9 }
0x2516   :  { %10121 = vrot.lane.b32.xlu0 %v11067_v4, %s10331_s8 }
0x258d   :  { %v4689_v24 = vpop.xlane.xlu0 %4688 }
0x258e   :  { %10262 = vrcp.f32 %v4689_v24 }
0x2591   :  { %v10122_v25 = vpop.permute.xlu0 %10121 }
0x2592   :  { %v10124_v33 = vunpack.i.h.bf16 %v10122_v25  ;;  %v10123_v26 = vunpack.i.l.bf16 %v10122_v25 }
0x2594   :  { %v9657_v47 = vpack.c.bf16 %v10124_v33, %v10123_v26 }
0x2598   :  { %v10263_v46 = vpop.eup %10262 }
0x259c   :  { %v4347_v30 = vpop.f32.mrb[54].mxu1 }
0x259d   :  { %v4351_v31 = vadd.f32 %v4347_v30, %v11144_v15  ;;  %v9382_v32 = vpop.f32.mrb[55].mxu1  ;;  %v4924_v34 = vpop.f32.mrb[58].mxu0  ;;  %v4691_v15 = vmul.f32 %v10263_v46, %v10261_v23 }
0x259e   :  { %v4925_v42 = vadd.f32 %v4924_v34, %v11085_v13  ;;  %v9427_v45 = vpop.f32.mrb[59].mxu0  ;;  %v11235_v13 = vsel %vm5093_vm4, -1e+09, %v10326_v3 }
0x25a0   :  { %v4521_v48 = vpop.f32.mrb[56].mxu1  ;;  %v4928_v54 = vsel %vm3696_vm3, %v4925_v42, -inf }
0x25a1   :  { %v9396_v49 = vpop.f32.mrb[57].mxu1  ;;  %9400 = vmatmul.mubr.msk.f32.vlgmr.msra.gmra.mrb[58].mxu1 %vm409_vm6, %v4521_v48  ;;  %4929 = vmax.xlane.f32.xlu1 %v4928_v54 }
0x25a2   :  { %9659 = vmatpush3.bf16.msk.msra.mxu1 %vm11057_vm1, %v9657_v47  ;;  %9413 = vmatprep.mubr.msk.f32.mxu1 %vm10327_vm5, %v10326_v3 }
0x25a3   :  { %9416 = vmatprep.subr.mxu1 %v10326_v3 }
0x25a5   :  { %9414 = vmatmul.mubr.msk.f32.vlgmr.msra.gmra.mrb[60].mxu1 %vm3696_vm3, %v4691_v15  ;;  %v5172_v7 = vpop.f32.mrb[60].mxu0 }
0x25a6   :  { %v5173_v51 = vadd.f32 %v5172_v7, %v11235_v13  ;;  %v9446_v61 = vpop.f32.mrb[61].mxu0  ;;  %9418 = vmatprep.mubr.msk.f32.mxu1 %vm10327_vm5, %v10326_v3  ;;  %9417 = vmatpush3.msra.mxu1 %v11248_v53 }
0x25a7   :  { %9664 = vmatprep.subr.bf16.mxu1 %v10333_v8 }
0x25a8   :  { %v5176_v52 = vsel %vm3696_vm3, %v5173_v51, -inf }
0x25a9   :  { %5177 = vmax.xlane.f32.xlu0 %v5176_v52 }
0x25bf   :  { %10131 = vrot.lane.b32.xlu0 %v11008_v40, %s10328_s11 }
0x262e   :  { %v4930_v56 = vpop.xlane.xlu1 %4929 }
0x262f   :  { %v4931_v43 = vsub.f32 %v4925_v42, %v4930_v56 }
0x2631   :  { %v4932_v57 = vmul.f32 1.442695, %v4931_v43 }
0x2633   :  { %10264 = vpow2.f32 %v4932_v57 }
0x2636   :  { %v5178_v62 = vpop.xlane.xlu0 %5177 }
0x2637   :  { %v5179_v63 = vsub.f32 %v5173_v51, %v5178_v62 }
0x2639   :  { %v5180_v0 = vmul.f32 1.442695, %v5179_v63 }
0x263b   :  { %10266 = vpow2.f32 %v5180_v0 }
0x263d   :  { %v10265_v59 = vpop.eup %10264 }
0x263e   :  { %v4934_v60 = vsel %vm3696_vm3, %v10265_v59, 0.0 }
0x263f   :  { %4935 = vadd.xlane.f32.xlu1 %v4934_v60 }
0x2645   :  { %v10267_v1 = vpop.eup %10266 }
0x2646   :  { %v5182_v28 = vsel %vm3696_vm3, %v10267_v1, 0.0 }
0x2650   :  { %10126 = vrot.lane.b32.xlu1 %v11067_v4, %s10332_s10 }
0x2674   :  { %v4594_v44 = vpop.f32.mrb[58].mxu1  ;;  %5183 = vadd.xlane.f32.xlu1 %v5182_v28 }
0x2675   :  { %v4598_v22 = vadd.f32 %v4594_v44, %v4351_v31  ;;  %v9401_v14 = vpop.f32.mrb[59].mxu1  ;;  %v10132_v31 = vpop.permute.xlu0 %10131 }
0x2676   :  { %v10134_v34 = vunpack.i.h.bf16 %v10132_v31  ;;  %v10133_v36 = vunpack.i.l.bf16 %v10132_v31 }
0x2678   :  { %v4768_v16 = vpop.f32.mrb[60].mxu1  ;;  %v9677_v42 = vpack.c.bf16 %v10134_v34, %v10133_v36 }
0x2679   :  { %v9415_v17 = vpop.f32.mrb[61].mxu1  ;;  %9419 = vmatmul.mubr.msk.f32.vlgmr.msra.gmra.mrb[62].mxu1 %vm409_vm6, %v4768_v16 }
0x267a   :  { %9432 = vmatprep.mubr.msk.f32.mxu1 %vm10327_vm5, %v10326_v3 }
0x2685   :  { %5267 = vrot.lane.b32.xlu1 %v11207_v35, %s10328_s11 }
0x26cc   :  { %v4936_v4 = vpop.xlane.xlu1 %4935 }
0x26cd   :  { %10268 = vrcp.f32 %v4936_v4 }
0x26d0   :  { %v10127_v18 = vpop.permute.xlu1 %10126 }
0x26d1   :  { %v10129_v19 = vunpack.i.h.bf16 %v10127_v18  ;;  %v10128_v20 = vunpack.i.l.bf16 %v10127_v18 }
0x26d3   :  { %v9665_v21 = vpack.c.bf16 %v10129_v19, %v10128_v20 }
0x26d5   :  { %9667 = vmatpush3.bf16.msk.msra.mxu1 %vm11057_vm1, %v9665_v21 }
0x26d6   :  { %9435 = vmatprep.subr.mxu1 %v10326_v3 }
0x26d7   :  { %v10269_v37 = vpop.eup %10268 }
0x26d8   :  { %v4938_v39 = vmul.f32 %v10269_v37, %v10265_v59 }
0x26da   :  { %9433 = vmatmul.mubr.msk.f32.vlgmr.msra.gmra.mrb[64].mxu1 %vm3696_vm3, %v4938_v39 }
0x26db   :  { %9436 = vmatpush3.msra.mxu1 %v11267_v38  ;;  %9437 = vmatprep.mubr.msk.f32.mxu1 %vm10327_vm5, %v10326_v3 }
0x26dc   :  { %9672 = vmatprep.subr.bf16.mxu1 %v10333_v8 }
0x2701   :  { %v5184_v25 = vpop.xlane.xlu1 %5183 }
0x2702   :  { %10270 = vrcp.f32 %v5184_v25 }
0x2705   :  { %v5268_v11 = vpop.permute.xlu1 %5267 }
0x270c   :  { %v10271_v33 = vpop.eup %10270 }
0x270d   :  { %v5186_v32 = vmul.f32 %v10271_v33, %v10267_v1 }
0x274c   :  { %v4841_v23 = vpop.f32.mrb[62].mxu1 }
0x274d   :  { %v4845_v9 = vadd.f32 %v4841_v23, %v4598_v22  ;;  %v9420_v24 = vpop.f32.mrb[63].mxu1 }
0x27ad   :  { %v5015_v26 = vpop.f32.mrb[64].mxu1 }
0x27ae   :  { %v9434_v30 = vpop.f32.mrb[65].mxu1  ;;  %9438 = vmatmul.mubr.msk.f32.vlgmr.msra.gmra.mrb[66].mxu1 %vm409_vm6, %v5015_v26 }
0x27af   :  { %9675 = vmatpush3.bf16.msk.msra.mxu1 %vm11057_vm1, %v9673_v10  ;;  %9451 = vmatprep.mubr.msk.f32.mxu1 %vm10327_vm5, %v10326_v3 }
0x27b0   :  { %9676 = vmatprep.subr.bf16.mxu1 %v10333_v8 }
0x27b2   :  { %9452 = vmatmul.mubr.msk.f32.vlgmr.msra.gmra.mrb[68].mxu1 %vm3696_vm3, %v5186_v32 }
0x27b3   :  { %9458 = vmatprep.mubr.msk.f32.mxu1 %vm10327_vm5, %v10326_v3 }
0x27b8   :  { %9679 = vmatpush3.bf16.xpose.msk.msra.mxu1 %vm10987_vm13, %v9677_v42 }
0x27b9   :  { %9473 = vmatprep.subr.mxu1 %v10326_v3 }
0x27bf   :  { %9459 = vmatmul.mubr.msk.f32.vlgmr.msra.gmra.mrb[70].mxu1 %vm409_vm6, %v5268_v11 }
0x27c0   :  { %9474 = vmatpush3.msra.mxu1 %v11109_v41  ;;  %9475 = vmatprep.mubr.msk.f32.mxu1 %vm10327_vm5, %v10326_v3 }
0x27c1   :  { %9688 = vmatprep.subr.bf16.mxu1 %v10333_v8 }
0x2881   :  { %v5088_v2 = vpop.f32.mrb[66].mxu1 }
0x2882   :  { %v11294_v10 = vadd.f32 %v5088_v2, %v4845_v9  ;;  %v9439_v45 = vpop.f32.mrb[67].mxu1 }
0x2885   :  { %v5263_v46 = vpop.f32.mrb[68].mxu1 }
0x2886   :  { %v9453_v47 = vpop.f32.mrb[69].mxu1  ;;  %9476 = vmatmul.mubr.msk.f32.vlgmr.msra.gmra.mrb[72].mxu1 %vm409_vm6, %v5263_v46 }
0x2887   :  { %9489 = vmatprep.mubr.msk.f32.mxu1 %vm10327_vm5, %v10326_v3 }
0x2892   :  { %v5345_v48 = vpop.f32.mrb[70].mxu1 }
0x2893   :  { %v5346_v54 = vadd.f32 %v5345_v48, %v11235_v13  ;;  %v9460_v41 = vpop.f32.mrb[71].mxu1 }
0x2895   :  { %v5349_v49 = vsel %vm3696_vm3, %v5346_v54, -inf }
0x2896   :  { %5350 = vmax.xlane.f32.xlu0 %v5349_v49 }
0x28ac   :  { %10136 = vrot.lane.b32.xlu0 %v11079_v6, %s10328_s11 }
0x28b0   :  { %5586 = vrot.lane.b32.xlu0 %v11207_v35, %s10329_s6 }
0x28b4   :  { %10146 = vrot.lane.b32.xlu0 %v11008_v40, %s10330_s30 }
0x2923   :  { %v5351_v15 = vpop.xlane.xlu0 %5350 }
0x2924   :  { %v5352_v7 = vsub.f32 %v5346_v54, %v5351_v15 }
0x2926   :  { %v5353_v51 = vmul.f32 1.442695, %v5352_v7 }
0x2927   :  { %v10137_v61 = vpop.permute.xlu0 %10136 }
0x2928   :  { %10272 = vpow2.f32 %v5353_v51  ;;  %v10139_v52 = vunpack.i.h.bf16 %v10137_v61  ;;  %v10138_v56 = vunpack.i.l.bf16 %v10137_v61 }
0x292a   :  { %v9681_v43 = vpack.c.bf16 %v10139_v52, %v10138_v56 }
0x292b   :  { %v5587_v44 = vpop.permute.xlu0 %5586 }
0x292c   :  { %9683 = vmatpush3.bf16.msk.msra.mxu0 %vm11057_vm1, %v9681_v43 }
0x292d   :  { %9468 = vmatprep.subr.mxu0 %v10326_v3 }
0x292f   :  { %v10147_v4 = vpop.permute.xlu0 %10146 }
0x2930   :  { %v10148_v19 = vunpack.i.l.bf16 %v10147_v4 }
0x2932   :  { %v10273_v57 = vpop.eup %10272 }
0x2933   :  { %v5355_v59 = vsel %vm3696_vm3, %v10273_v57, 0.0 }
0x2934   :  { %5356 = vadd.xlane.f32.xlu1 %v5355_v59 }
0x2945   :  { %10141 = vrot.lane.b32.xlu1 %v11008_v40, %s10329_s6 }
0x2949   :  { %5833 = vrot.lane.b32.xlu1 %v11207_v35, %s10330_s30 }
0x2959   :  { %v5582_v60 = vpop.f32.mrb[72].mxu1 }
0x295a   :  { %v9477_v62 = vpop.f32.mrb[73].mxu1 }
0x29c1   :  { %v5357_v63 = vpop.xlane.xlu1 %5356 }
0x29c2   :  { %10274 = vrcp.f32 %v5357_v63 }
0x29c5   :  { %v10142_v28 = vpop.permute.xlu1 %10141 }
0x29c6   :  { %v10144_v22 = vunpack.i.h.bf16 %v10142_v28  ;;  %v10143_v14 = vunpack.i.l.bf16 %v10142_v28 }
0x29c8   :  { %v9685_v16 = vpack.c.bf16 %v10144_v22, %v10143_v14 }
0x29c9   :  { %v5834_v21 = vpop.permute.xlu1 %5833 }
0x29cc   :  { %v10275_v0 = vpop.eup %10274 }
0x29cd   :  { %v5359_v1 = vmul.f32 %v10275_v0, %v10273_v57 }
0x29cf   :  { %9466 = vmatmul.mubr.msk.f32.vlgmr.msra.gmra.mrb[62].mxu0 %vm3696_vm3, %v5359_v1 }
0x29d0   :  { %9469 = vmatpush3.msra.mxu0 %v11119_v50  ;;  %9470 = vmatprep.mubr.msk.f32.mxu0 %vm10327_vm5, %v10326_v3  ;;  %v10149_v50 = vunpack.i.h.bf16 %v10147_v4 }
0x29d1   :  { %9684 = vmatprep.subr.bf16.mxu0 %v10333_v8 }
0x29d2   :  { %v9693_v20 = vpack.c.bf16 %v10149_v50, %v10148_v19 }
0x2aa2   :  { %v5436_v17 = vpop.f32.mrb[62].mxu0 }
0x2aa3   :  { %v9467_v18 = vpop.f32.mrb[63].mxu0  ;;  %9471 = vmatmul.mubr.msk.f32.vlgmr.msra.gmra.mrb[64].mxu0 %vm409_vm6, %v5436_v17 }
0x2aa4   :  { %9687 = vmatpush3.bf16.xpose.msk.msra.mxu0 %vm10987_vm13, %v9685_v16  ;;  %9482 = vmatprep.mubr.msk.f32.mxu0 %vm10327_vm5, %v10326_v3 }
0x2aa5   :  { %9692 = vmatprep.subr.bf16.mxu0 %v10333_v8 }
0x2aab   :  { %9483 = vmatmul.mubr.msk.f32.vlgmr.msra.gmra.mrb[66].mxu0 %vm409_vm6, %v5587_v44 }
0x2aac   :  { %9695 = vmatpush3.bf16.xpose.msk.msra.mxu0 %vm10987_vm13, %v9693_v20  ;;  %9501 = vmatprep.mubr.msk.f32.mxu0 %vm10327_vm5, %v10326_v3  ;;  %v11391_v20 = vld [vmem:[%s12765_s19] ss:$0 sm:$0xff] }
0x2aad   :  { %9700 = vmatprep.subr.bf16.mxu0 %v10333_v8 }
0x2ab3   :  { %9502 = vmatmul.mubr.msk.f32.vlgmr.msra.gmra.mrb[68].mxu0 %vm409_vm6, %v5834_v21  ;;  %v6580_v21 = vadd.f32 %v11391_v20, %v11294_v10 }
0x2ab4   :  { %9520 = vmatprep.mubr.msk.f32.mxu0 %vm10327_vm5, %v10326_v3 }
0x2b76   :  { %v5509_v37 = vpop.f32.mrb[64].mxu0 }
0x2b77   :  { %v11335_v39 = vadd.f32 %v5582_v60, %v5509_v37  ;;  %v9472_v23 = vpop.f32.mrb[65].mxu0  ;;  %v11396_v37 = vadd.f32 %v6580_v21, %v10879_v12 }
0x2b7e   :  { %v5664_v9 = vpop.f32.mrb[66].mxu0 }
0x2b7f   :  { %v5665_v24 = vadd.f32 %v5664_v9, %v11235_v13  ;;  %v9484_v25 = vpop.f32.mrb[67].mxu0  ;;  %v6586_v9 = vsel %vm89_vm0, %v11396_v37, 0.0 }
0x2b81   :  { %v5668_v33 = vsel %vm3696_vm3, %v5665_v24, -inf }
0x2b82   :  { %5669 = vmax.xlane.f32.xlu0 %v5668_v33 }
0x2b86   :  { %v5911_v26 = vpop.f32.mrb[68].mxu0 }
0x2b87   :  { %v9503_v30 = vpop.f32.mrb[69].mxu0  ;;  %v5912_v47 = vadd.f32 %v5911_v26, %v11235_v13 }
0x2b89   :  { %v5915_v48 = vsel %vm3696_vm3, %v5912_v47, -inf }
0x2b98   :  { %10151 = vrot.lane.b32.xlu0 %v11079_v6, %s10329_s6 }
0x2b9c   :  { %6080 = vrot.lane.b32.xlu0 %v11207_v35, %s10331_s8 }
0x2c0f   :  { %v5670_v31 = vpop.xlane.xlu0 %5669 }
0x2c10   :  { %v5671_v32 = vsub.f32 %v5665_v24, %v5670_v31 }
0x2c12   :  { %v5672_v34 = vmul.f32 1.442695, %v5671_v32 }
0x2c13   :  { %v10152_v36 = vpop.permute.xlu0 %10151 }
0x2c14   :  { %10276 = vpow2.f32 %v5672_v34  ;;  %v10154_v42 = vunpack.i.h.bf16 %v10152_v36  ;;  %v10153_v11 = vunpack.i.l.bf16 %v10152_v36 }
0x2c16   :  { %v9689_v2 = vpack.c.bf16 %v10154_v42, %v10153_v11 }
0x2c17   :  { %v6081_v52 = vpop.permute.xlu0 %6080 }
0x2c18   :  { %9691 = vmatpush3.bf16.msk.msra.mxu1 %vm11057_vm1, %v9689_v2 }
0x2c19   :  { %9492 = vmatprep.subr.mxu1 %v10326_v3 }
0x2c1e   :  { %v10277_v45 = vpop.eup %10276 }
0x2c1f   :  { %v5674_v46 = vsel %vm3696_vm3, %v10277_v45, 0.0 }
0x2c20   :  { %5675 = vadd.xlane.f32.xlu1 %v5674_v46 }
0x2c31   :  { %10156 = vrot.lane.b32.xlu1 %v11008_v40, %s10331_s8 }
0x2c55   :  { %5916 = vmax.xlane.f32.xlu1 %v5915_v48 }
0x2c66   :  { %10166 = vrot.lane.b32.xlu1 %v11008_v40, %s10332_s10 }
0x2c6a   :  { %6327 = vrot.lane.b32.xlu1 %v11207_v35, %s10332_s10 }
0x2cad   :  { %v5676_v54 = vpop.xlane.xlu1 %5675 }
0x2cae   :  { %10278 = vrcp.f32 %v5676_v54 }
0x2cb1   :  { %v10157_v41 = vpop.permute.xlu1 %10156 }
0x2cb2   :  { %v10159_v49 = vunpack.i.h.bf16 %v10157_v41  ;;  %v10158_v15 = vunpack.i.l.bf16 %v10157_v41 }
0x2cb4   :  { %v9701_v7 = vpack.c.bf16 %v10159_v49, %v10158_v15  ;;  %v6645_v49 = vld [vmem:[%s12766_s20 + $0x8] sm:$0xff] }
0x2cb6   :  { %9703 = vmatpush3.bf16.xpose.msk.msra.mxu0 %vm10987_vm13, %v9701_v7  ;;  %v6644_v7 = vld [vmem:[%s12766_s20] sm:$0xff] }
0x2cb7   :  { %9708 = vmatprep.subr.bf16.mxu0 %v10333_v8 }
0x2cb8   :  { %v10279_v51 = vpop.eup %10278 }
0x2cb9   :  { %v5678_v61 = vmul.f32 %v10279_v51, %v10277_v45  ;;  %v6660_v51 = vld [vmem:[%s12766_s20 + $0x80] sm:$0xff] }
0x2cbb   :  { %9490 = vmatmul.mubr.msk.f32.vlgmr.msra.gmra.mrb[74].mxu1 %vm3696_vm3, %v5678_v61  ;;  %v9718_v61 = vpack.c.bf16 %v6660_v51, %v6644_v7 }
0x2cbc   :  { %9493 = vmatpush3.msra.mxu1 %v11179_v58  ;;  %9494 = vmatprep.mubr.msk.f32.mxu1 %vm10327_vm5, %v10326_v3 }
0x2cbd   :  { %9521 = vmatmul.mubr.msk.f32.vlgmr.msra.gmra.mrb[70].mxu0 %vm409_vm6, %v6081_v52  ;;  %9696 = vmatprep.subr.bf16.mxu1 %v10333_v8  ;;  %v6677_v52 = vld [vmem:[%s12766_s20 + $0x108] sm:$0xff] }
0x2cbe   :  { %9539 = vmatprep.mubr.msk.f32.mxu0 %vm10327_vm5, %v10326_v3 }
0x2ce2   :  { %v5917_v40 = vpop.xlane.xlu1 %5916 }
0x2ce3   :  { %v5918_v35 = vsub.f32 %v5912_v47, %v5917_v40  ;;  %v6693_v40 = vld [vmem:[%s12766_s20 + $0x188] sm:$0xff] }
0x2ce5   :  { %v5919_v56 = vmul.f32 1.442695, %v5918_v35  ;;  %v9720_v35 = vpack.c.bf16 %v6693_v40, %v6677_v52  ;;  %v6678_v52 = vld [vmem:[%s12766_s20 + $0x110] sm:$0xff] }
0x2ce6   :  { %v10167_v43 = vpop.permute.xlu1 %10166  ;;  %v6694_v40 = vld [vmem:[%s12766_s20 + $0x190] sm:$0xff] }
0x2ce7   :  { %10280 = vpow2.f32 %v5919_v56  ;;  %v10169_v57 = vunpack.i.h.bf16 %v10167_v43  ;;  %v10168_v59 = vunpack.i.l.bf16 %v10167_v43  ;;  %v6676_v56 = vld [vmem:[%s12766_s20 + $0x100] sm:$0xff] }
0x2ce8   :  { %v6692_v43 = vld [vmem:[%s12766_s20 + $0x180] sm:$0xff] }
0x2ce9   :  { %v9709_v60 = vpack.c.bf16 %v10169_v57, %v10168_v59  ;;  %v9722_v57 = vpack.c.bf16 %v6692_v43, %v6676_v56  ;;  %v6709_v59 = vld [vmem:[%s12766_s20 + $0x208] sm:$0xff]  ;;  %v6711_v56 = vld [vmem:[%s12766_s20 + $0x218] sm:$0xff] }
0x2cea   :  { %v6328_v62 = vpop.permute.xlu1 %6327  ;;  %v6727_v43 = vld [vmem:[%s12766_s20 + $0x298] sm:$0xff] }
0x2ceb   :  { %9711 = vmatpush3.bf16.xpose.msk.msra.mxu0 %vm10987_vm13, %v9709_v60  ;;  %v6725_v60 = vld [vmem:[%s12766_s20 + $0x288] sm:$0xff] }
0x2cf1   :  { %v10281_v58 = vpop.eup %10280 }
0x2cf2   :  { %9540 = vmatmul.mubr.msk.f32.vlgmr.msra.gmra.mrb[72].mxu0 %vm409_vm6, %v6328_v62  ;;  %v5921_v63 = vsel %vm3696_vm3, %v10281_v58, 0.0  ;;  %v9724_v62 = vpack.c.bf16 %v6725_v60, %v6709_v59  ;;  %v9734_v59 = vpack.c.bf16 %v6694_v40, %v6678_v52  ;;  %v9736_v60 = vpack.c.bf16 %v6727_v43, %v6711_v56  ;;  %v6730_v40 = vld [vmem:[%s12766_s20 + $0x2b0] sm:$0xff]  ;;  %v6653_v56 = vld [vmem:[%s12766_s20 + $0x48] sm:$0xff] }
0x2cf3   :  { %5922 = vadd.xlane.f32.xlu0 %v5921_v63  ;;  %6894 = vmatprep.mubr.f32.mxu0 %v10326_v3  ;;  %v6724_v63 = vld [vmem:[%s12766_s20 + $0x280] sm:$0xff]  ;;  %v6669_v43 = vld [vmem:[%s12766_s20 + $0xc8] sm:$0xff] }
0x2d09   :  { %10161 = vrot.lane.b32.xlu0 %v11079_v6, %s10330_s30  ;;  %s12796_s30 = sld [smem:[#allocation13_spill]] }
0x2d80   :  { %v5923_v0 = vpop.xlane.xlu0 %5922 }
0x2d81   :  { %10282 = vrcp.f32 %v5923_v0 }
0x2d84   :  { %v10162_v1 = vpop.permute.xlu0 %10161 }
0x2d85   :  { %v10164_v28 = vunpack.i.h.bf16 %v10162_v1  ;;  %v10163_v44 = vunpack.i.l.bf16 %v10162_v1 }
0x2d87   :  { %v9697_v27 = vpack.c.bf16 %v10164_v28, %v10163_v44 }
0x2d8b   :  { %v10283_v22 = vpop.eup %10282 }
0x2d8c   :  { %v5925_v4 = vmul.f32 %v10283_v22, %v10281_v58  ;;  %v6708_v58 = vld [vmem:[%s12766_s20 + $0x200] sm:$0xff] }
0x2d8d   :  { %v9726_v0 = vpack.c.bf16 %v6724_v63, %v6708_v58  ;;  %v6710_v58 = vld [vmem:[%s12766_s20 + $0x210] sm:$0xff] }
0x2d8e   :  { %v5755_v14 = vpop.f32.mrb[74].mxu1 }
0x2d8f   :  { %v9491_v16 = vpop.f32.mrb[75].mxu1  ;;  %9495 = vmatmul.mubr.msk.f32.vlgmr.msra.gmra.mrb[76].mxu1 %vm409_vm6, %v5755_v14 }
0x2d90   :  { %9699 = vmatpush3.bf16.msk.msra.mxu1 %vm11057_vm1, %v9697_v27  ;;  %v6158_v17 = vpop.f32.mrb[70].mxu0  ;;  %9508 = vmatprep.mubr.msk.f32.mxu1 %vm10327_vm5, %v10326_v3 }
0x2d91   :  { %v6159_v18 = vadd.f32 %v6158_v17, %v11235_v13  ;;  %v9522_v50 = vpop.f32.mrb[71].mxu0  ;;  %9511 = vmatprep.subr.mxu1 %v10326_v3 }
0x2d93   :  { %9509 = vmatmul.mubr.msk.f32.vlgmr.msra.gmra.mrb[78].mxu1 %vm3696_vm3, %v5925_v4  ;;  %v6162_v19 = vsel %vm3696_vm3, %v6159_v18, -inf }
0x2d94   :  { %6163 = vmax.xlane.f32.xlu0 %v6162_v19  ;;  %9512 = vmatpush3.msra.mxu1 %v11219_v55 }
0x2d95   :  { %9513 = vmatprep.mubr.msk.f32.mxu1 %vm10327_vm5, %v10326_v3  ;;  %9704 = vmatprep.subr.bf16.mxu1 %v10333_v8 }
0x2daa   :  { %10171 = vrot.lane.b32.xlu0 %v11079_v6, %s10331_s8 }
0x2dc5   :  { %v6405_v55 = vpop.f32.mrb[72].mxu0 }
0x2dc6   :  { %v9541_v23 = vpop.f32.mrb[73].mxu0  ;;  %v6406_v30 = vadd.f32 %v6405_v55, %v11235_v13 }
0x2dc8   :  { %v6409_v10 = vsel %vm3696_vm3, %v6406_v30, -inf }
0x2dc9   :  { %6587 = vadd.xlane.f32.xlu0 %v6586_v9  ;;  %v11465_v9 = vld [vmem:[%s12796_s30] ss:$0 sm:$0xff] }
0x2e21   :  { %v6164_v24 = vpop.xlane.xlu0 %6163 }
0x2e22   :  { %v6165_v25 = vsub.f32 %v6159_v18, %v6164_v24  ;;  %v11471_v24 = vld [vmem:[%s12755_s9] ss:$0 sm:$0xff] }
0x2e24   :  { %v6166_v33 = vmul.f32 1.442695, %v6165_v25 }
0x2e25   :  { %v10172_v12 = vpop.permute.xlu0 %10171 }
0x2e26   :  { %10284 = vpow2.f32 %v6166_v33  ;;  %v10174_v2 = vunpack.i.h.bf16 %v10172_v12  ;;  %v10173_v13 = vunpack.i.l.bf16 %v10172_v12 }
0x2e28   :  { %v9705_v48 = vpack.c.bf16 %v10174_v2, %v10173_v13 }
0x2e30   :  { %v10285_v26 = vpop.eup %10284 }
0x2e31   :  { %v6168_v31 = vsel %vm3696_vm3, %v10285_v26, 0.0 }
0x2e32   :  { %6169 = vadd.xlane.f32.xlu1 %v6168_v31 }
0x2e36   :  { %6410 = vmax.xlane.f32.xlu1 %v6409_v10 }
0x2e56   :  { %v6588_v32 = vpop.xlane.xlu0 %6587 }
0x2e57   :  { %v6592_v34 = vmul.f32 0.020833334, %v6588_v32 }
0x2e59   :  { %v11404_v36 = vsub.f32 %v11396_v37, %v6592_v34 }
0x2e5b   :  { %v6596_v42 = vmul.f32 %v11404_v36, %v11404_v36 }
0x2e5d   :  { %v6598_v11 = vsel %vm89_vm0, %v6596_v42, 0.0 }
0x2e5e   :  { %6599 = vadd.xlane.f32.xlu0 %v6598_v11 }
0x2e62   :  { %v5828_v45 = vpop.f32.mrb[76].mxu1 }
0x2e63   :  { %v11410_v46 = vadd.f32 %v5828_v45, %v11335_v39  ;;  %v9496_v47 = vpop.f32.mrb[77].mxu1  ;;  %v6661_v39 = vld [vmem:[%s12766_s20 + $0x88] sm:$0xff] }
0x2e64   :  { %v9716_v15 = vpack.c.bf16 %v6661_v39, %v6645_v49  ;;  %v6663_v47 = vld [vmem:[%s12766_s20 + $0x98] sm:$0xff] }
0x2e65   :  { %v6679_v49 = vld [vmem:[%s12766_s20 + $0x118] sm:$0xff] }
0x2e66   :  { %v6002_v54 = vpop.f32.mrb[78].mxu1  ;;  %9717 = vmatprep.subr.bf16.mxu0 %v9716_v15  ;;  %v6695_v39 = vld [vmem:[%s12766_s20 + $0x198] sm:$0xff] }
0x2e67   :  { %v9510_v41 = vpop.f32.mrb[79].mxu1  ;;  %9514 = vmatmul.mubr.msk.f32.vlgmr.msra.gmra.mrb[80].mxu1 %vm409_vm6, %v6002_v54  ;;  %9719 = vmatpush1.bf16.msra.mxu0 %v9718_v61  ;;  %v6662_v54 = vld [vmem:[%s12766_s20 + $0x90] sm:$0xff]  ;;  %v9732_v61 = vpack.c.bf16 %v6695_v39, %v6679_v49  ;;  %v6731_v49 = vld [vmem:[%s12766_s20 + $0x2b8] sm:$0xff] }
0x2e68   :  { %9707 = vmatpush3.bf16.msk.msra.mxu1 %vm11057_vm1, %v9705_v48  ;;  %9527 = vmatprep.mubr.msk.f32.mxu1 %vm10327_vm5, %v10326_v3  ;;  %v9728_v48 = vpack.c.bf16 %v6663_v47, %v6647_v5  ;;  %v6682_v5 = vld [vmem:[%s12766_s20 + $0x130] sm:$0xff] }
0x2e69   :  { %9530 = vmatprep.subr.mxu1 %v10326_v3  ;;  %9721 = vmatprep.subr.bf16.mxu0 %v9720_v35  ;;  %v6698_v47 = vld [vmem:[%s12766_s20 + $0x1b0] sm:$0xff] }
0x2e6b   :  { %9723 = vmatpush1.bf16.msra.mxu0 %v9722_v57 }
0x2e6c   :  { %9725 = vmatprep.subr.bf16.mxu0 %v9724_v62  ;;  %v6726_v62 = vld [vmem:[%s12766_s20 + $0x290] sm:$0xff] }
0x2e6d   :  { %v9738_v63 = vpack.c.bf16 %v6726_v62, %v6710_v58 }
0x2e6f   :  { %9727 = vmatpush1.bf16.msra.mxu0 %v9726_v0 }
0x2ebf   :  { %v6170_v1 = vpop.xlane.xlu1 %6169 }
0x2ec0   :  { %10286 = vrcp.f32 %v6170_v1 }
0x2ec3   :  { %v6411_v28 = vpop.xlane.xlu1 %6410 }
0x2ec4   :  { %v6412_v44 = vsub.f32 %v6406_v30, %v6411_v28 }
0x2ec6   :  { %v6413_v22 = vmul.f32 1.442695, %v6412_v44 }
0x2ec8   :  { %10288 = vpow2.f32 %v6413_v22 }
0x2eca   :  { %v10287_v27 = vpop.eup %10286 }
0x2ecb   :  { %v6172_v14 = vmul.f32 %v10287_v27, %v10285_v26 }
0x2ecd   :  { %9528 = vmatmul.mubr.msk.f32.vlgmr.msra.gmra.mrb[82].mxu1 %vm3696_vm3, %v6172_v14 }
0x2ece   :  { %9531 = vmatpush3.msra.mxu1 %v11248_v53  ;;  %9532 = vmatprep.mubr.msk.f32.mxu1 %vm10327_vm5, %v10326_v3 }
0x2ecf   :  { %9712 = vmatprep.subr.bf16.mxu1 %v10333_v8 }
0x2ed2   :  { %v10289_v16 = vpop.eup %10288 }
0x2ed3   :  { %v6415_v17 = vsel %vm3696_vm3, %v10289_v16, 0.0 }
0x2ed4   :  { %6416 = vadd.xlane.f32.xlu1 %v6415_v17 }
0x2ee5   :  { %10176 = vrot.lane.b32.xlu1 %v11079_v6, %s10332_s10 }
0x2eeb   :  { %v6600_v4 = vpop.xlane.xlu0 %6599 }
0x2eec   :  { %v6604_v18 = vmul.f32 0.021276595, %v6600_v4 }
0x2eee   :  { %10290 = vrsqrt.f32 %v6604_v18  ;;  %vm6608_vm7 = vcmp.eq.f32.partialorder %v6604_v18, inf  ;;  %v6611_v21 = vand.u32 2147483648, %v6604_v18  ;;  %vm6610_vm8 = vcmp.eq.f32.partialorder %v6604_v18, 0.0 }
0x2ef8   :  { %v10291_v50 = vpop.eup %10290 }
0x2ef9   :  { %v6607_v19 = vmul.f32 %v10291_v50, %v6604_v18 }
0x2efb   :  { %v6609_v53 = vsel %vm6608_vm7, %v6604_v18, %v6607_v19  ;;  %v6665_v19 = vld [vmem:[%s12766_s20 + $0xa8] sm:$0xff] }
0x2efc   :  { %v6612_v55 = vsel %vm6610_vm8, %v6611_v21, %v6609_v53  ;;  %v6651_v21 = vld [vmem:[%s12766_s20 + $0x38] sm:$0xff] }
0x2efd   :  { %v6620_v23 = vadd.f32 1e-06, %v6612_v55  ;;  %v6667_v55 = vld [vmem:[%s12766_s20 + $0xb8] sm:$0xff] }
0x2eff   :  { %10292 = vrcp.f32 %v6620_v23  ;;  %v6648_v23 = vld [vmem:[%s12766_s20 + $0x20] sm:$0xff] }
0x2f09   :  { %v10293_v8 = vpop.eup %10292 }
0x2f0a   :  { %v6626_v6 = vmul.f32 %v10293_v8, %v11404_v36  ;;  %v6664_v8 = vld [vmem:[%s12766_s20 + $0xa0] sm:$0xff] }
0x2f0c   :  { %v6634_v25 = vmul.f32 %v11465_v9, %v6626_v6  ;;  %v9752_v6 = vpack.c.bf16 %v6667_v55, %v6651_v21  ;;  %v6668_v21 = vld [vmem:[%s12766_s20 + $0xc0] sm:$0xff]  ;;  %v6687_v55 = vld [vmem:[%s12766_s20 + $0x158] sm:$0xff] }
0x2f0e   :  { %v11475_v33 = vadd.f32 %v11471_v24, %v6634_v25  ;;  %v9742_v25 = vpack.c.bf16 %v6664_v8, %v6648_v23  ;;  %v6703_v23 = vld [vmem:[%s12766_s20 + $0x1d8] sm:$0xff] }
0x2f10   :  { %8505 = vmatmul.mubr.msk.f32.vlgmr.msra.gmra.mrb[74].mxu0 %vm89_vm0, %v11475_v33 }
0x2f11   :  { %6900 = vmatprep.mubr.f32.mxu0 %v10326_v3 }
0x2f3a   :  { %v6075_v26 = vpop.f32.mrb[80].mxu1 }
0x2f3b   :  { %v6079_v30 = vadd.f32 %v6075_v26, %v11410_v46  ;;  %v9515_v31 = vpop.f32.mrb[81].mxu1  ;;  %v6650_v26 = vld [vmem:[%s12766_s20 + $0x30] sm:$0xff] }
0x2f61   :  { %v6417_v10 = vpop.xlane.xlu1 %6416 }
0x2f62   :  { %10294 = vrcp.f32 %v6417_v10  ;;  %v6681_v10 = vld [vmem:[%s12766_s20 + $0x128] sm:$0xff] }
0x2f65   :  { %v10177_v12 = vpop.permute.xlu1 %10176 }
0x2f66   :  { %v10179_v32 = vunpack.i.h.bf16 %v10177_v12  ;;  %v10178_v34 = vunpack.i.l.bf16 %v10177_v12  ;;  %v6697_v12 = vld [vmem:[%s12766_s20 + $0x1a8] sm:$0xff] }
0x2f68   :  { %v9713_v42 = vpack.c.bf16 %v10179_v32, %v10178_v34  ;;  %v6683_v32 = vld [vmem:[%s12766_s20 + $0x138] sm:$0xff]  ;;  %v9744_v34 = vpack.c.bf16 %v6697_v12, %v6681_v10  ;;  %v6717_v10 = vld [vmem:[%s12766_s20 + $0x248] sm:$0xff] }
0x2f6c   :  { %v10295_v36 = vpop.eup %10294 }
0x2f6d   :  { %v6419_v13 = vmul.f32 %v10295_v36, %v10289_v16  ;;  %v6699_v36 = vld [vmem:[%s12766_s20 + $0x1b8] sm:$0xff] }
0x2fa0   :  { %v6249_v11 = vpop.f32.mrb[82].mxu1 }
0x2fa1   :  { %v9529_v2 = vpop.f32.mrb[83].mxu1  ;;  %9533 = vmatmul.mubr.msk.f32.vlgmr.msra.gmra.mrb[84].mxu1 %vm409_vm6, %v6249_v11  ;;  %v6696_v11 = vld [vmem:[%s12766_s20 + $0x1a0] sm:$0xff] }
0x2fa2   :  { %9715 = vmatpush3.bf16.msk.msra.mxu1 %vm11057_vm1, %v9713_v42  ;;  %9546 = vmatprep.mubr.msk.f32.mxu1 %vm10327_vm5, %v10326_v3  ;;  %v6680_v42 = vld [vmem:[%s12766_s20 + $0x120] sm:$0xff]  ;;  %v9756_v2 = vpack.c.bf16 %v6699_v36, %v6683_v32  ;;  %v9780_v32 = vpack.c.bf16 %v6703_v23, %v6687_v55  ;;  %v6719_v36 = vld [vmem:[%s12766_s20 + $0x258] sm:$0xff] }
0x2fa3   :  { %9549 = vmatprep.subr.mxu1 %v10326_v3  ;;  %v6736_v55 = vld [vmem:[%s12766_s20 + $0x2e0] sm:$0xff] }
0x2fa5   :  { %9547 = vmatmul.mubr.msk.f32.vlgmr.msra.gmra.mrb[86].mxu1 %vm3696_vm3, %v6419_v13  ;;  %v9746_v13 = vpack.c.bf16 %v6696_v11, %v6680_v42  ;;  %v6735_v42 = vld [vmem:[%s12766_s20 + $0x2d8] sm:$0xff] }
0x2fa6   :  { %9550 = vmatpush3.msra.mxu1 %v11267_v38  ;;  %9551 = vmatprep.mubr.msk.f32.mxu1 %vm10327_vm5, %v10326_v3  ;;  %v6646_v38 = vld [vmem:[%s12766_s20 + $0x10] sm:$0xff] }
0x2fa7   :  { %9729 = vmatprep.subr.bf16.mxu1 %v9728_v48  ;;  %v9730_v51 = vpack.c.bf16 %v6662_v54, %v6646_v38  ;;  %v6713_v48 = vld [vmem:[%s12766_s20 + $0x228] sm:$0xff]  ;;  %v9758_v38 = vpack.c.bf16 %v6698_v47, %v6682_v5  ;;  %v6732_v5 = vld [vmem:[%s12766_s20 + $0x2c0] sm:$0xff] }
0x2fa8   :  { %v6729_v54 = vld [vmem:[%s12766_s20 + $0x2a8] sm:$0xff] }
0x2fa9   :  { %v9748_v39 = vpack.c.bf16 %v6729_v54, %v6713_v48  ;;  %v9784_v48 = vpack.c.bf16 %v6735_v42, %v6719_v36  ;;  %v6734_v54 = vld [vmem:[%s12766_s20 + $0x2d0] sm:$0xff] }
0x2fe3   :  { %v11491_v45 = vpop.f32.mrb[74].mxu0 }
0x2fe4   :  { %v11493_v46 = vpop.f32.mrb[75].mxu0 }
0x3074   :  { %v6322_v41 = vpop.f32.mrb[84].mxu1 }
0x3075   :  { %v6326_v15 = vadd.f32 %v6322_v41, %v6079_v30  ;;  %v9534_v7 = vpop.f32.mrb[85].mxu1  ;;  %v6666_v30 = vld [vmem:[%s12766_s20 + $0xb0] sm:$0xff]  ;;  %v6715_v41 = vld [vmem:[%s12766_s20 + $0x238] sm:$0xff] }
0x3076   :  { %v9754_v31 = vpack.c.bf16 %v6666_v30, %v6650_v26  ;;  %v6712_v7 = vld [vmem:[%s12766_s20 + $0x220] sm:$0xff]  ;;  %v6686_v30 = vld [vmem:[%s12766_s20 + $0x150] sm:$0xff] }
0x3077   :  { %v6700_v26 = vld [vmem:[%s12766_s20 + $0x1c0] sm:$0xff] }
0x3078   :  { %v6496_v35 = vpop.f32.mrb[86].mxu1 }
0x3079   :  { %v9548_v57 = vpop.f32.mrb[87].mxu1  ;;  %9552 = vmatmul.mubr.msk.f32.vlgmr.msra.gmra.mrb[88].mxu1 %vm409_vm6, %v6496_v35 }
0x307a   :  { %9731 = vmatpush1.bf16.msra.mxu1 %v9730_v51  ;;  %6971 = vmatprep.mubr.f32.mxu1 %v10326_v3  ;;  %v6728_v51 = vld [vmem:[%s12766_s20 + $0x2a0] sm:$0xff]  ;;  %v6655_v57 = vld [vmem:[%s12766_s20 + $0x58] sm:$0xff] }
0x307b   :  { %9733 = vmatprep.subr.bf16.mxu1 %v9732_v61  ;;  %v6714_v61 = vld [vmem:[%s12766_s20 + $0x230] sm:$0xff]  ;;  %v9750_v52 = vpack.c.bf16 %v6728_v51, %v6712_v7 }
0x307c   :  { %v9762_v35 = vpack.c.bf16 %v6730_v40, %v6714_v61  ;;  %v6656_v61 = vld [vmem:[%s12766_s20 + $0x60] sm:$0xff] }
0x307e   :  { %9735 = vmatpush1.bf16.msra.mxu1 %v9734_v59  ;;  %v9764_v59 = vpack.c.bf16 %v6669_v43, %v6653_v56  ;;  %v6658_v56 = vld [vmem:[%s12766_s20 + $0x70] sm:$0xff] }
0x307f   :  { %9737 = vmatprep.subr.bf16.mxu1 %v9736_v60  ;;  %v6671_v60 = vld [vmem:[%s12766_s20 + $0xd8] sm:$0xff]  ;;  %v6674_v43 = vld [vmem:[%s12766_s20 + $0xf0] sm:$0xff] }
0x3080   :  { %v9776_v58 = vpack.c.bf16 %v6671_v60, %v6655_v57  ;;  %v6744_v57 = vlaneseq  ;;  %v6705_v60 = vld [vmem:[%s12766_s20 + $0x1e8] sm:$0xff] }
0x3082   :  { %9739 = vmatpush1.bf16.msra.mxu1 %v9738_v63 }
0x3083   :  { %9753 = vmatprep.subr.bf16.mxu1 %v9752_v6 }
0x3085   :  { %8507 = vmatmul.mubr.msk.f32.vlgmr.msra.gmra.mrb[90].mxu1 %vm89_vm0, %v11475_v33 }
0x3086   :  { %6977 = vmatprep.mubr.f32.mxu1 %v10326_v3  ;;  %9755 = vmatpush1.bf16.msra.mxu1 %v9754_v31  ;;  %v6702_v31 = vld [vmem:[%s12766_s20 + $0x1d0] sm:$0xff] }
0x3087   :  { %9757 = vmatprep.subr.bf16.mxu1 %v9756_v2  ;;  %v9782_v2 = vpack.c.bf16 %v6702_v31, %v6686_v30  ;;  %v7495_v31 = vld [vmem:[%s12768_s22 + $0x88] sm:$0xff] }
0x308a   :  { %9759 = vmatpush1.bf16.msra.mxu1 %v9758_v38  ;;  %v6718_v38 = vld [vmem:[%s12766_s20 + $0x250] sm:$0xff] }
0x308b   :  { %v9786_v51 = vpack.c.bf16 %v6734_v54, %v6718_v38  ;;  %v7496_v54 = vld [vmem:[%s12768_s22 + $0x90] sm:$0xff] }
0x314c   :  { %v6569_v0 = vpop.f32.mrb[88].mxu1 }
0x314d   :  { %v6573_v1 = vadd.f32 %v6569_v0, %v6326_v15  ;;  %v9553_v28 = vpop.f32.mrb[89].mxu1  ;;  %v9760_v15 = vpack.c.bf16 %v6731_v49, %v6715_v41  ;;  %v6657_v41 = vld [vmem:[%s12766_s20 + $0x68] sm:$0xff] }
0x314e   :  { %v6673_v49 = vld [vmem:[%s12766_s20 + $0xe8] sm:$0xff] }
0x314f   :  { %v6581_v44 = vadd.f32 %v11391_v20, %v6573_v1  ;;  %9761 = vmatprep.subr.bf16.mxu1 %v9760_v15  ;;  %v6675_v15 = vld [vmem:[%s12766_s20 + $0xf8] sm:$0xff] }
0x3150   :  { %9763 = vmatpush1.bf16.msra.mxu1 %v9762_v35  ;;  %v6672_v35 = vld [vmem:[%s12766_s20 + $0xe0] sm:$0xff] }
0x3151   :  { %v11538_v22 = vadd.f32 %v6581_v44, %v10895_v29  ;;  %v6649_v29 = vld [vmem:[%s12766_s20 + $0x28] sm:$0xff]  ;;  %9777 = vmatprep.subr.bf16.mxu1 %v9776_v58  ;;  %v6691_v58 = vld [vmem:[%s12766_s20 + $0x178] sm:$0xff] }
0x3152   :  { %v9740_v53 = vpack.c.bf16 %v6665_v19, %v6649_v29  ;;  %v6652_v29 = vld [vmem:[%s12766_s20 + $0x40] sm:$0xff] }
0x3153   :  { %v6589_v27 = vsel %vm89_vm0, %v11538_v22, 0.0  ;;  %v9766_v8 = vpack.c.bf16 %v6668_v21, %v6652_v29  ;;  %v6737_v29 = vld [vmem:[%s12766_s20 + $0x2e8] sm:$0xff]  ;;  %v6723_v21 = vld [vmem:[%s12766_s20 + $0x278] sm:$0xff] }
0x3154   :  { %6590 = vadd.xlane.f32.xlu1 %v6589_v27  ;;  %9741 = vmatprep.subr.bf16.mxu0 %v9740_v53  ;;  %v6654_v53 = vld [vmem:[%s12766_s20 + $0x50] sm:$0xff] }
0x3155   :  { %9743 = vmatpush1.bf16.msra.mxu0 %v9742_v25  ;;  %v6684_v25 = vld [vmem:[%s12766_s20 + $0x140] sm:$0xff] }
0x3156   :  { %9745 = vmatprep.subr.bf16.mxu0 %v9744_v34  ;;  %v6733_v34 = vld [vmem:[%s12766_s20 + $0x2c8] sm:$0xff]  ;;  %v9770_v11 = vpack.c.bf16 %v6700_v26, %v6684_v25  ;;  %v6738_v25 = vld [vmem:[%s12766_s20 + $0x2f0] sm:$0xff]  ;;  %v7494_v26 = vld [vmem:[%s12768_s22 + $0x80] sm:$0xff] }
0x3157   :  { %v9772_v47 = vpack.c.bf16 %v6733_v34, %v6717_v10  ;;  %v7526_v10 = vld [vmem:[%s12768_s22 + $0x180] sm:$0xff] }
0x3158   :  { %v11542_v14 = vpop.f32.mrb[90].mxu1 }
0x3159   :  { %v11544_v16 = vpop.f32.mrb[91].mxu1  ;;  %9747 = vmatpush1.bf16.msra.mxu0 %v9746_v13  ;;  %v6716_v13 = vld [vmem:[%s12766_s20 + $0x240] sm:$0xff] }
0x315a   :  { %9749 = vmatprep.subr.bf16.mxu0 %v9748_v39  ;;  %v6659_v39 = vld [vmem:[%s12766_s20 + $0x78] sm:$0xff]  ;;  %v9774_v7 = vpack.c.bf16 %v6732_v5, %v6716_v13  ;;  %v7479_v5 = vld [vmem:[%s12768_s22 + $0x8] sm:$0xff] }
0x315b   :  { %v9800_v40 = vpack.c.bf16 %v6675_v15, %v6659_v39  ;;  %v7528_v39 = vld [vmem:[%s12768_s22 + $0x190] sm:$0xff]  ;;  %v7529_v15 = vld [vmem:[%s12768_s22 + $0x198] sm:$0xff] }
0x315d   :  { %9751 = vmatpush1.bf16.msra.mxu0 %v9750_v52  ;;  %v9788_v52 = vpack.c.bf16 %v6673_v49, %v6657_v41  ;;  %v7497_v49 = vld [vmem:[%s12768_s22 + $0x98] sm:$0xff] }
0x315e   :  { %9765 = vmatprep.subr.bf16.mxu0 %v9764_v59  ;;  %v6689_v59 = vld [vmem:[%s12766_s20 + $0x168] sm:$0xff] }
0x31e1   :  { %v6591_v17 = vpop.xlane.xlu1 %6590 }
0x31e2   :  { %v6593_v4 = vmul.f32 0.020833334, %v6591_v17 }
0x31e4   :  { %v11547_v18 = vsub.f32 %v11538_v22, %v6593_v4 }
0x31e6   :  { %v6597_v50 = vmul.f32 %v11547_v18, %v11547_v18 }
0x31e8   :  { %v6601_v20 = vsel %vm89_vm0, %v6597_v50, 0.0 }
0x31e9   :  { %6602 = vadd.xlane.f32.xlu0 %v6601_v20 }
0x3276   :  { %v6603_v62 = vpop.xlane.xlu0 %6602 }
0x3277   :  { %v6605_v63 = vmul.f32 0.021276595, %v6603_v62  ;;  %v6707_v62 = vld [vmem:[%s12766_s20 + $0x1f8] sm:$0xff] }
0x3279   :  { %10296 = vrsqrt.f32 %v6605_v63  ;;  %vm6615_vm5 = vcmp.eq.f32.partialorder %v6605_v63, inf  ;;  %v6618_v28 = vand.u32 2147483648, %v6605_v63  ;;  %vm6617_vm6 = vcmp.eq.f32.partialorder %v6605_v63, 0.0 }
0x3283   :  { %v10297_v0 = vpop.eup %10296 }
0x3284   :  { %v6614_v1 = vmul.f32 %v10297_v0, %v6605_v63  ;;  %v9802_v0 = vpack.c.bf16 %v6674_v43, %v6658_v56  ;;  %v9848_v56 = vpack.c.bf16 %v7529_v15, %v7528_v39  ;;  %v7512_v43 = vld [vmem:[%s12768_s22 + $0x110] sm:$0xff] }
0x3286   :  { %v6616_v44 = vsel %vm6615_vm5, %v6605_v63, %v6614_v1  ;;  %v9790_v63 = vpack.c.bf16 %v6672_v35, %v6656_v61  ;;  %v6688_v1 = vld [vmem:[%s12766_s20 + $0x160] sm:$0xff]  ;;  %v7480_v61 = vld [vmem:[%s12768_s22 + $0x10] sm:$0xff]  ;;  %v9816_v35 = vpack.c.bf16 %v7497_v49, %v7496_v54  ;;  %v7537_v49 = vld [vmem:[%s12768_s22 + $0x1d8] sm:$0xff] }
0x3287   :  { %v6619_v27 = vsel %vm6617_vm6, %v6618_v28, %v6616_v44  ;;  %v6704_v28 = vld [vmem:[%s12766_s20 + $0x1e0] sm:$0xff]  ;;  %v6690_v44 = vld [vmem:[%s12766_s20 + $0x170] sm:$0xff] }
0x3288   :  { %v6621_v17 = vadd.f32 1e-06, %v6619_v27  ;;  %v6706_v27 = vld [vmem:[%s12766_s20 + $0x1f0] sm:$0xff] }
0x3289   :  { %v7536_v54 = vld [vmem:[%s12768_s22 + $0x1d0] sm:$0xff] }
0x328a   :  { %10298 = vrcp.f32 %v6621_v17  ;;  %v6721_v17 = vld [vmem:[%s12766_s20 + $0x268] sm:$0xff] }
0x328b   :  { %v9796_v23 = vpack.c.bf16 %v6737_v29, %v6721_v17  ;;  %v7500_v17 = vld [vmem:[%s12768_s22 + $0xb0] sm:$0xff] }
0x328c   :  { %v7532_v29 = vld [vmem:[%s12768_s22 + $0x1b0] sm:$0xff] }
0x3294   :  { %v10299_v4 = vpop.eup %10298 }
0x3295   :  { %v6627_v50 = vmul.f32 %v10299_v4, %v11547_v18  ;;  %v6670_v18 = vld [vmem:[%s12766_s20 + $0xd0] sm:$0xff]  ;;  %v11770_v4 = vshrl.u32 %v6744_v57, 7  ;;  %v7513_v57 = vld [vmem:[%s12768_s22 + $0x118] sm:$0xff] }
0x3296   :  { %v9778_v6 = vpack.c.bf16 %v6670_v18, %v6654_v53  ;;  %v6739_v53 = vld [vmem:[%s12766_s20 + $0x2f8] sm:$0xff]  ;;  %v9794_v18 = vpack.c.bf16 %v6704_v28, %v6688_v1  ;;  %v7514_v1 = vld [vmem:[%s12768_s22 + $0x120] sm:$0xff] }
0x3297   :  { %v6635_v20 = vmul.f32 %v11465_v9, %v6627_v50  ;;  %v6685_v9 = vld [vmem:[%s12766_s20 + $0x148] sm:$0xff]  ;;  %v9792_v50 = vpack.c.bf16 %v6705_v60, %v6689_v59  ;;  %v6750_v30 = vsub.s32 1, %v11770_v4  ;;  %v6758_v34 = vsub.s32 3, %v11770_v4  ;;  %v7498_v59 = vld [vmem:[%s12768_s22 + $0xa0] sm:$0xff] }
0x3299   :  { %v11642_v19 = vadd.f32 %v11471_v24, %v6635_v20  ;;  %v6701_v24 = vld [vmem:[%s12766_s20 + $0x1c8] sm:$0xff]  ;;  %v9804_v20 = vpack.c.bf16 %v6707_v62, %v6691_v58  ;;  %v7530_v58 = vld [vmem:[%s12768_s22 + $0x1a0] sm:$0xff] }
0x329a   :  { %v9768_v12 = vpack.c.bf16 %v6701_v24, %v6685_v9  ;;  %v9806_v9 = vpack.c.bf16 %v6706_v27, %v6690_v44  ;;  %v6720_v24 = vld [vmem:[%s12766_s20 + $0x260] sm:$0xff]  ;;  %v7531_v62 = vld [vmem:[%s12768_s22 + $0x1a8] sm:$0xff] }
0x329b   :  { %8506 = vmatmul.mubr.msk.f32.gmra.mrb[76].mxu0 %vm89_vm0, %v11642_v19  ;;  %8508 = vmatmul.mubr.msk.f32.gmra.mrb[92].mxu1 %vm89_vm0, %v11642_v19  ;;  %v9798_v36 = vpack.c.bf16 %v6736_v55, %v6720_v24  ;;  %v9852_v27 = vpack.c.bf16 %v7531_v62, %v7530_v58  ;;  %v7484_v24 = vld [vmem:[%s12768_s22 + $0x30] sm:$0xff] }
0x329c   :  { %7048 = vmatprep.mubr.f32.mxu0 %v10326_v3  ;;  %7125 = vmatprep.mubr.f32.mxu1 %v10326_v3  ;;  %v7516_v55 = vld [vmem:[%s12768_s22 + $0x130] sm:$0xff] }
0x329f   :  { %8509 = vmatmul.mubr.msk.f32.vlgmr.msra.gmra.mrb[78].mxu0 %vm89_vm0, %v11475_v33  ;;  %8511 = vmatmul.mubr.msk.f32.vlgmr.msra.gmra.mrb[94].mxu1 %vm89_vm0, %v11475_v33 }
0x32a0   :  { %9767 = vmatpush1.bf16.msra.mxu0 %v9766_v8  ;;  %9779 = vmatpush1.bf16.msra.mxu1 %v9778_v6  ;;  %v9808_v8 = vpack.c.bf16 %v6739_v53, %v6723_v21  ;;  %v6722_v6 = vld [vmem:[%s12766_s20 + $0x270] sm:$0xff]  ;;  %v7533_v21 = vld [vmem:[%s12768_s22 + $0x1b8] sm:$0xff] }
0x32a1   :  { %7054 = vmatprep.mubr.f32.mxu0 %v10326_v3  ;;  %7131 = vmatprep.mubr.f32.mxu1 %v10326_v3  ;;  %v9810_v42 = vpack.c.bf16 %v6738_v25, %v6722_v6  ;;  %v7502_v6 = vld [vmem:[%s12768_s22 + $0xc0] sm:$0xff]  ;;  %v7503_v25 = vld [vmem:[%s12768_s22 + $0xc8] sm:$0xff] }
0x32a2   :  { %9769 = vmatprep.subr.bf16.mxu0 %v9768_v12  ;;  %9781 = vmatprep.subr.bf16.mxu1 %v9780_v32  ;;  %v7527_v12 = vld [vmem:[%s12768_s22 + $0x188] sm:$0xff]  ;;  %v11815_v32 = vld [vmem:[%s12767_s21] sm:$0xff] }
0x32a3   :  { %8510 = vmatmul.mubr.msk.f32.gmra.mrb[80].mxu0 %vm89_vm0, %v11642_v19  ;;  %8512 = vmatmul.mubr.msk.f32.gmra.mrb[96].mxu1 %vm89_vm0, %v11642_v19  ;;  %v9844_v13 = vpack.c.bf16 %v7527_v12, %v7526_v10  ;;  %v11837_v38 = vrot.slane %v11815_v32, %v6750_v30  ;;  %v11847_v41 = vrot.slane %v11815_v32, %v6758_v34 }
0x32a4   :  { %9771 = vmatpush1.bf16.msra.mxu0 %v9770_v11  ;;  %9783 = vmatpush1.bf16.msra.mxu1 %v9782_v2  ;;  %v7478_v11 = vld [vmem:[%s12768_s22] sm:$0xff]  ;;  %v9812_v2 = vpack.c.bf16 %v7495_v31, %v7494_v26  ;;  %v7535_v31 = vld [vmem:[%s12768_s22 + $0x1c8] sm:$0xff] }
0x32a5   :  { %9773 = vmatprep.subr.bf16.mxu0 %v9772_v47  ;;  %9785 = vmatprep.subr.bf16.mxu1 %v9784_v48  ;;  %v7510_v47 = vld [vmem:[%s12768_s22 + $0x100] sm:$0xff]  ;;  %v7511_v48 = vld [vmem:[%s12768_s22 + $0x108] sm:$0xff]  ;;  %v6976_v60 = vadd.f32 %v11544_v16, %v11847_v41 }
0x32a6   :  { %7202 = vmatprep.mubr.f32.mxu0 %v10326_v3  ;;  %7279 = vmatprep.mubr.f32.mxu1 %v10326_v3  ;;  %v7534_v26 = vld [vmem:[%s12768_s22 + $0x1c0] sm:$0xff] }
0x32a8   :  { %9775 = vmatpush1.bf16.msra.mxu0 %v9774_v7  ;;  %9787 = vmatpush1.bf16.msra.mxu1 %v9786_v51  ;;  %v9814_v7 = vpack.c.bf16 %v7479_v5, %v7478_v11  ;;  %v9846_v51 = vpack.c.bf16 %v7511_v48, %v7510_v47  ;;  %v7487_v11 = vld [vmem:[%s12768_s22 + $0x48] sm:$0xff]  ;;  %v7504_v47 = vld [vmem:[%s12768_s22 + $0xd0] sm:$0xff]  ;;  %v7505_v48 = vld [vmem:[%s12768_s22 + $0xd8] sm:$0xff] }
0x32a9   :  { %9789 = vmatprep.subr.bf16.mxu0 %v9788_v52  ;;  %9801 = vmatprep.subr.bf16.mxu1 %v9800_v40  ;;  %v7481_v52 = vld [vmem:[%s12768_s22 + $0x18] sm:$0xff]  ;;  %v6899_v40 = vadd.f32 %v11493_v46, %v11837_v38  ;;  %v7499_v46 = vld [vmem:[%s12768_s22 + $0xa8] sm:$0xff] }
0x32aa   :  { %v9818_v16 = vpack.c.bf16 %v7481_v52, %v7480_v61  ;;  %v9820_v44 = vpack.c.bf16 %v7499_v46, %v7498_v59  ;;  %v7519_v5 = vld [vmem:[%s12768_s22 + $0x148] sm:$0xff]  ;;  %v7489_v61 = vld [vmem:[%s12768_s22 + $0x58] sm:$0xff]  ;;  %v7520_v52 = vld [vmem:[%s12768_s22 + $0x150] sm:$0xff]  ;;  %v6746_v46 = vsub.s32 0, %v11770_v4 }
0x32ab   :  { %8513 = vmatmul.mubr.msk.f32.vlgmr.msra.gmra.mrb[82].mxu0 %vm89_vm0, %v11475_v33  ;;  %8515 = vmatmul.mubr.msk.f32.vlgmr.msra.gmra.mrb[98].mxu1 %vm89_vm0, %v11475_v33  ;;  %v7447_v28 = vmax.f32 %v6899_v40, 0.0  ;;  %v9864_v40 = vpack.c.bf16 %v7537_v49, %v7536_v54  ;;  %v7539_v59 = vld [vmem:[%s12768_s22 + $0x1e8] sm:$0xff] }
0x32ac   :  { %9791 = vmatpush1.bf16.msra.mxu0 %v9790_v63  ;;  %9803 = vmatpush1.bf16.msra.mxu1 %v9802_v0  ;;  %v7482_v63 = vld [vmem:[%s12768_s22 + $0x20] sm:$0xff]  ;;  %v7483_v0 = vld [vmem:[%s12768_s22 + $0x28] sm:$0xff] }
0x32ad   :  { %7208 = vmatprep.mubr.f32.mxu0 %v10326_v3  ;;  %7285 = vmatprep.mubr.f32.mxu1 %v10326_v3  ;;  %v9822_v53 = vpack.c.bf16 %v7483_v0, %v7482_v63  ;;  %v7522_v63 = vld [vmem:[%s12768_s22 + $0x160] sm:$0xff]  ;;  %v6754_v0 = vsub.s32 2, %v11770_v4 }
0x32ae   :  { %9793 = vmatprep.subr.bf16.mxu0 %v9792_v50  ;;  %9805 = vmatprep.subr.bf16.mxu1 %v9804_v20  ;;  %v7501_v50 = vld [vmem:[%s12768_s22 + $0xb8] sm:$0xff]  ;;  %v7449_v20 = vmax.f32 %v6976_v60, 0.0 }
0x32af   :  { %8514 = vmatmul.mubr.msk.f32.gmra.mrb[84].mxu0 %vm89_vm0, %v11642_v19  ;;  %8516 = vmatmul.mubr.msk.f32.gmra.mrb[100].mxu1 %vm89_vm0, %v11642_v19 }
0x32b0   :  { %9795 = vmatpush1.bf16.msra.mxu0 %v9794_v18  ;;  %9807 = vmatpush1.bf16.msra.mxu1 %v9806_v9  ;;  %v9824_v9 = vpack.c.bf16 %v7501_v50, %v7500_v17  ;;  %v7541_v17 = vld [vmem:[%s12768_s22 + $0x1f8] sm:$0xff] }
0x32b1   :  { %9797 = vmatprep.subr.bf16.mxu0 %v9796_v23  ;;  %9809 = vmatprep.subr.bf16.mxu1 %v9808_v8  ;;  %v9856_v23 = vpack.c.bf16 %v7533_v21, %v7532_v29  ;;  %v7517_v8 = vld [vmem:[%s12768_s22 + $0x138] sm:$0xff] }
0x32b2   :  { %7356 = vmatprep.mubr.f32.mxu0 %v10326_v3  ;;  %7433 = vmatprep.mubr.f32.mxu1 %v10326_v3  ;;  %v9858_v12 = vpack.c.bf16 %v7517_v8, %v7516_v55  ;;  %v7525_v55 = vld [vmem:[%s12768_s22 + $0x178] sm:$0xff]  ;;  %v7559_v8 = vld [vmem:[%s12768_s22 + $0x288] sm:$0xff] }
0x32b4   :  { %9799 = vmatpush1.bf16.msra.mxu0 %v9798_v36  ;;  %9811 = vmatpush1.bf16.msra.mxu1 %v9810_v42  ;;  %v9828_v36 = vpack.c.bf16 %v7503_v25, %v7502_v6  ;;  %v7486_v42 = vld [vmem:[%s12768_s22 + $0x40] sm:$0xff]  ;;  %v7591_v25 = vld [vmem:[%s12768_s22 + $0x388] sm:$0xff] }
0x32b5   :  { %9813 = vmatprep.subr.bf16.mxu0 %v9812_v2  ;;  %9845 = vmatprep.subr.bf16.mxu1 %v9844_v13  ;;  %v7518_v2 = vld [vmem:[%s12768_s22 + $0x140] sm:$0xff]  ;;  %v9860_v13 = vpack.c.bf16 %v7535_v31, %v7534_v26  ;;  %v9830_v39 = vpack.c.bf16 %v7487_v11, %v7486_v42  ;;  %v7543_v42 = vld [vmem:[%s12768_s22 + $0x208] sm:$0xff] }
0x32b6   :  { %v9862_v15 = vpack.c.bf16 %v7519_v5, %v7518_v2  ;;  %v7590_v6 = vld [vmem:[%s12768_s22 + $0x380] sm:$0xff]  ;;  %v7560_v5 = vld [vmem:[%s12768_s22 + $0x290] sm:$0xff] }
0x32b7   :  { %8517 = vmatmul.mubr.msk.f32.vlgmr.msra.gmra.mrb[86].mxu0 %vm89_vm0, %v11475_v33  ;;  %8519 = vmatmul.mubr.msk.f32.vlgmr.msra.gmra.mrb[102].mxu1 %vm89_vm0, %v11475_v33  ;;  %v9850_v33 = vpack.c.bf16 %v7513_v57, %v7512_v43  ;;  %v7507_v43 = vld [vmem:[%s12768_s22 + $0xe8] sm:$0xff]  ;;  %v7538_v57 = vld [vmem:[%s12768_s22 + $0x1e0] sm:$0xff] }
0x32b8   :  { %9815 = vmatpush3.bf16.msra.mxu0 %v9814_v7  ;;  %9847 = vmatpush3.bf16.msra.mxu1 %v9846_v51  ;;  %v9832_v7 = vpack.c.bf16 %v7505_v48, %v7504_v47  ;;  %v7488_v51 = vld [vmem:[%s12768_s22 + $0x50] sm:$0xff]  ;;  %v7574_v11 = vld [vmem:[%s12768_s22 + $0x300] sm:$0xff]  ;;  %v7561_v47 = vld [vmem:[%s12768_s22 + $0x298] sm:$0xff] }
0x32b9   :  { %7362 = vmatprep.mubr.f32.mxu0 %v10326_v3  ;;  %7439 = vmatprep.mubr.f32.mxu1 %v10326_v3  ;;  %v7515_v3 = vld [vmem:[%s12768_s22 + $0x128] sm:$0xff]  ;;  %v9834_v60 = vpack.c.bf16 %v7489_v61, %v7488_v51  ;;  %v7592_v48 = vld [vmem:[%s12768_s22 + $0x390] sm:$0xff]  ;;  %v7545_v51 = vld [vmem:[%s12768_s22 + $0x218] sm:$0xff] }
0x32ba   :  { %9817 = vmatprep.subr.bf16.mxu0 %v9816_v35  ;;  %9849 = vmatprep.subr.bf16.mxu1 %v9848_v56  ;;  %v9854_v18 = vpack.c.bf16 %v7515_v3, %v7514_v1  ;;  %v7521_v35 = vld [vmem:[%s12768_s22 + $0x158] sm:$0xff]  ;;  %v7506_v56 = vld [vmem:[%s12768_s22 + $0xe0] sm:$0xff]  ;;  %v9868_v1 = vpack.c.bf16 %v7539_v59, %v7538_v57  ;;  %v7540_v3 = vld [vmem:[%s12768_s22 + $0x1f0] sm:$0xff] }
0x32bb   :  { %8518 = vmatmul.mubr.msk.f32.gmra.mrb[88].mxu0 %vm89_vm0, %v11642_v19  ;;  %8520 = vmatmul.mubr.msk.f32.gmra.mrb[104].mxu1 %vm89_vm0, %v11642_v19  ;;  %v7485_v19 = vld [vmem:[%s12768_s22 + $0x38] sm:$0xff]  ;;  %v9866_v58 = vpack.c.bf16 %v7521_v35, %v7520_v52  ;;  %v9836_v62 = vpack.c.bf16 %v7507_v43, %v7506_v56  ;;  %v7576_v61 = vld [vmem:[%s12768_s22 + $0x310] sm:$0xff]  ;;  %v7562_v56 = vld [vmem:[%s12768_s22 + $0x2a0] sm:$0xff] }
0x32bc   :  { %9819 = vmatpush3.bf16.msra.mxu0 %v9818_v16  ;;  %7798 = vmatprep.mubr.f32.mxu0 %v7447_v28  ;;  %v9826_v10 = vpack.c.bf16 %v7485_v19, %v7484_v24  ;;  %v7490_v16 = vld [vmem:[%s12768_s22 + $0x60] sm:$0xff]  ;;  %v7523_v28 = vld [vmem:[%s12768_s22 + $0x168] sm:$0xff]  ;;  %v12035_v24 = vrot.slane %v11815_v32, %v6754_v0  ;;  %v9872_v19 = vpack.c.bf16 %v7541_v17, %v7540_v3  ;;  %v7577_v35 = vld [vmem:[%s12768_s22 + $0x318] sm:$0xff] }
0x32bd   :  { %9851 = vmatpush3.bf16.msra.mxu1 %v9850_v33  ;;  %7873 = vmatprep.mubr.f32.mxu1 %v7449_v20  ;;  %v7491_v33 = vld [vmem:[%s12768_s22 + $0x68] sm:$0xff]  ;;  %v12021_v20 = vrot.slane %v11815_v32, %v6746_v46  ;;  %v9870_v29 = vpack.c.bf16 %v7523_v28, %v7522_v63  ;;  %v7594_v57 = vld [vmem:[%s12768_s22 + $0x3a0] sm:$0xff]  ;;  %v7596_v3 = vld [vmem:[%s12768_s22 + $0x3b0] sm:$0xff] }
0x32be   :  { %9821 = vmatprep.subr.bf16.mxu0 %v9820_v44  ;;  %9853 = vmatprep.subr.bf16.mxu1 %v9852_v27  ;;  %v7508_v44 = vld [vmem:[%s12768_s22 + $0xf0] sm:$0xff]  ;;  %v7509_v27 = vld [vmem:[%s12768_s22 + $0xf8] sm:$0xff]  ;;  %v9838_v50 = vpack.c.bf16 %v7491_v33, %v7490_v16  ;;  %v6974_v2 = vadd.f32 %v11542_v14, %v12035_v24  ;;  %v7563_v43 = vld [vmem:[%s12768_s22 + $0x2a8] sm:$0xff] }
0x32bf   :  { %v9840_v21 = vpack.c.bf16 %v7509_v27, %v7508_v44  ;;  %v6897_v31 = vadd.f32 %v11491_v45, %v12021_v20  ;;  %v9908_v45 = vpack.c.bf16 %v7591_v25, %v7590_v6  ;;  %v7593_v14 = vld [vmem:[%s12768_s22 + $0x398] sm:$0xff]  ;;  %v7595_v59 = vld [vmem:[%s12768_s22 + $0x3a8] sm:$0xff]  ;;  %v7546_v16 = vld [vmem:[%s12768_s22 + $0x220] sm:$0xff] }
0x32c0   :  { %9823 = vmatpush3.bf16.msra.mxu0 %v9822_v53  ;;  %v7492_v53 = vld [vmem:[%s12768_s22 + $0x70] sm:$0xff]  ;;  %v7448_v52 = vmax.f32 %v6974_v2, 0.0  ;;  %v7547_v33 = vld [vmem:[%s12768_s22 + $0x228] sm:$0xff]  ;;  %v7578_v63 = vld [vmem:[%s12768_s22 + $0x320] sm:$0xff] }
0x32c1   :  { %9855 = vmatpush3.bf16.msra.mxu1 %v9854_v18  ;;  %9825 = vmatprep.subr.bf16.mxu0 %v9824_v9  ;;  %v7493_v18 = vld [vmem:[%s12768_s22 + $0x78] sm:$0xff]  ;;  %v7524_v9 = vld [vmem:[%s12768_s22 + $0x170] sm:$0xff]  ;;  %v7446_v49 = vmax.f32 %v6897_v31, 0.0  ;;  %v7579_v28 = vld [vmem:[%s12768_s22 + $0x328] sm:$0xff] }
0x32c2   :  { %9857 = vmatprep.subr.bf16.mxu1 %v9856_v23  ;;  %v7558_v23 = vld [vmem:[%s12768_s22 + $0x280] sm:$0xff]  ;;  %v9842_v26 = vpack.c.bf16 %v7493_v18, %v7492_v53  ;;  %v7564_v44 = vld [vmem:[%s12768_s22 + $0x2b0] sm:$0xff]  ;;  %v7565_v27 = vld [vmem:[%s12768_s22 + $0x2b8] sm:$0xff] }
0x32c3   :  { %v7597_v17 = vld [vmem:[%s12768_s22 + $0x3b8] sm:$0xff]  ;;  %v7548_v53 = vld [vmem:[%s12768_s22 + $0x230] sm:$0xff]  ;;  %v7598_v6 = vld [vmem:[%s12768_s22 + $0x3c0] sm:$0xff] }
0x32c4   :  { %9827 = vmatpush3.bf16.msra.mxu0 %v9826_v10  ;;  %v9874_v10 = vpack.c.bf16 %v7525_v55, %v7524_v9  ;;  %v7549_v18 = vld [vmem:[%s12768_s22 + $0x238] sm:$0xff]  ;;  %v7580_v9 = vld [vmem:[%s12768_s22 + $0x330] sm:$0xff]  ;;  %v7599_v25 = vld [vmem:[%s12768_s22 + $0x3c8] sm:$0xff] }
0x32c5   :  { %9859 = vmatpush3.bf16.msra.mxu1 %v9858_v12  ;;  %9829 = vmatprep.subr.bf16.mxu0 %v9828_v36  ;;  %v9876_v12 = vpack.c.bf16 %v7559_v8, %v7558_v23  ;;  %v7542_v36 = vld [vmem:[%s12768_s22 + $0x200] sm:$0xff]  ;;  %v7581_v55 = vld [vmem:[%s12768_s22 + $0x338] sm:$0xff]  ;;  %v7567_v8 = vld [vmem:[%s12768_s22 + $0x2c8] sm:$0xff] }
0x32c6   :  { %9861 = vmatprep.subr.bf16.mxu1 %v9860_v13  ;;  %v7575_v13 = vld [vmem:[%s12768_s22 + $0x308] sm:$0xff]  ;;  %v9878_v54 = vpack.c.bf16 %v7543_v42, %v7542_v36  ;;  %v7566_v23 = vld [vmem:[%s12768_s22 + $0x2c0] sm:$0xff]  ;;  %v9922_v31 = vpack.c.bf16 %v7581_v55, %v7580_v9 }
0x32c7   :  { %v7551_v36 = vld [vmem:[%s12768_s22 + $0x248] sm:$0xff]  ;;  %v7582_v42 = vld [vmem:[%s12768_s22 + $0x340] sm:$0xff] }
0x32c8   :  { %9831 = vmatpush3.bf16.msra.mxu0 %v9830_v39  ;;  %v9910_v39 = vpack.c.bf16 %v7575_v13, %v7574_v11  ;;  %v9924_v11 = vpack.c.bf16 %v7599_v25, %v7598_v6  ;;  %v7583_v2 = vld [vmem:[%s12768_s22 + $0x348] sm:$0xff]  ;;  %v7569_v13 = vld [vmem:[%s12768_s22 + $0x2d8] sm:$0xff] }
0x32c9   :  { %9863 = vmatpush3.bf16.msra.mxu1 %v9862_v15  ;;  %9833 = vmatprep.subr.bf16.mxu0 %v9832_v7  ;;  %v9880_v15 = vpack.c.bf16 %v7561_v47, %v7560_v5  ;;  %v7544_v7 = vld [vmem:[%s12768_s22 + $0x210] sm:$0xff]  ;;  %v7601_v47 = vld [vmem:[%s12768_s22 + $0x3d8] sm:$0xff]  ;;  %v7623_v55 = vld [vmem:[%s12768_s22 + $0x488] sm:$0xff] }
0x32ca   :  { %9865 = vmatprep.subr.bf16.mxu1 %v9864_v40  ;;  %v9912_v40 = vpack.c.bf16 %v7593_v14, %v7592_v48  ;;  %v7600_v5 = vld [vmem:[%s12768_s22 + $0x3d0] sm:$0xff]  ;;  %v9926_v14 = vpack.c.bf16 %v7583_v2, %v7582_v42  ;;  %v7655_v6 = vld [vmem:[%s12768_s22 + $0x588] sm:$0xff] }
0x32cc   :  { %9835 = vmatpush3.bf16.msra.mxu0 %v9834_v60  ;;  %v9882_v60 = vpack.c.bf16 %v7545_v51, %v7544_v7  ;;  %v7584_v7 = vld [vmem:[%s12768_s22 + $0x350] sm:$0xff]  ;;  %v7585_v51 = vld [vmem:[%s12768_s22 + $0x358] sm:$0xff] }
0x32cd   :  { %9867 = vmatpush3.bf16.msra.mxu1 %v9866_v58  ;;  %9837 = vmatprep.subr.bf16.mxu0 %v9836_v62  ;;  %v9914_v58 = vpack.c.bf16 %v7577_v35, %v7576_v61  ;;  %v9884_v62 = vpack.c.bf16 %v7563_v43, %v7562_v56  ;;  %v7571_v35 = vld [vmem:[%s12768_s22 + $0x2e8] sm:$0xff]  ;;  %v7602_v56 = vld [vmem:[%s12768_s22 + $0x3e0] sm:$0xff] }
0x32ce   :  { %9869 = vmatprep.subr.bf16.mxu1 %v9868_v1  ;;  %v9916_v1 = vpack.c.bf16 %v7595_v59, %v7594_v57  ;;  %v7603_v57 = vld [vmem:[%s12768_s22 + $0x3e8] sm:$0xff]  ;;  %v7554_v59 = vld [vmem:[%s12768_s22 + $0x260] sm:$0xff] }
0x32d0   :  { %9839 = vmatpush3.bf16.msra.mxu0 %v9838_v50  ;;  %v9886_v50 = vpack.c.bf16 %v7547_v33, %v7546_v16  ;;  %v7586_v16 = vld [vmem:[%s12768_s22 + $0x360] sm:$0xff]  ;;  %v7587_v33 = vld [vmem:[%s12768_s22 + $0x368] sm:$0xff] }
0x32d1   :  { %9871 = vmatpush3.bf16.msra.mxu1 %v9870_v29  ;;  %9841 = vmatprep.subr.bf16.mxu0 %v9840_v21  ;;  %v9918_v29 = vpack.c.bf16 %v7579_v28, %v7578_v63  ;;  %v9888_v21 = vpack.c.bf16 %v7565_v27, %v7564_v44  ;;  %v9934_v63 = vpack.c.bf16 %v7587_v33, %v7586_v16  ;;  %v7573_v28 = vld [vmem:[%s12768_s22 + $0x2f8] sm:$0xff]  ;;  %v7604_v44 = vld [vmem:[%s12768_s22 + $0x3f0] sm:$0xff] }
0x32d2   :  { %9873 = vmatprep.subr.bf16.mxu1 %v9872_v19  ;;  %v9920_v19 = vpack.c.bf16 %v7597_v17, %v7596_v3  ;;  %v7605_v3 = vld [vmem:[%s12768_s22 + $0x3f8] sm:$0xff]  ;;  %v7556_v17 = vld [vmem:[%s12768_s22 + $0x270] sm:$0xff] }
0x32d4   :  { %9843 = vmatpush3.bf16.msra.mxu0 %v9842_v26  ;;  %v9890_v26 = vpack.c.bf16 %v7549_v18, %v7548_v53  ;;  %v7588_v53 = vld [vmem:[%s12768_s22 + $0x370] sm:$0xff]  ;;  %v7589_v18 = vld [vmem:[%s12768_s22 + $0x378] sm:$0xff] }
0x32d5   :  { %9875 = vmatpush3.bf16.msra.mxu1 %v9874_v10  ;;  %9877 = vmatprep.subr.bf16.mxu0 %v9876_v12  ;;  %v9892_v10 = vpack.c.bf16 %v7567_v8, %v7566_v23  ;;  %v7550_v12 = vld [vmem:[%s12768_s22 + $0x240] sm:$0xff]  ;;  %v9938_v9 = vpack.c.bf16 %v7589_v18, %v7588_v53 }
0x32d6   :  { %9909 = vmatprep.subr.bf16.mxu1 %v9908_v45  ;;  %v7568_v45 = vld [vmem:[%s12768_s22 + $0x2d0] sm:$0xff]  ;;  %v9894_v48 = vpack.c.bf16 %v7551_v36, %v7550_v12  ;;  %v7654_v23 = vld [vmem:[%s12768_s22 + $0x580] sm:$0xff]  ;;  %v6774_v12 = vsub.s32 7, %v11770_v4 }
0x32d7   :  { %7799 = vmatmul.mubr.f32.vlgmr.msra.gmra.mrb[90].mxu0 %v7446_v49  ;;  %v7552_v49 = vld [vmem:[%s12768_s22 + $0x250] sm:$0xff]  ;;  %v9972_v25 = vpack.c.bf16 %v7655_v6, %v7654_v23  ;;  %v7641_v23 = vld [vmem:[%s12768_s22 + $0x518] sm:$0xff] }
0x32d8   :  { %7874 = vmatmul.mubr.f32.vlgmr.msra.gmra.mrb[106].mxu1 %v7448_v52  ;;  %9879 = vmatpush3.bf16.msra.mxu0 %v9878_v54  ;;  %v9896_v54 = vpack.c.bf16 %v7569_v13, %v7568_v45  ;;  %v9930_v52 = vpack.c.bf16 %v7585_v51, %v7584_v7  ;;  %v7624_v51 = vld [vmem:[%s12768_s22 + $0x490] sm:$0xff] }
0x32d9   :  { %9911 = vmatpush3.bf16.msra.mxu1 %v9910_v39  ;;  %9881 = vmatprep.subr.bf16.mxu0 %v9880_v15  ;;  %v7553_v39 = vld [vmem:[%s12768_s22 + $0x258] sm:$0xff]  ;;  %v9928_v15 = vpack.c.bf16 %v7601_v47, %v7600_v5 }
0x32da   :  { %9913 = vmatprep.subr.bf16.mxu1 %v9912_v40  ;;  %v9898_v61 = vpack.c.bf16 %v7553_v39, %v7552_v49  ;;  %v7570_v40 = vld [vmem:[%s12768_s22 + $0x2e0] sm:$0xff]  ;;  %v7607_v49 = vld [vmem:[%s12768_s22 + $0x408] sm:$0xff] }
0x32db   :  { %v9900_v43 = vpack.c.bf16 %v7571_v35, %v7570_v40 }
0x32dc   :  { %9883 = vmatpush3.bf16.msra.mxu0 %v9882_v60  ;;  %v7555_v60 = vld [vmem:[%s12768_s22 + $0x268] sm:$0xff] }
0x32dd   :  { %9915 = vmatpush3.bf16.msra.mxu1 %v9914_v58  ;;  %9885 = vmatprep.subr.bf16.mxu0 %v9884_v62  ;;  %v9932_v58 = vpack.c.bf16 %v7603_v57, %v7602_v56  ;;  %v9902_v62 = vpack.c.bf16 %v7555_v60, %v7554_v59  ;;  %v7656_v59 = vld [vmem:[%s12768_s22 + $0x590] sm:$0xff]  ;;  %v7657_v60 = vld [vmem:[%s12768_s22 + $0x598] sm:$0xff] }
0x32de   :  { %9917 = vmatprep.subr.bf16.mxu1 %v9916_v1  ;;  %v7572_v1 = vld [vmem:[%s12768_s22 + $0x2f0] sm:$0xff] }
0x32df   :  { %v9904_v27 = vpack.c.bf16 %v7573_v28, %v7572_v1 }
0x32e0   :  { %9887 = vmatpush3.bf16.msra.mxu0 %v9886_v50  ;;  %v7557_v50 = vld [vmem:[%s12768_s22 + $0x278] sm:$0xff] }
0x32e1   :  { %9919 = vmatpush3.bf16.msra.mxu1 %v9918_v29  ;;  %9889 = vmatprep.subr.bf16.mxu0 %v9888_v21  ;;  %v9936_v29 = vpack.c.bf16 %v7605_v3, %v7604_v44  ;;  %v9906_v21 = vpack.c.bf16 %v7557_v50, %v7556_v17  ;;  %v9976_v17 = vpack.c.bf16 %v7657_v60, %v7656_v59  ;;  %v7609_v50 = vld [vmem:[%s12768_s22 + $0x418] sm:$0xff] }
0x32e2   :  { %9921 = vmatprep.subr.bf16.mxu1 %v9920_v19  ;;  %v7622_v19 = vld [vmem:[%s12768_s22 + $0x480] sm:$0xff] }
0x32e3   :  { %v9940_v8 = vpack.c.bf16 %v7623_v55, %v7622_v19 }
0x32e4   :  { %9891 = vmatpush3.bf16.msra.mxu0 %v9890_v26  ;;  %v6762_v26 = vsub.s32 4, %v11770_v4 }
0x32e5   :  { %9923 = vmatpush3.bf16.msra.mxu1 %v9922_v31  ;;  %9893 = vmatprep.subr.bf16.mxu0 %v9892_v10  ;;  %v6770_v31 = vsub.s32 6, %v11770_v4  ;;  %v6766_v10 = vsub.s32 5, %v11770_v4  ;;  %v7672_v4 = vld [vmem:[%s12768_s22 + $0x610] sm:$0xff] }
0x32e6   :  { %9925 = vmatprep.subr.bf16.mxu1 %v9924_v11  ;;  %v6763_v5 = vrot.slane %v11815_v32, %v6762_v26 }
0x32e7   :  { %v6771_v47 = vrot.slane %v11815_v32, %v6770_v31 }
0x32e8   :  { %9895 = vmatpush3.bf16.msra.mxu0 %v9894_v48 }
0x32e9   :  { %9927 = vmatpush3.bf16.msra.mxu1 %v9926_v14  ;;  %9897 = vmatprep.subr.bf16.mxu0 %v9896_v54  ;;  %v7606_v54 = vld [vmem:[%s12768_s22 + $0x400] sm:$0xff] }
0x32ea   :  { %9929 = vmatprep.subr.bf16.mxu1 %v9928_v15  ;;  %v9942_v16 = vpack.c.bf16 %v7607_v49, %v7606_v54 }
0x32ec   :  { %9899 = vmatpush3.bf16.msra.mxu0 %v9898_v61  ;;  %v7625_v61 = vld [vmem:[%s12768_s22 + $0x498] sm:$0xff] }
0x32ed   :  { %9931 = vmatpush3.bf16.msra.mxu1 %v9930_v52  ;;  %9901 = vmatprep.subr.bf16.mxu0 %v9900_v43  ;;  %v9944_v3 = vpack.c.bf16 %v7625_v61, %v7624_v51  ;;  %v7660_v51 = vld [vmem:[%s12768_s22 + $0x5b0] sm:$0xff]  ;;  %v7661_v61 = vld [vmem:[%s12768_s22 + $0x5b8] sm:$0xff] }
0x32ee   :  { %9933 = vmatprep.subr.bf16.mxu1 %v9932_v58  ;;  %v9984_v60 = vpack.c.bf16 %v7661_v61, %v7660_v51 }
0x32f0   :  { %9903 = vmatpush3.bf16.msra.mxu0 %v9902_v62 }
0x32f1   :  { %9935 = vmatpush3.bf16.msra.mxu1 %v9934_v63  ;;  %9905 = vmatprep.subr.bf16.mxu0 %v9904_v27  ;;  %v7608_v63 = vld [vmem:[%s12768_s22 + $0x410] sm:$0xff] }
0x32f2   :  { %9937 = vmatprep.subr.bf16.mxu1 %v9936_v29  ;;  %v7640_v29 = vld [vmem:[%s12768_s22 + $0x510] sm:$0xff] }
0x32f4   :  { %9907 = vmatpush3.bf16.msra.mxu0 %v9906_v21 }
0x32f5   :  { %9939 = vmatpush3.bf16.msra.mxu1 %v9938_v9  ;;  %9941 = vmatprep.subr.bf16.mxu0 %v9940_v8  ;;  %v7626_v8 = vld [vmem:[%s12768_s22 + $0x4a0] sm:$0xff] }
0x32f6   :  { %9973 = vmatprep.subr.bf16.mxu1 %v9972_v25 }
0x336e   :  { %v6902_v36 = vpop.f32.mrb[76].mxu0  ;;  %v6979_v42 = vpop.f32.mrb[92].mxu1 }
0x336f   :  { %v6903_v11 = vadd.f32 %v6902_v36, %v12021_v20  ;;  %v6980_v2 = vadd.f32 %v6979_v42, %v12035_v24  ;;  %v6904_v45 = vpop.f32.mrb[77].mxu0  ;;  %v6981_v13 = vpop.f32.mrb[93].mxu1  ;;  %v6767_v20 = vrot.slane %v11815_v32, %v6766_v10  ;;  %v6775_v24 = vrot.slane %v11815_v32, %v6774_v12  ;;  %v7627_v36 = vld [vmem:[%s12768_s22 + $0x4a8] sm:$0xff]  ;;  %v7658_v42 = vld [vmem:[%s12768_s22 + $0x5a0] sm:$0xff] }
0x3370   :  { %v6905_v48 = vadd.f32 %v6904_v45, %v11837_v38  ;;  %v6982_v14 = vadd.f32 %v6981_v13, %v11847_v41  ;;  %v7638_v38 = vld [vmem:[%s12768_s22 + $0x500] sm:$0xff]  ;;  %v7639_v41 = vld [vmem:[%s12768_s22 + $0x508] sm:$0xff]  ;;  %v9948_v54 = vpack.c.bf16 %v7627_v36, %v7626_v8  ;;  %v7633_v36 = vld [vmem:[%s12768_s22 + $0x4d8] sm:$0xff] }
0x3371   :  { %v7462_v52 = vmax.f32 %v6903_v11, 0.0  ;;  %v7464_v40 = vmax.f32 %v6980_v2, 0.0  ;;  %v9974_v33 = vpack.c.bf16 %v7639_v41, %v7638_v38  ;;  %v7659_v11 = vld [vmem:[%s12768_s22 + $0x5a8] sm:$0xff]  ;;  %v7642_v38 = vld [vmem:[%s12768_s22 + $0x520] sm:$0xff] }
0x3372   :  { %v7463_v39 = vmax.f32 %v6905_v48, 0.0  ;;  %v7465_v15 = vmax.f32 %v6982_v14, 0.0  ;;  %v7050_v7 = vpop.f32.mrb[78].mxu0  ;;  %v7127_v32 = vpop.f32.mrb[94].mxu1  ;;  %v12319_v2 = vld [vmem:[%s12767_s21 + $0x8] sm:$0xff]  ;;  %v7610_v48 = vld [vmem:[%s12768_s22 + $0x420] sm:$0xff]  ;;  %v9980_v49 = vpack.c.bf16 %v7659_v11, %v7658_v42 }
0x3373   :  { %v7051_v35 = vadd.f32 %v7050_v7, %v6763_v5  ;;  %v7128_v56 = vadd.f32 %v7127_v32, %v6771_v47  ;;  %v7052_v43 = vpop.f32.mrb[79].mxu0  ;;  %v7129_v57 = vpop.f32.mrb[95].mxu1  ;;  %v7611_v14 = vld [vmem:[%s12768_s22 + $0x428] sm:$0xff]  ;;  %v12344_v7 = vrot.slane %v12319_v2, %v6758_v34  ;;  %v7629_v32 = vld [vmem:[%s12768_s22 + $0x4b8] sm:$0xff]  ;;  %v7646_v8 = vld [vmem:[%s12768_s22 + $0x540] sm:$0xff] }
0x3374   :  { %v7053_v58 = vadd.f32 %v7052_v43, %v6767_v20  ;;  %v7130_v62 = vadd.f32 %v7129_v57, %v6775_v24  ;;  %7803 = vmatprep.mubr.f32.mxu0 %v7463_v39  ;;  %7878 = vmatprep.mubr.f32.mxu1 %v7465_v15  ;;  %v7643_v41 = vld [vmem:[%s12768_s22 + $0x528] sm:$0xff]  ;;  %v7628_v39 = vld [vmem:[%s12768_s22 + $0x4b0] sm:$0xff]  ;;  %v12339_v15 = vrot.slane %v12319_v2, %v6750_v30  ;;  %v7665_v11 = vld [vmem:[%s12768_s22 + $0x5d8] sm:$0xff] }
0x3375   :  { %7804 = vmatmul.mubr.f32.gmra.mrb[92].mxu0 %v7462_v52  ;;  %7879 = vmatmul.mubr.f32.gmra.mrb[108].mxu1 %v7464_v40  ;;  %v7450_v21 = vmax.f32 %v7051_v35, 0.0  ;;  %v7452_v53 = vmax.f32 %v7128_v56, 0.0  ;;  %v9950_v34 = vpack.c.bf16 %v7611_v14, %v7610_v48  ;;  %v9982_v40 = vpack.c.bf16 %v7643_v41, %v7642_v38  ;;  %v7612_v35 = vld [vmem:[%s12768_s22 + $0x430] sm:$0xff]  ;;  %v7613_v56 = vld [vmem:[%s12768_s22 + $0x438] sm:$0xff]  ;;  %v7635_v38 = vld [vmem:[%s12768_s22 + $0x4e8] sm:$0xff] }
0x3376   :  { %v7451_v1 = vmax.f32 %v7053_v58, 0.0  ;;  %v7453_v28 = vmax.f32 %v7130_v62, 0.0  ;;  %v7056_v44 = vpop.f32.mrb[80].mxu0  ;;  %v7133_v27 = vpop.f32.mrb[96].mxu1  ;;  %v9952_v59 = vpack.c.bf16 %v7629_v32, %v7628_v39  ;;  %v7644_v58 = vld [vmem:[%s12768_s22 + $0x530] sm:$0xff]  ;;  %v7645_v62 = vld [vmem:[%s12768_s22 + $0x538] sm:$0xff] }
0x3377   :  { %v7057_v18 = vadd.f32 %v7056_v44, %v6763_v5  ;;  %v7134_v9 = vadd.f32 %v7133_v27, %v6771_v47  ;;  %v7058_v19 = vpop.f32.mrb[81].mxu0  ;;  %v7135_v55 = vpop.f32.mrb[97].mxu1  ;;  %v9946_v5 = vpack.c.bf16 %v7609_v50, %v7608_v63  ;;  %v9978_v47 = vpack.c.bf16 %v7641_v23, %v7640_v29  ;;  %v7663_v44 = vld [vmem:[%s12768_s22 + $0x5c8] sm:$0xff]  ;;  %v7664_v42 = vld [vmem:[%s12768_s22 + $0x5d0] sm:$0xff]  ;;  %v7617_v48 = vld [vmem:[%s12768_s22 + $0x458] sm:$0xff] }
0x3378   :  { %v7059_v6 = vadd.f32 %v7058_v19, %v6767_v20  ;;  %v7136_v25 = vadd.f32 %v7135_v55, %v6775_v24  ;;  %7948 = vmatprep.mubr.f32.mxu0 %v7451_v1  ;;  %8023 = vmatprep.mubr.f32.mxu1 %v7453_v28  ;;  %v7631_v1 = vld [vmem:[%s12768_s22 + $0x4c8] sm:$0xff]  ;;  %v7662_v28 = vld [vmem:[%s12768_s22 + $0x5c0] sm:$0xff]  ;;  %v9954_v29 = vpack.c.bf16 %v7613_v56, %v7612_v35  ;;  %v7648_v14 = vld [vmem:[%s12768_s22 + $0x550] sm:$0xff] }
0x3379   :  { %7949 = vmatmul.mubr.f32.vlgmr.msra.gmra.mrb[94].mxu0 %v7450_v21  ;;  %8024 = vmatmul.mubr.f32.vlgmr.msra.gmra.mrb[110].mxu1 %v7452_v53  ;;  %v7466_v20 = vmax.f32 %v7057_v18, 0.0  ;;  %v7468_v24 = vmax.f32 %v7134_v9, 0.0  ;;  %v9986_v21 = vpack.c.bf16 %v7645_v62, %v7644_v58  ;;  %v7614_v53 = vld [vmem:[%s12768_s22 + $0x440] sm:$0xff]  ;;  %v7615_v18 = vld [vmem:[%s12768_s22 + $0x448] sm:$0xff]  ;;  %v9988_v23 = vpack.c.bf16 %v7663_v44, %v7662_v28 }
0x337a   :  { %v7467_v45 = vmax.f32 %v7059_v6, 0.0  ;;  %v7469_v13 = vmax.f32 %v7136_v25, 0.0  ;;  %9943 = vmatpush3.bf16.msra.mxu0 %v9942_v16  ;;  %9975 = vmatpush3.bf16.msra.mxu1 %v9974_v33  ;;  %v7630_v16 = vld [vmem:[%s12768_s22 + $0x4c0] sm:$0xff]  ;;  %v7647_v6 = vld [vmem:[%s12768_s22 + $0x548] sm:$0xff]  ;;  %v7632_v25 = vld [vmem:[%s12768_s22 + $0x4d0] sm:$0xff]  ;;  %v6779_v28 = vrot.slane %v12319_v2, %v6746_v46  ;;  %v6787_v44 = vrot.slane %v12319_v2, %v6754_v0 }
0x337b   :  { %9945 = vmatprep.subr.bf16.mxu0 %v9944_v3  ;;  %9977 = vmatprep.subr.bf16.mxu1 %v9976_v17  ;;  %v9956_v55 = vpack.c.bf16 %v7631_v1, %v7630_v16  ;;  %v7666_v41 = vld [vmem:[%s12768_s22 + $0x5e0] sm:$0xff]  ;;  %v7619_v35 = vld [vmem:[%s12768_s22 + $0x468] sm:$0xff]  ;;  %v7636_v16 = vld [vmem:[%s12768_s22 + $0x4f0] sm:$0xff] }
0x337c   :  { %7953 = vmatprep.mubr.f32.mxu0 %v7467_v45  ;;  %8028 = vmatprep.mubr.f32.mxu1 %v7469_v13  ;;  %v6795_v45 = vrot.slane %v12319_v2, %v6762_v26  ;;  %v9958_v13 = vpack.c.bf16 %v7615_v18, %v7614_v53  ;;  %v6803_v26 = vrot.slane %v12319_v2, %v6770_v31  ;;  %v7667_v31 = vld [vmem:[%s12768_s22 + $0x5e8] sm:$0xff]  ;;  %v7650_v56 = vld [vmem:[%s12768_s22 + $0x560] sm:$0xff]  ;;  %v7669_v1 = vld [vmem:[%s12768_s22 + $0x5f8] sm:$0xff] }
0x337d   :  { %7954 = vmatmul.mubr.f32.gmra.mrb[96].mxu0 %v7466_v20  ;;  %8029 = vmatmul.mubr.f32.gmra.mrb[112].mxu1 %v7468_v24  ;;  %v9960_v20 = vpack.c.bf16 %v7633_v36, %v7632_v25  ;;  %v9992_v24 = vpack.c.bf16 %v7665_v11, %v7664_v42  ;;  %v9996_v58 = vpack.c.bf16 %v7667_v31, %v7666_v41  ;;  %v7651_v62 = vld [vmem:[%s12768_s22 + $0x568] sm:$0xff]  ;;  %v7620_v18 = vld [vmem:[%s12768_s22 + $0x470] sm:$0xff]  ;;  %v7653_v36 = vld [vmem:[%s12768_s22 + $0x578] sm:$0xff] }
0x337e   :  { %v12355_v30 = vpop.f32.mrb[82].mxu0  ;;  %v12357_v52 = vpop.f32.mrb[98].mxu1  ;;  %9947 = vmatpush3.bf16.msra.mxu0 %v9946_v5  ;;  %9979 = vmatpush3.bf16.msra.mxu1 %v9978_v47  ;;  %v9990_v5 = vpack.c.bf16 %v7647_v6, %v7646_v8  ;;  %v7616_v47 = vld [vmem:[%s12768_s22 + $0x450] sm:$0xff]  ;;  %v7686_v42 = vld [vmem:[%s12768_s22 + $0x680] sm:$0xff]  ;;  %v7687_v11 = vld [vmem:[%s12768_s22 + $0x688] sm:$0xff] }
0x337f   :  { %v7206_v43 = vpop.f32.mrb[83].mxu0  ;;  %v7283_v57 = vpop.f32.mrb[99].mxu1  ;;  %9949 = vmatprep.subr.bf16.mxu0 %v9948_v54  ;;  %9981 = vmatprep.subr.bf16.mxu1 %v9980_v49  ;;  %v7649_v54 = vld [vmem:[%s12768_s22 + $0x558] sm:$0xff]  ;;  %v7634_v49 = vld [vmem:[%s12768_s22 + $0x4e0] sm:$0xff]  ;;  %v9962_v51 = vpack.c.bf16 %v7617_v48, %v7616_v47  ;;  %v7652_v46 = vld [vmem:[%s12768_s22 + $0x570] sm:$0xff] }
0x3380   :  { %v7207_v33 = vadd.f32 %v7206_v43, %v12339_v15  ;;  %v7284_v63 = vadd.f32 %v7283_v57, %v12344_v7  ;;  %v9994_v61 = vpack.c.bf16 %v7649_v54, %v7648_v14  ;;  %v7671_v47 = vld [vmem:[%s12768_s22 + $0x608] sm:$0xff]  ;;  %v10002_v14 = vpack.c.bf16 %v7653_v36, %v7652_v46  ;;  %v7688_v54 = vld [vmem:[%s12768_s22 + $0x690] sm:$0xff]  ;;  %v7689_v31 = vld [vmem:[%s12768_s22 + $0x698] sm:$0xff] }
0x3381   :  { %v7707_v46 = vld [vmem:[%s12768_s22 + $0x728] sm:$0xff]  ;;  %v7693_v36 = vld [vmem:[%s12768_s22 + $0x6b8] sm:$0xff] }
0x3382   :  { %v7455_v27 = vmax.f32 %v7207_v33, 0.0  ;;  %v7457_v3 = vmax.f32 %v7284_v63, 0.0  ;;  %v12385_v17 = vpop.f32.mrb[84].mxu0  ;;  %v12387_v50 = vpop.f32.mrb[100].mxu1  ;;  %9951 = vmatpush3.bf16.msra.mxu0 %v9950_v34  ;;  %9983 = vmatpush3.bf16.msra.mxu1 %v9982_v40  ;;  %v9964_v34 = vpack.c.bf16 %v7635_v38, %v7634_v49  ;;  %v7618_v40 = vld [vmem:[%s12768_s22 + $0x460] sm:$0xff]  ;;  %v7637_v33 = vld [vmem:[%s12768_s22 + $0x4f8] sm:$0xff]  ;;  %v7205_v49 = vadd.f32 %v12355_v30, %v6779_v28 }
0x3383   :  { %v12395_v9 = vpop.f32.mrb[85].mxu0  ;;  %v12397_v19 = vpop.f32.mrb[101].mxu1  ;;  %9953 = vmatprep.subr.bf16.mxu0 %v9952_v59  ;;  %9985 = vmatprep.subr.bf16.mxu1 %v9984_v60  ;;  %v7668_v63 = vld [vmem:[%s12768_s22 + $0x5f0] sm:$0xff]  ;;  %v9968_v53 = vpack.c.bf16 %v7637_v33, %v7636_v16  ;;  %v7282_v38 = vadd.f32 %v12357_v52, %v6787_v44  ;;  %v7690_v16 = vld [vmem:[%s12768_s22 + $0x6a0] sm:$0xff]  ;;  %v7723_v33 = vld [vmem:[%s12768_s22 + $0x7a8] sm:$0xff] }
0x3384   :  { %8098 = vmatprep.mubr.f32.mxu0 %v7455_v27  ;;  %8173 = vmatprep.mubr.f32.mxu1 %v7457_v3  ;;  %v10000_v25 = vpack.c.bf16 %v7669_v1, %v7668_v63  ;;  %v7213_v30 = vadd.f32 %v12395_v9, %v12339_v15  ;;  %v7290_v52 = vadd.f32 %v12397_v19, %v12344_v7  ;;  %v7454_v15 = vmax.f32 %v7205_v49, 0.0  ;;  %v7726_v49 = vld [vmem:[%s12768_s22 + $0x7c0] sm:$0xff] }
0x3385   :  { %v7456_v9 = vmax.f32 %v7282_v38, 0.0  ;;  %v7211_v7 = vadd.f32 %v12385_v17, %v6779_v28  ;;  %v7288_v19 = vadd.f32 %v12387_v50, %v6787_v44  ;;  %v7704_v50 = vld [vmem:[%s12768_s22 + $0x710] sm:$0xff]  ;;  %v7727_v38 = vld [vmem:[%s12768_s22 + $0x7c8] sm:$0xff] }
0x3386   :  { %9955 = vmatpush3.bf16.msra.mxu0 %v9954_v29  ;;  %9987 = vmatpush3.bf16.msra.mxu1 %v9986_v21  ;;  %v9966_v29 = vpack.c.bf16 %v7619_v35, %v7618_v40  ;;  %v9998_v21 = vpack.c.bf16 %v7651_v62, %v7650_v56  ;;  %v10008_v35 = vpack.c.bf16 %v7689_v31, %v7688_v54  ;;  %v7705_v62 = vld [vmem:[%s12768_s22 + $0x718] sm:$0xff]  ;;  %v7695_v54 = vld [vmem:[%s12768_s22 + $0x6c8] sm:$0xff] }
0x3387   :  { %9957 = vmatprep.subr.bf16.mxu0 %v9956_v55  ;;  %9989 = vmatprep.subr.bf16.mxu1 %v9988_v23  ;;  %v7621_v55 = vld [vmem:[%s12768_s22 + $0x478] sm:$0xff]  ;;  %v7470_v63 = vmax.f32 %v7211_v7, 0.0  ;;  %v7472_v1 = vmax.f32 %v7288_v19, 0.0  ;;  %v10042_v44 = vpack.c.bf16 %v7705_v62, %v7704_v50  ;;  %v7698_v50 = vld [vmem:[%s12768_s22 + $0x6e0] sm:$0xff]  ;;  %v7699_v62 = vld [vmem:[%s12768_s22 + $0x6e8] sm:$0xff] }
0x3388   :  { %v9970_v48 = vpack.c.bf16 %v7621_v55, %v7620_v18  ;;  %v7706_v55 = vld [vmem:[%s12768_s22 + $0x720] sm:$0xff] }
0x338a   :  { %v7358_v39 = vpop.f32.mrb[86].mxu0  ;;  %v7435_v32 = vpop.f32.mrb[102].mxu1  ;;  %9959 = vmatpush3.bf16.msra.mxu0 %v9958_v13  ;;  %9991 = vmatpush3.bf16.msra.mxu1 %v9990_v5  ;;  %v7719_v13 = vld [vmem:[%s12768_s22 + $0x788] sm:$0xff]  ;;  %v7670_v5 = vld [vmem:[%s12768_s22 + $0x600] sm:$0xff] }
0x338b   :  { %v12456_v43 = vadd.f32 %v7358_v39, %v6795_v45  ;;  %v12458_v57 = vadd.f32 %v7435_v32, %v6803_v26  ;;  %v12460_v59 = vpop.f32.mrb[87].mxu0  ;;  %v12462_v60 = vpop.f32.mrb[103].mxu1  ;;  %9961 = vmatprep.subr.bf16.mxu0 %v9960_v20  ;;  %9993 = vmatprep.subr.bf16.mxu1 %v9992_v24  ;;  %v7702_v20 = vld [vmem:[%s12768_s22 + $0x700] sm:$0xff]  ;;  %v7703_v24 = vld [vmem:[%s12768_s22 + $0x708] sm:$0xff]  ;;  %v7720_v39 = vld [vmem:[%s12768_s22 + $0x790] sm:$0xff] }
0x338c   :  { %v7721_v32 = vld [vmem:[%s12768_s22 + $0x798] sm:$0xff]  ;;  %v10038_v40 = vpack.c.bf16 %v7703_v24, %v7702_v20  ;;  %v7694_v24 = vld [vmem:[%s12768_s22 + $0x6c0] sm:$0xff] }
0x338d   :  { %v10040_v56 = vpack.c.bf16 %v7721_v32, %v7720_v39  ;;  %v7709_v20 = vld [vmem:[%s12768_s22 + $0x738] sm:$0xff]  ;;  %v7678_v39 = vld [vmem:[%s12768_s22 + $0x640] sm:$0xff]  ;;  %v7679_v32 = vld [vmem:[%s12768_s22 + $0x648] sm:$0xff] }
0x338e   :  { %v7364_v27 = vpop.f32.mrb[88].mxu0  ;;  %v7441_v3 = vpop.f32.mrb[104].mxu1  ;;  %9963 = vmatpush3.bf16.msra.mxu0 %v9962_v51  ;;  %9995 = vmatpush3.bf16.msra.mxu1 %v9994_v61  ;;  %v12550_v51 = vrot.slane %v12319_v2, %v6766_v10  ;;  %v12555_v61 = vrot.slane %v12319_v2, %v6774_v12  ;;  %v7673_v10 = vld [vmem:[%s12768_s22 + $0x618] sm:$0xff]  ;;  %v7471_v12 = vmax.f32 %v7213_v30, 0.0  ;;  %v7473_v2 = vmax.f32 %v7290_v52, 0.0 }
0x338f   :  { %v12494_v0 = vadd.f32 %v7364_v27, %v6795_v45  ;;  %v12496_v23 = vadd.f32 %v7441_v3, %v6803_v26  ;;  %v12498_v8 = vpop.f32.mrb[89].mxu0  ;;  %v12500_v6 = vpop.f32.mrb[105].mxu1  ;;  %9965 = vmatprep.subr.bf16.mxu0 %v9964_v34  ;;  %9997 = vmatprep.subr.bf16.mxu1 %v9996_v58  ;;  %v7718_v45 = vld [vmem:[%s12768_s22 + $0x780] sm:$0xff]  ;;  %v10004_v26 = vpack.c.bf16 %v7687_v11, %v7686_v42  ;;  %v7675_v3 = vld [vmem:[%s12768_s22 + $0x628] sm:$0xff]  ;;  %v7724_v42 = vld [vmem:[%s12768_s22 + $0x7b0] sm:$0xff] }
0x3390   :  { %v10036_v41 = vpack.c.bf16 %v7719_v13, %v7718_v45  ;;  %v10006_v34 = vpack.c.bf16 %v7671_v47, %v7670_v5  ;;  %v7361_v58 = vadd.f32 %v12460_v59, %v12550_v51  ;;  %v7438_v17 = vadd.f32 %v12462_v60, %v12555_v61  ;;  %v7691_v59 = vld [vmem:[%s12768_s22 + $0x6a8] sm:$0xff]  ;;  %v7722_v60 = vld [vmem:[%s12768_s22 + $0x7a0] sm:$0xff]  ;;  %v7725_v11 = vld [vmem:[%s12768_s22 + $0x7b8] sm:$0xff] }
0x3391   :  { %v10010_v28 = vpack.c.bf16 %v7673_v10, %v7672_v4  ;;  %v7674_v27 = vld [vmem:[%s12768_s22 + $0x620] sm:$0xff]  ;;  %v10044_v18 = vpack.c.bf16 %v7723_v33, %v7722_v60  ;;  %v10046_v13 = vpack.c.bf16 %v7707_v46, %v7706_v55  ;;  %v7676_v5 = vld [vmem:[%s12768_s22 + $0x630] sm:$0xff]  ;;  %v7677_v47 = vld [vmem:[%s12768_s22 + $0x638] sm:$0xff]  ;;  %v10020_v30 = vpack.c.bf16 %v7695_v54, %v7694_v24 }
0x3392   :  { %9967 = vmatpush3.bf16.msra.mxu0 %v9966_v29  ;;  %9999 = vmatpush3.bf16.msra.mxu1 %v9998_v21  ;;  %v7459_v29 = vmax.f32 %v7361_v58, 0.0  ;;  %v7461_v21 = vmax.f32 %v7438_v17, 0.0  ;;  %v10014_v45 = vpack.c.bf16 %v7675_v3, %v7674_v27  ;;  %v10052_v52 = vpack.c.bf16 %v7727_v38, %v7726_v49  ;;  %v7680_v4 = vld [vmem:[%s12768_s22 + $0x650] sm:$0xff]  ;;  %v7681_v10 = vld [vmem:[%s12768_s22 + $0x658] sm:$0xff]  ;;  %v7683_v27 = vld [vmem:[%s12768_s22 + $0x668] sm:$0xff] }
0x3393   :  { %9969 = vmatprep.subr.bf16.mxu0 %v9968_v53  ;;  %10001 = vmatprep.subr.bf16.mxu1 %v10000_v25  ;;  %v10012_v53 = vpack.c.bf16 %v7691_v59, %v7690_v16  ;;  %v7692_v25 = vld [vmem:[%s12768_s22 + $0x6b0] sm:$0xff]  ;;  %v10022_v7 = vpack.c.bf16 %v7679_v32, %v7678_v39  ;;  %v7713_v17 = vld [vmem:[%s12768_s22 + $0x758] sm:$0xff]  ;;  %v7730_v16 = vld [vmem:[%s12768_s22 + $0x7e0] sm:$0xff]  ;;  %v7367_v38 = vadd.f32 %v12498_v8, %v12550_v51  ;;  %v7460_v39 = vmax.f32 %v12458_v57, 0.0 }
0x3394   :  { %v7712_v58 = vld [vmem:[%s12768_s22 + $0x750] sm:$0xff]  ;;  %v7731_v59 = vld [vmem:[%s12768_s22 + $0x7e8] sm:$0xff]  ;;  %v7717_v24 = vld [vmem:[%s12768_s22 + $0x778] sm:$0xff] }
0x3395   :  { %v7715_v55 = vld [vmem:[%s12768_s22 + $0x768] sm:$0xff]  ;;  %v7700_v46 = vld [vmem:[%s12768_s22 + $0x6f0] sm:$0xff]  ;;  %v7475_v32 = vmax.f32 %v7367_v38, 0.0 }
0x3396   :  { %9971 = vmatpush3.bf16.msra.mxu0 %v9970_v48  ;;  %10003 = vmatpush3.bf16.msra.mxu1 %v10002_v14  ;;  %v10016_v48 = vpack.c.bf16 %v7693_v36, %v7692_v25  ;;  %v10048_v14 = vpack.c.bf16 %v7725_v11, %v7724_v42  ;;  %v7701_v36 = vld [vmem:[%s12768_s22 + $0x6f8] sm:$0xff]  ;;  %v7732_v42 = vld [vmem:[%s12768_s22 + $0x7f0] sm:$0xff] }
0x3397   :  { %10005 = vmatprep.subr.bf16.mxu0 %v10004_v26  ;;  %10037 = vmatprep.subr.bf16.mxu1 %v10036_v41  ;;  %v7708_v26 = vld [vmem:[%s12768_s22 + $0x730] sm:$0xff]  ;;  %v10018_v41 = vpack.c.bf16 %v7677_v47, %v7676_v5  ;;  %v7733_v11 = vld [vmem:[%s12768_s22 + $0x7f8] sm:$0xff] }
0x3398   :  { %v10050_v31 = vpack.c.bf16 %v7709_v20, %v7708_v26  ;;  %v7684_v47 = vld [vmem:[%s12768_s22 + $0x670] sm:$0xff]  ;;  %v7685_v26 = vld [vmem:[%s12768_s22 + $0x678] sm:$0xff] }
0x3399   :  { %8099 = vmatmul.mubr.f32.vlgmr.msra.gmra.mrb[98].mxu0 %v7454_v15  ;;  %8174 = vmatmul.mubr.f32.vlgmr.msra.gmra.mrb[114].mxu1 %v7456_v9  ;;  %v7728_v15 = vld [vmem:[%s12768_s22 + $0x7d0] sm:$0xff]  ;;  %v7729_v9 = vld [vmem:[%s12768_s22 + $0x7d8] sm:$0xff]  ;;  %v10034_v54 = vpack.c.bf16 %v7685_v26, %v7684_v47 }
0x339a   :  { %8103 = vmatprep.mubr.f32.mxu0 %v7471_v12  ;;  %8178 = vmatprep.mubr.f32.mxu1 %v7473_v2  ;;  %v10056_v2 = vpack.c.bf16 %v7729_v9, %v7728_v15  ;;  %v7716_v20 = vld [vmem:[%s12768_s22 + $0x770] sm:$0xff] }
0x339b   :  { %10007 = vmatpush3.bf16.msra.mxu0 %v10006_v34  ;;  %10039 = vmatpush3.bf16.msra.mxu1 %v10038_v40  ;;  %v7710_v34 = vld [vmem:[%s12768_s22 + $0x740] sm:$0xff]  ;;  %v7711_v40 = vld [vmem:[%s12768_s22 + $0x748] sm:$0xff]  ;;  %v10066_v49 = vpack.c.bf16 %v7717_v24, %v7716_v20 }
0x339c   :  { %10009 = vmatprep.subr.bf16.mxu0 %v10008_v35  ;;  %10041 = vmatprep.subr.bf16.mxu1 %v10040_v56  ;;  %v7696_v35 = vld [vmem:[%s12768_s22 + $0x6d0] sm:$0xff]  ;;  %v7697_v56 = vld [vmem:[%s12768_s22 + $0x6d8] sm:$0xff]  ;;  %v10054_v19 = vpack.c.bf16 %v7711_v40, %v7710_v34  ;;  %v7476_v34 = vmax.f32 %v12496_v23, 0.0 }
0x339d   :  { %8104 = vmatmul.mubr.f32.gmra.mrb[100].mxu0 %v7470_v63  ;;  %8179 = vmatmul.mubr.f32.gmra.mrb[116].mxu1 %v7472_v1  ;;  %v10024_v12 = vpack.c.bf16 %v7697_v56, %v7696_v35  ;;  %v10026_v1 = vpack.c.bf16 %v7681_v10, %v7680_v4 }
0x339e   :  { %8248 = vmatprep.mubr.f32.mxu0 %v7459_v29  ;;  %8323 = vmatprep.mubr.f32.mxu1 %v7461_v21  ;;  %v10028_v21 = vpack.c.bf16 %v7699_v62, %v7698_v50 }
0x339f   :  { %10011 = vmatpush3.bf16.msra.mxu0 %v10010_v28  ;;  %10043 = vmatpush3.bf16.msra.mxu1 %v10042_v44  ;;  %v10058_v28 = vpack.c.bf16 %v7713_v17, %v7712_v58  ;;  %v7682_v44 = vld [vmem:[%s12768_s22 + $0x660] sm:$0xff] }
0x33a0   :  { %10013 = vmatprep.subr.bf16.mxu0 %v10012_v53  ;;  %10045 = vmatprep.subr.bf16.mxu1 %v10044_v18  ;;  %v10060_v53 = vpack.c.bf16 %v7731_v59, %v7730_v16  ;;  %v7714_v18 = vld [vmem:[%s12768_s22 + $0x760] sm:$0xff] }
0x33a1   :  { %v10062_v5 = vpack.c.bf16 %v7715_v55, %v7714_v18 }
0x33a3   :  { %10015 = vmatpush3.bf16.msra.mxu0 %v10014_v45  ;;  %10047 = vmatpush3.bf16.msra.mxu1 %v10046_v13  ;;  %v10030_v13 = vpack.c.bf16 %v7683_v27, %v7682_v44 }
0x33a4   :  { %10017 = vmatprep.subr.bf16.mxu0 %v10016_v48  ;;  %10049 = vmatprep.subr.bf16.mxu1 %v10048_v14  ;;  %v10032_v48 = vpack.c.bf16 %v7701_v36, %v7700_v46  ;;  %v10064_v14 = vpack.c.bf16 %v7733_v11, %v7732_v42 }
0x33a7   :  { %10019 = vmatpush3.bf16.msra.mxu0 %v10018_v41  ;;  %10051 = vmatpush3.bf16.msra.mxu1 %v10050_v31  ;;  %v7444_v41 = vadd.f32 %v12500_v6, %v12555_v61  ;;  %v7458_v31 = vmax.f32 %v12456_v43, 0.0 }
0x33a8   :  { %10021 = vmatprep.subr.bf16.mxu0 %v10020_v30  ;;  %10053 = vmatprep.subr.bf16.mxu1 %v10052_v52  ;;  %v7474_v52 = vmax.f32 %v12494_v0, 0.0 }
0x33a9   :  { %v7477_v30 = vmax.f32 %v7444_v41, 0.0 }
0x33aa   :  { %v8772_v60 = vpop.f32.mrb[90].mxu0 }
0x33ab   :  { %v8810_v33 = vpop.f32.mrb[106].mxu1  ;;  %10023 = vmatpush3.bf16.msra.mxu0 %v10022_v7  ;;  %10055 = vmatpush3.bf16.msra.mxu1 %v10054_v19  ;;  %v8773_v63 = vpop.f32.mrb[91].mxu0 }
0x33ac   :  { %v8774_v3 = vadd.f32 %v8773_v63, %v8772_v60  ;;  %v8811_v29 = vpop.f32.mrb[107].mxu1  ;;  %10025 = vmatprep.subr.bf16.mxu0 %v10024_v12  ;;  %10057 = vmatprep.subr.bf16.mxu1 %v10056_v2 }
0x33ad   :  { %v8812_v25 = vadd.f32 %v8811_v29, %v8810_v33 }
0x33af   :  { %v7876_v45 = vadd.f32 %v8812_v25, %v8774_v3  ;;  %10027 = vmatpush3.bf16.msra.mxu0 %v10026_v1  ;;  %10059 = vmatpush3.bf16.msra.mxu1 %v10058_v28 }
0x33b0   :  { %10029 = vmatprep.subr.bf16.mxu0 %v10028_v21  ;;  %10061 = vmatprep.subr.bf16.mxu1 %v10060_v53 }
0x33b3   :  { %10031 = vmatpush3.bf16.msra.mxu0 %v10030_v13  ;;  %10063 = vmatpush3.bf16.msra.mxu1 %v10062_v5 }
0x33b4   :  { %10033 = vmatprep.subr.bf16.mxu0 %v10032_v48  ;;  %10065 = vmatprep.subr.bf16.mxu1 %v10064_v14 }
0x33b7   :  { %10035 = vmatpush3.bf16.msra.mxu0 %v10034_v54  ;;  %10067 = vmatpush3.bf16.msra.mxu1 %v10066_v49  ;;  %v8521_v49 = vld [vmem:[%s12769_s23] ss:$0 sm:$0xff] }
0x33ba   :  { %8249 = vmatmul.mubr.f32.vlgmr.msra.gmra.mrb[102].mxu0 %v7458_v31  ;;  %8324 = vmatmul.mubr.f32.vlgmr.msra.gmra.mrb[118].mxu1 %v7460_v39 }
0x33bb   :  { %8253 = vmatprep.mubr.f32.mxu0 %v7475_v32  ;;  %8328 = vmatprep.mubr.f32.mxu1 %v7477_v30 }
0x33be   :  { %8254 = vmatmul.mubr.f32.gmra.mrb[104].mxu0 %v7474_v52  ;;  %8329 = vmatmul.mubr.f32.gmra.mrb[120].mxu1 %v7476_v34 }
0x3448   :  { %v8775_v8 = vpop.f32.mrb[92].mxu0  ;;  %v8813_v6 = vpop.f32.mrb[108].mxu1 }
0x3449   :  { %v8776_v51 = vpop.f32.mrb[93].mxu0  ;;  %v8814_v61 = vpop.f32.mrb[109].mxu1 }
0x344a   :  { %v8777_v40 = vadd.f32 %v8776_v51, %v8775_v8  ;;  %v8815_v43 = vadd.f32 %v8814_v61, %v8813_v6 }
0x344c   :  { %v7881_v35 = vadd.f32 %v8815_v43, %v8777_v40  ;;  %v8848_v57 = vpop.f32.mrb[94].mxu0  ;;  %v8886_v56 = vpop.f32.mrb[110].mxu1 }
0x344d   :  { %v8849_v15 = vpop.f32.mrb[95].mxu0  ;;  %v8887_v9 = vpop.f32.mrb[111].mxu1 }
0x344e   :  { %v8850_v7 = vadd.f32 %v8849_v15, %v8848_v57  ;;  %v8888_v19 = vadd.f32 %v8887_v9, %v8886_v56 }
0x3450   :  { %v7951_v4 = vadd.f32 %v8850_v7, %v7876_v45  ;;  %v8851_v10 = vpop.f32.mrb[96].mxu0  ;;  %v8889_v0 = vpop.f32.mrb[112].mxu1 }
0x3451   :  { %v8852_v12 = vpop.f32.mrb[97].mxu0  ;;  %v8890_v23 = vpop.f32.mrb[113].mxu1 }
0x3452   :  { %v8026_v2 = vadd.f32 %v8888_v19, %v7951_v4  ;;  %v8853_v58 = vadd.f32 %v8852_v12, %v8851_v10  ;;  %v8891_v17 = vadd.f32 %v8890_v23, %v8889_v0 }
0x3454   :  { %v7956_v50 = vadd.f32 %v8853_v58, %v7881_v35 }
0x3456   :  { %v8031_v62 = vadd.f32 %v8891_v17, %v7956_v50 }
0x346c   :  { %v8924_v16 = vpop.f32.mrb[98].mxu0  ;;  %v8962_v59 = vpop.f32.mrb[114].mxu1 }
0x346d   :  { %v8925_v60 = vpop.f32.mrb[99].mxu0  ;;  %v8963_v33 = vpop.f32.mrb[115].mxu1 }
0x346e   :  { %v8926_v63 = vadd.f32 %v8925_v60, %v8924_v16  ;;  %v8964_v1 = vadd.f32 %v8963_v33, %v8962_v59 }
0x3470   :  { %v8101_v28 = vadd.f32 %v8926_v63, %v8026_v2  ;;  %v8927_v44 = vpop.f32.mrb[100].mxu0  ;;  %v8965_v27 = vpop.f32.mrb[116].mxu1 }
0x3471   :  { %v8928_v3 = vpop.f32.mrb[101].mxu0  ;;  %v8966_v29 = vpop.f32.mrb[117].mxu1 }
0x3472   :  { %v8176_v21 = vadd.f32 %v8964_v1, %v8101_v28  ;;  %v8929_v53 = vadd.f32 %v8928_v3, %v8927_v44  ;;  %v8967_v18 = vadd.f32 %v8966_v29, %v8965_v27 }
0x3474   :  { %v8106_v55 = vadd.f32 %v8929_v53, %v8031_v62 }
0x3476   :  { %v8181_v46 = vadd.f32 %v8967_v18, %v8106_v55 }
0x348d   :  { %v9000_v25 = vpop.f32.mrb[102].mxu0  ;;  %v9038_v36 = vpop.f32.mrb[118].mxu1 }
0x348e   :  { %v9001_v42 = vpop.f32.mrb[103].mxu0  ;;  %v9039_v11 = vpop.f32.mrb[119].mxu1 }
0x348f   :  { %v9002_v45 = vadd.f32 %v9001_v42, %v9000_v25  ;;  %v9040_v13 = vadd.f32 %v9039_v11, %v9038_v36 }
0x3491   :  { %v8251_v5 = vadd.f32 %v9002_v45, %v8176_v21  ;;  %v9003_v47 = vpop.f32.mrb[104].mxu0  ;;  %v9041_v48 = vpop.f32.mrb[120].mxu1 }
0x3492   :  { %v9004_v14 = vpop.f32.mrb[105].mxu0  ;;  %v9042_v26 = vpop.f32.mrb[121].mxu1 }
0x3493   :  { %v8326_v20 = vadd.f32 %v9040_v13, %v8251_v5  ;;  %v9005_v24 = vadd.f32 %v9004_v14, %v9003_v47  ;;  %v9043_v54 = vadd.f32 %v9042_v26, %v9041_v48 }
0x3495   :  { %v8334_v38 = vadd.f32 %v8326_v20, %v11396_v37  ;;  %v8256_v41 = vadd.f32 %v9005_v24, %v8181_v46 }
0x3497   :  { %v8343_v31 = vadd.f32 %v8521_v49, %v8334_v38  ;;  %v8331_v39 = vadd.f32 %v9043_v54, %v8256_v41 }
0x3499   :  { %8345 = vst.msk [vmem:[#allocation2] sm:$0xff] %vm89_vm0, %v8343_v31  ;;  %v8335_v32 = vadd.f32 %v8331_v39, %v11538_v22 }
0x349b   :  { %v8344_v30 = vadd.f32 %v8521_v49, %v8335_v32 }
0x349d   :  { %8346 = vst.msk [vmem:[#allocation2 + $0x8] sm:$0xff] %vm89_vm0, %v8344_v30 }
0x349e   :  { %10313 = shalt.err (!%p10310_p4)
}
0x349f   :  { %s10314_s29 = scalar_lea.hbm %s12770_s24, 256 }
0x34a0   :  { %p10315_p5 = scmp.ne.s32.totalorder %s12770_s24, %s10314_s29  ;;  %p10318_p6 = scmp.lt.u32.totalorder %s10314_s29, %s12770_s24 }
0x34a2   :  { %p10320_p7 = pnand %p10318_p6, %p10315_p5 }
0x34a4   :  { %10323 = shalt.err (!%p10320_p7)
}
0x34a5   :  { %s10336_s14 = smov 128   ;;  %s10337_s25 = smov 8  }
0x34a6   :  { %8358 = dma.vmem_to_hbm [thread:$0]  %s8353_s26, 256, %s12770_s24, [#allocation3], %s10336_s14, %s10336_s14, %s10337_s25  }
0x34a7   :  { %10324 = dma.done.wait [#allocation3], 256  }
0x34a8   :  { %10325 = vsyncadd [#allocation3], 4294967040 }
0x34a9   :  { %8362 = vsyncpa [#allocation3], 1 }

</bundles_post_ra>
